<compile_context>
chip_gen: v7x
topology: tpu7x:2x2x1
jax: 0.10.0
libtpu: 0.0.40
codegen_flags: <defaults>
</compile_context>

<pallas_src>
import functools
import math

import jax
import jax.numpy as jnp
from jax.experimental import pallas as pl
from jax.experimental.pallas import tpu as pltpu


def _round_up(x, m):
    return (x + m - 1) // m * m


# ----------------------------------------------------------------------------
# Fused conv-as-matmul Pallas kernel (transposed, channel-major layout)
# ----------------------------------------------------------------------------
def _conv_mm_kernel(x_ref, w_ref, b_ref, *rest, relu, has_res):
    """out^T = maybe_relu( W_folded @ x^T + bias [+ residual^T] ).

    x_ref: (K, tm) bf16    w_ref: (Cout, K) bf16    b_ref: (Cout, 1) f32
    rest = ([res_ref (Cout, tm) f32], o_ref (Cout, tm) f32)
    """
    o_ref = rest[-1]
    # Up-cast to f32 BEFORE the dot: F32 x F32 = F32 is supported everywhere
    # (the previous BF16 x BF16 = F32 dot failed on the execution backend).
    w = w_ref[...].astype(jnp.float32)
    x = x_ref[...].astype(jnp.float32)
    acc = jnp.dot(w, x, preferred_element_type=jnp.float32)
    acc = acc + b_ref[...]                      # BN bias (scale folded into W)
    if has_res:
        acc = acc + rest[0][...]                # residual add stays in f32
    if relu:
        acc = jnp.maximum(acc, 0.0)
    o_ref[...] = acc.astype(o_ref.dtype)


def fused_conv_matmul(x_t, w_t, bias, residual_t=None, relu=True):
    """x_t: (K, M) patches^T, w_t: (Cout, K) BN-folded weights,
    bias: (Cout,), residual_t: (Cout, M) or None.  Returns (Cout, M) f32."""
    K, M = x_t.shape
    Cout = w_t.shape[0]

    # Pad M up to a lane-dense multiple of 128, pick the largest tile <= 512.
    Mp = _round_up(M, 128)
    if Mp != M:
        x_t = jnp.pad(x_t, ((0, 0), (0, Mp - M)))
        if residual_t is not None:
            residual_t = jnp.pad(residual_t, ((0, 0), (0, Mp - M)))
    tm = 512 if Mp % 512 == 0 else (256 if Mp % 256 == 0 else 128)
    grid = (Mp // tm,)

    x_bf = x_t.astype(jnp.bfloat16)
    w_bf = w_t.astype(jnp.bfloat16)
    bias = bias.reshape(Cout, 1).astype(jnp.float32)

    in_specs = [
        pl.BlockSpec((K, tm), lambda i: (0, i)),        # patches tile (lane-dense)
        pl.BlockSpec((Cout, K), lambda i: (0, 0)),      # folded weights (resident)
        pl.BlockSpec((Cout, 1), lambda i: (0, 0)),      # BN bias
    ]
    args = [x_bf, w_bf, bias]
    has_res = residual_t is not None
    bytes_accessed = K * Mp * 2 + Cout * K * 2 + Cout * 4 + Cout * Mp * 4
    if has_res:
        in_specs.append(pl.BlockSpec((Cout, tm), lambda i: (0, i)))
        args.append(residual_t.astype(jnp.float32))
        bytes_accessed += Cout * Mp * 4

    kernel = functools.partial(_conv_mm_kernel, relu=relu, has_res=has_res)
    out = pl.pallas_call(
        kernel,
        out_shape=jax.ShapeDtypeStruct((Cout, Mp), jnp.float32),
        grid=grid,
        in_specs=in_specs,
        out_specs=pl.BlockSpec((Cout, tm), lambda i: (0, i)),
        compiler_params=pltpu.CompilerParams(
            dimension_semantics=("parallel",),          # shard M tiles across TCs
            vmem_limit_bytes=32 * 1024 * 1024),
        cost_estimate=pl.CostEstimate(
            flops=2 * Mp * K * Cout,
            transcendentals=0,
            bytes_accessed=bytes_accessed),
    )(*args)
    if Mp != M:
        out = out[:, :M]
    return out


# ----------------------------------------------------------------------------
# Fused global-average-pool + Linear head kernel
# ----------------------------------------------------------------------------
def _head_kernel(x_ref, w_ref, o_ref, *, inv_hw):
    # x: (C, N, HW) f32, w: (classes, C) f32 -> out: (classes, N) f32
    pooled_t = jnp.sum(x_ref[...], axis=2) * inv_hw          # (C, N)
    o_ref[...] = jnp.dot(w_ref[...], pooled_t,
                         preferred_element_type=jnp.float32)  # (classes, N)


def head_pool_linear(x_cnhw, w_lin):
    c, n, h, w = x_cnhw.shape
    classes = w_lin.shape[1]
    x3 = x_cnhw.reshape(c, n, h * w).astype(jnp.float32)
    w_t = jnp.transpose(w_lin).astype(jnp.float32)            # (classes, C)
    logits_t = pl.pallas_call(
        functools.partial(_head_kernel, inv_hw=1.0 / float(h * w)),
        out_shape=jax.ShapeDtypeStruct((classes, n), jnp.float32),
        grid=(1,),
        in_specs=[pl.BlockSpec((c, n, h * w), lambda i: (0, 0, 0)),
                  pl.BlockSpec((classes, c), lambda i: (0, 0))],
        out_specs=pl.BlockSpec((classes, n), lambda i: (0, 0)),
        compiler_params=pltpu.CompilerParams(
            dimension_semantics=("arbitrary",)),
    )(x3, w_t)
    return logits_t.T                                          # (N, classes)


# ----------------------------------------------------------------------------
# im2col glue in channel-major layout (pad + strided slices; matmul is Pallas)
# ----------------------------------------------------------------------------
def im2col_t(x_cnhw, kh, kw, stride, pad):
    """(C, N, H, W) -> patches^T (kh*kw*C, N*Ho*Wo), done in bf16."""
    c, n, h, w = x_cnhw.shape
    xb = x_cnhw.astype(jnp.bfloat16)
    xp = jnp.pad(xb, ((0, 0), (0, 0), (pad, pad), (pad, pad)))
    ho = (h + 2 * pad - kh) // stride + 1
    wo = (w + 2 * pad - kw) // stride + 1
    slices = []
    for dy in range(kh):
        for dx in range(kw):
            slices.append(
                xp[:, :, dy:dy + (ho - 1) * stride + 1:stride,
                         dx:dx + (wo - 1) * stride + 1:stride])
    p = jnp.stack(slices, axis=0)                 # (kh*kw, C, N, Ho, Wo)
    return p.reshape(kh * kw * c, n * ho * wo), ho, wo


def conv_bn(x_cnhw, w_hwio, bn_scale, bn_bias, *, stride, pad,
            residual=None, relu=True):
    kh, kw, cin, cout = w_hwio.shape
    _, n, _, _ = x_cnhw.shape
    patches_t, ho, wo = im2col_t(x_cnhw, kh, kw, stride, pad)
    # Fold BN scale into the (transposed) weights on the host side.
    w_t = w_hwio.reshape(kh * kw * cin, cout).T * bn_scale.reshape(cout, 1)
    res_t = None
    if residual is not None:
        res_t = residual.reshape(cout, n * ho * wo)
    out_t = fused_conv_matmul(patches_t, w_t, bn_bias, res_t, relu)
    return out_t.reshape(cout, n, ho, wo)


# ----------------------------------------------------------------------------
# Deterministic parameter init (kaiming_normal_, fan_in, gain=sqrt(2))
# ----------------------------------------------------------------------------
def _kaiming_conv(key, kh, kw, cin, cout):
    std = math.sqrt(2.0 / (kh * kw * cin))
    return jax.random.normal(key, (kh, kw, cin, cout), jnp.float32) * std


def _bn_params(c, eps=1e-5):
    # gamma=1, beta=0, running_mean=0, running_var=1  (fresh eval-mode BN)
    scale = jnp.full((c,), 1.0 / math.sqrt(1.0 + eps), jnp.float32)
    bias = jnp.zeros((c,), jnp.float32)
    return scale, bias


def init_params(key, inflate=1, classes=10):
    c1, c2, c3 = 16 * inflate, 32 * inflate, 64 * inflate
    ks = jax.random.split(key, 16)
    p = {}
    p["conv0"] = _kaiming_conv(ks[0], 3, 3, 3, 16)
    p["bn0"] = _bn_params(16)
    p["conv111"] = _kaiming_conv(ks[1], 3, 3, 16, c1)
    p["bn111"] = _bn_params(c1)
    p["conv112"] = _kaiming_conv(ks[2], 3, 3, c1, c1)
    p["bn112"] = _bn_params(c1)
    p["resconv21"] = _kaiming_conv(ks[3], 1, 1, c1, c2)
    p["resbn21"] = _bn_params(c2)
    p["conv211"] = _kaiming_conv(ks[4], 3, 3, c1, c2)
    p["bn211"] = _bn_params(c2)
    p["conv212"] = _kaiming_conv(ks[5], 3, 3, c2, c2)
    p["bn212"] = _bn_params(c2)
    p["resconv31"] = _kaiming_conv(ks[6], 1, 1, c2, c3)
    p["resbn31"] = _bn_params(c3)
    p["conv311"] = _kaiming_conv(ks[7], 3, 3, c2, c3)
    p["bn311"] = _bn_params(c3)
    p["conv312"] = _kaiming_conv(ks[8], 3, 3, c3, c3)
    p["bn312"] = _bn_params(c3)
    p["conv321"] = _kaiming_conv(ks[9], 3, 3, c3, c3)
    p["bn321"] = _bn_params(c3)
    p["conv322"] = _kaiming_conv(ks[10], 3, 3, c3, c3)
    p["bn322"] = _bn_params(c3)
    p["linear"] = jax.random.normal(ks[11], (c3, classes),
                                    jnp.float32) * math.sqrt(2.0 / c3)
    if inflate > 1:
        p["resconv11"] = _kaiming_conv(ks[12], 1, 1, 16, c1)
        p["resbn11"] = _bn_params(c1)
    return p


# ----------------------------------------------------------------------------
# Forward pass (eval-mode semantics of Model_NoisetoEveryConv)
# ----------------------------------------------------------------------------
def forward(params, x_nchw, inflate=1):
    # PyTorch NCHW -> channel-major (C, N, H, W) kernel layout.
    x = jnp.transpose(x_nchw, (1, 0, 2, 3)).astype(jnp.float32)

    # Stage 0
    out = conv_bn(x, params["conv0"], *params["bn0"], stride=1, pad=1, relu=True)

    # Block 1
    residual = out
    if inflate > 1:
        residual = conv_bn(residual, params["resconv11"], *params["resbn11"],
                           stride=1, pad=0, relu=False)
    out = conv_bn(out, params["conv111"], *params["bn111"], stride=1, pad=1,
                  relu=True)
    out = conv_bn(out, params["conv112"], *params["bn112"], stride=1, pad=1,
                  residual=residual, relu=True)

    # Block 2 (downsample x2)
    residual = conv_bn(out, params["resconv21"], *params["resbn21"],
                       stride=2, pad=0, relu=False)
    out = conv_bn(out, params["conv211"], *params["bn211"], stride=2, pad=1,
                  relu=True)
    out = conv_bn(out, params["conv212"], *params["bn212"], stride=1, pad=1,
                  residual=residual, relu=True)

    # Block 3 (downsample x2)
    residual = conv_bn(out, params["resconv31"], *params["resbn31"],
                       stride=2, pad=0, relu=False)
    out = conv_bn(out, params["conv311"], *params["bn311"], stride=2, pad=1,
                  relu=True)
    out = conv_bn(out, params["conv312"], *params["bn312"], stride=1, pad=1,
                  residual=residual, relu=True)

    # Block 4 (identity residual)
    residual = out
    out = conv_bn(out, params["conv321"], *params["bn321"], stride=1, pad=1,
                  relu=True)
    out = conv_bn(out, params["conv322"], *params["bn322"], stride=1, pad=1,
                  residual=residual, relu=True)

    # Fused global average pool + Linear (bias=False); noiselinear is identity.
    logits = head_pool_linear(out, params["linear"])
    return logits


if __name__ == "__main__":
    key = jax.random.PRNGKey(0)
    k_x, _ = jax.random.split(key)

    # Small CIFAR-like input: batch=2, 3 channels, 16x16 spatial (NCHW).
    x = jax.random.normal(k_x, (2, 3, 16, 16), jnp.float32)

    params = init_params(jax.random.PRNGKey(42), inflate=1, classes=10)

    fwd = jax.jit(functools.partial(forward, inflate=1))
    out = fwd(params, x)
    jax.block_until_ready(out)
    assert out.shape == (2, 10), out.shape
    print("KERNEL_OK")
</pallas_src>

<mosaic_0001>
module attributes {stable_mosaic.version = 11 : i64} {
  func.func @_conv_mm_kernel(%arg0: i32, %arg1: memref<27x512xbf16, #tpu.memory_space<vmem>>, %arg2: memref<16x27xbf16, #tpu.memory_space<vmem>>, %arg3: memref<16x1xf32, #tpu.memory_space<vmem>>, %arg4: memref<16x512xf32, #tpu.memory_space<vmem>>) attributes {dimension_semantics = [#tpu.dimension_semantics<parallel>], iteration_bounds = array<i64: 1>, scalar_prefetch = 0 : i64, scratch_operands = 0 : i64, tpu.core_type = #tpu.core_type<tc>, window_params = [{transform_indices = @transform_0, window_bounds = array<i64: 27, 512>}, {pipeline_mode = #tpu.pipeline_mode<synchronous>, transform_indices = @transform_1, window_bounds = array<i64: 16, 27>}, {pipeline_mode = #tpu.pipeline_mode<synchronous>, transform_indices = @transform_2, window_bounds = array<i64: 16, 1>}, {transform_indices = @transform_3, window_bounds = array<i64: 16, 512>}]} {
    %c0 = arith.constant 0 : index
    %c0_0 = arith.constant 0 : index
    %0 = vector.load %arg2[%c0, %c0_0] : memref<16x27xbf16, #tpu.memory_space<vmem>>, vector<16x27xbf16>
    %1 = arith.extf %0 : vector<16x27xbf16> to vector<16x27xf32>
    %c0_1 = arith.constant 0 : index
    %c0_2 = arith.constant 0 : index
    %2 = vector.load %arg1[%c0_1, %c0_2] : memref<27x512xbf16, #tpu.memory_space<vmem>>, vector<27x512xbf16>
    %3 = arith.extf %2 : vector<27x512xbf16> to vector<27x512xf32>
    %cst = arith.constant dense<0.000000e+00> : vector<16x512xf32>
    %4 = tpu.matmul %1, %3, %cst {dimension_numbers = #tpu.dot_dimension_numbers<[1], [0], [0], [1], [0, 0, 1, 1], [], []>} : vector<16x27xf32>, vector<27x512xf32>, vector<16x512xf32> -> vector<16x512xf32>
    %c0_3 = arith.constant 0 : index
    %c0_4 = arith.constant 0 : index
    %5 = vector.load %arg3[%c0_3, %c0_4] : memref<16x1xf32, #tpu.memory_space<vmem>>, vector<16x1xf32>
    %6 = vector.broadcast %5 : vector<16x1xf32> to vector<16x512xf32>
    %7 = arith.addf %4, %6 : vector<16x512xf32>
    %cst_5 = arith.constant 0.000000e+00 : f32
    %8 = vector.broadcast %cst_5 : f32 to vector<16x512xf32>
    %9 = arith.maximumf %7, %8 : vector<16x512xf32>
    %c0_6 = arith.constant 0 : index
    %c0_7 = arith.constant 0 : index
    %10 = vector.load %arg4[%c0_6, %c0_7] : memref<16x512xf32, #tpu.memory_space<vmem>>, vector<16x512xf32>
    tpu.vector_store %arg4[%c0_6, %c0_7], %9 {strides = array<i32>} : memref<16x512xf32, #tpu.memory_space<vmem>>, vector<16x512xf32>,
    return
  }
  func.func @transform_0(%arg0: i32) -> (i32, i32) {
    %c0_i32 = arith.constant 0 : i32
    %c0_i32_0 = arith.constant 0 : i32
    return %c0_i32, %arg0 : i32, i32
  }
  func.func @transform_1(%arg0: i32) -> (i32, i32) {
    %c0_i32 = arith.constant 0 : i32
    %c0_i32_0 = arith.constant 0 : i32
    %c0_i32_1 = arith.constant 0 : i32
    return %c0_i32, %c0_i32_0 : i32, i32
  }
  func.func @transform_2(%arg0: i32) -> (i32, i32) {
    %c0_i32 = arith.constant 0 : i32
    %c0_i32_0 = arith.constant 0 : i32
    %c0_i32_1 = arith.constant 0 : i32
    return %c0_i32, %c0_i32_0 : i32, i32
  }
  func.func @transform_3(%arg0: i32) -> (i32, i32) {
    %c0_i32 = arith.constant 0 : i32
    %c0_i32_0 = arith.constant 0 : i32
    return %c0_i32, %arg0 : i32, i32
  }
}

module attributes {stable_mosaic.version = 11 : i64} {
  func.func @_conv_mm_kernel(%arg0: i32, %arg1: memref<144x512xbf16, #tpu.memory_space<vmem>>, %arg2: memref<16x144xbf16, #tpu.memory_space<vmem>>, %arg3: memref<16x1xf32, #tpu.memory_space<vmem>>, %arg4: memref<16x512xf32, #tpu.memory_space<vmem>>, %arg5: memref<16x512xf32, #tpu.memory_space<vmem>>) attributes {dimension_semantics = [#tpu.dimension_semantics<parallel>], iteration_bounds = array<i64: 1>, scalar_prefetch = 0 : i64, scratch_operands = 0 : i64, tpu.core_type = #tpu.core_type<tc>, window_params = [{transform_indices = @transform_0, window_bounds = array<i64: 144, 512>}, {pipeline_mode = #tpu.pipeline_mode<synchronous>, transform_indices = @transform_1, window_bounds = array<i64: 16, 144>}, {pipeline_mode = #tpu.pipeline_mode<synchronous>, transform_indices = @transform_2, window_bounds = array<i64: 16, 1>}, {transform_indices = @transform_3, window_bounds = array<i64: 16, 512>}, {transform_indices = @transform_4, window_bounds = array<i64: 16, 512>}]} {
    %c0 = arith.constant 0 : index
    %c0_0 = arith.constant 0 : index
    %0 = vector.load %arg2[%c0, %c0_0] : memref<16x144xbf16, #tpu.memory_space<vmem>>, vector<16x144xbf16>
    %1 = arith.extf %0 : vector<16x144xbf16> to vector<16x144xf32>
    %c0_1 = arith.constant 0 : index
    %c0_2 = arith.constant 0 : index
    %2 = vector.load %arg1[%c0_1, %c0_2] : memref<144x512xbf16, #tpu.memory_space<vmem>>, vector<144x512xbf16>
    %3 = arith.extf %2 : vector<144x512xbf16> to vector<144x512xf32>
    %cst = arith.constant dense<0.000000e+00> : vector<16x512xf32>
    %4 = tpu.matmul %1, %3, %cst {dimension_numbers = #tpu.dot_dimension_numbers<[1], [0], [0], [1], [0, 0, 1, 1], [], []>} : vector<16x144xf32>, vector<144x512xf32>, vector<16x512xf32> -> vector<16x512xf32>
    %c0_3 = arith.constant 0 : index
    %c0_4 = arith.constant 0 : index
    %5 = vector.load %arg3[%c0_3, %c0_4] : memref<16x1xf32, #tpu.memory_space<vmem>>, vector<16x1xf32>
    %6 = vector.broadcast %5 : vector<16x1xf32> to vector<16x512xf32>
    %7 = arith.addf %4, %6 : vector<16x512xf32>
    %c0_5 = arith.constant 0 : index
    %c0_6 = arith.constant 0 : index
    %8 = vector.load %arg4[%c0_5, %c0_6] : memref<16x512xf32, #tpu.memory_space<vmem>>, vector<16x512xf32>
    %9 = arith.addf %7, %8 : vector<16x512xf32>
    %cst_7 = arith.constant 0.000000e+00 : f32
    %10 = vector.broadcast %cst_7 : f32 to vector<16x512xf32>
    %11 = arith.maximumf %9, %10 : vector<16x512xf32>
    %c0_8 = arith.constant 0 : index
    %c0_9 = arith.constant 0 : index
    %12 = vector.load %arg5[%c0_8, %c0_9] : memref<16x512xf32, #tpu.memory_space<vmem>>, vector<16x512xf32>
    tpu.vector_store %arg5[%c0_8, %c0_9], %11 {strides = array<i32>} : memref<16x512xf32, #tpu.memory_space<vmem>>, vector<16x512xf32>,
    return
  }
  func.func @transform_0(%arg0: i32) -> (i32, i32) {
    %c0_i32 = arith.constant 0 : i32
    %c0_i32_0 = arith.constant 0 : i32
    return %c0_i32, %arg0 : i32, i32
  }
  func.func @transform_1(%arg0: i32) -> (i32, i32) {
    %c0_i32 = arith.constant 0 : i32
    %c0_i32_0 = arith.constant 0 : i32
    %c0_i32_1 = arith.constant 0 : i32
    return %c0_i32, %c0_i32_0 : i32, i32
  }
  func.func @transform_2(%arg0: i32) -> (i32, i32) {
    %c0_i32 = arith.constant 0 : i32
    %c0_i32_0 = arith.constant 0 : i32
    %c0_i32_1 = arith.constant 0 : i32
    return %c0_i32, %c0_i32_0 : i32, i32
  }
  func.func @transform_3(%arg0: i32) -> (i32, i32) {
    %c0_i32 = arith.constant 0 : i32
    %c0_i32_0 = arith.constant 0 : i32
    return %c0_i32, %arg0 : i32, i32
  }
  func.func @transform_4(%arg0: i32) -> (i32, i32) {
    %c0_i32 = arith.constant 0 : i32
    %c0_i32_0 = arith.constant 0 : i32
    return %c0_i32, %arg0 : i32, i32
  }
}

module attributes {stable_mosaic.version = 11 : i64} {
  func.func @_conv_mm_kernel(%arg0: i32, %arg1: memref<144x512xbf16, #tpu.memory_space<vmem>>, %arg2: memref<16x144xbf16, #tpu.memory_space<vmem>>, %arg3: memref<16x1xf32, #tpu.memory_space<vmem>>, %arg4: memref<16x512xf32, #tpu.memory_space<vmem>>) attributes {dimension_semantics = [#tpu.dimension_semantics<parallel>], iteration_bounds = array<i64: 1>, scalar_prefetch = 0 : i64, scratch_operands = 0 : i64, tpu.core_type = #tpu.core_type<tc>, window_params = [{transform_indices = @transform_0, window_bounds = array<i64: 144, 512>}, {pipeline_mode = #tpu.pipeline_mode<synchronous>, transform_indices = @transform_1, window_bounds = array<i64: 16, 144>}, {pipeline_mode = #tpu.pipeline_mode<synchronous>, transform_indices = @transform_2, window_bounds = array<i64: 16, 1>}, {transform_indices = @transform_3, window_bounds = array<i64: 16, 512>}]} {
    %c0 = arith.constant 0 : index
    %c0_0 = arith.constant 0 : index
    %0 = vector.load %arg2[%c0, %c0_0] : memref<16x144xbf16, #tpu.memory_space<vmem>>, vector<16x144xbf16>
    %1 = arith.extf %0 : vector<16x144xbf16> to vector<16x144xf32>
    %c0_1 = arith.constant 0 : index
    %c0_2 = arith.constant 0 : index
    %2 = vector.load %arg1[%c0_1, %c0_2] : memref<144x512xbf16, #tpu.memory_space<vmem>>, vector<144x512xbf16>
    %3 = arith.extf %2 : vector<144x512xbf16> to vector<144x512xf32>
    %cst = arith.constant dense<0.000000e+00> : vector<16x512xf32>
    %4 = tpu.matmul %1, %3, %cst {dimension_numbers = #tpu.dot_dimension_numbers<[1], [0], [0], [1], [0, 0, 1, 1], [], []>} : vector<16x144xf32>, vector<144x512xf32>, vector<16x512xf32> -> vector<16x512xf32>
    %c0_3 = arith.constant 0 : index
    %c0_4 = arith.constant 0 : index
    %5 = vector.load %arg3[%c0_3, %c0_4] : memref<16x1xf32, #tpu.memory_space<vmem>>, vector<16x1xf32>
    %6 = vector.broadcast %5 : vector<16x1xf32> to vector<16x512xf32>
    %7 = arith.addf %4, %6 : vector<16x512xf32>
    %cst_5 = arith.constant 0.000000e+00 : f32
    %8 = vector.broadcast %cst_5 : f32 to vector<16x512xf32>
    %9 = arith.maximumf %7, %8 : vector<16x512xf32>
    %c0_6 = arith.constant 0 : index
    %c0_7 = arith.constant 0 : index
    %10 = vector.load %arg4[%c0_6, %c0_7] : memref<16x512xf32, #tpu.memory_space<vmem>>, vector<16x512xf32>
    tpu.vector_store %arg4[%c0_6, %c0_7], %9 {strides = array<i32>} : memref<16x512xf32, #tpu.memory_space<vmem>>, vector<16x512xf32>,
    return
  }
  func.func @transform_0(%arg0: i32) -> (i32, i32) {
    %c0_i32 = arith.constant 0 : i32
    %c0_i32_0 = arith.constant 0 : i32
    return %c0_i32, %arg0 : i32, i32
  }
  func.func @transform_1(%arg0: i32) -> (i32, i32) {
    %c0_i32 = arith.constant 0 : i32
    %c0_i32_0 = arith.constant 0 : i32
    %c0_i32_1 = arith.constant 0 : i32
    return %c0_i32, %c0_i32_0 : i32, i32
  }
  func.func @transform_2(%arg0: i32) -> (i32, i32) {
    %c0_i32 = arith.constant 0 : i32
    %c0_i32_0 = arith.constant 0 : i32
    %c0_i32_1 = arith.constant 0 : i32
    return %c0_i32, %c0_i32_0 : i32, i32
  }
  func.func @transform_3(%arg0: i32) -> (i32, i32) {
    %c0_i32 = arith.constant 0 : i32
    %c0_i32_0 = arith.constant 0 : i32
    return %c0_i32, %arg0 : i32, i32
  }
}

module attributes {stable_mosaic.version = 11 : i64} {
  func.func @_conv_mm_kernel(%arg0: i32, %arg1: memref<144x128xbf16, #tpu.memory_space<vmem>>, %arg2: memref<32x144xbf16, #tpu.memory_space<vmem>>, %arg3: memref<32x1xf32, #tpu.memory_space<vmem>>, %arg4: memref<32x128xf32, #tpu.memory_space<vmem>>) attributes {dimension_semantics = [#tpu.dimension_semantics<parallel>], iteration_bounds = array<i64: 1>, scalar_prefetch = 0 : i64, scratch_operands = 0 : i64, tpu.core_type = #tpu.core_type<tc>, window_params = [{transform_indices = @transform_0, window_bounds = array<i64: 144, 128>}, {pipeline_mode = #tpu.pipeline_mode<synchronous>, transform_indices = @transform_1, window_bounds = array<i64: 32, 144>}, {pipeline_mode = #tpu.pipeline_mode<synchronous>, transform_indices = @transform_2, window_bounds = array<i64: 32, 1>}, {transform_indices = @transform_3, window_bounds = array<i64: 32, 128>}]} {
    %c0 = arith.constant 0 : index
    %c0_0 = arith.constant 0 : index
    %0 = vector.load %arg2[%c0, %c0_0] : memref<32x144xbf16, #tpu.memory_space<vmem>>, vector<32x144xbf16>
    %1 = arith.extf %0 : vector<32x144xbf16> to vector<32x144xf32>
    %c0_1 = arith.constant 0 : index
    %c0_2 = arith.constant 0 : index
    %2 = vector.load %arg1[%c0_1, %c0_2] : memref<144x128xbf16, #tpu.memory_space<vmem>>, vector<144x128xbf16>
    %3 = arith.extf %2 : vector<144x128xbf16> to vector<144x128xf32>
    %cst = arith.constant dense<0.000000e+00> : vector<32x128xf32>
    %4 = tpu.matmul %1, %3, %cst {dimension_numbers = #tpu.dot_dimension_numbers<[1], [0], [0], [1], [0, 0, 1, 1], [], []>} : vector<32x144xf32>, vector<144x128xf32>, vector<32x128xf32> -> vector<32x128xf32>
    %c0_3 = arith.constant 0 : index
    %c0_4 = arith.constant 0 : index
    %5 = vector.load %arg3[%c0_3, %c0_4] : memref<32x1xf32, #tpu.memory_space<vmem>>, vector<32x1xf32>
    %6 = vector.broadcast %5 : vector<32x1xf32> to vector<32x128xf32>
    %7 = arith.addf %4, %6 : vector<32x128xf32>
    %cst_5 = arith.constant 0.000000e+00 : f32
    %8 = vector.broadcast %cst_5 : f32 to vector<32x128xf32>
    %9 = arith.maximumf %7, %8 : vector<32x128xf32>
    %c0_6 = arith.constant 0 : index
    %c0_7 = arith.constant 0 : index
    %10 = vector.load %arg4[%c0_6, %c0_7] : memref<32x128xf32, #tpu.memory_space<vmem>>, vector<32x128xf32>
    tpu.vector_store %arg4[%c0_6, %c0_7], %9 {strides = array<i32>} : memref<32x128xf32, #tpu.memory_space<vmem>>, vector<32x128xf32>,
    return
  }
  func.func @transform_0(%arg0: i32) -> (i32, i32) {
    %c0_i32 = arith.constant 0 : i32
    %c0_i32_0 = arith.constant 0 : i32
    return %c0_i32, %arg0 : i32, i32
  }
  func.func @transform_1(%arg0: i32) -> (i32, i32) {
    %c0_i32 = arith.constant 0 : i32
    %c0_i32_0 = arith.constant 0 : i32
    %c0_i32_1 = arith.constant 0 : i32
    return %c0_i32, %c0_i32_0 : i32, i32
  }
  func.func @transform_2(%arg0: i32) -> (i32, i32) {
    %c0_i32 = arith.constant 0 : i32
    %c0_i32_0 = arith.constant 0 : i32
    %c0_i32_1 = arith.constant 0 : i32
    return %c0_i32, %c0_i32_0 : i32, i32
  }
  func.func @transform_3(%arg0: i32) -> (i32, i32) {
    %c0_i32 = arith.constant 0 : i32
    %c0_i32_0 = arith.constant 0 : i32
    return %c0_i32, %arg0 : i32, i32
  }
}

module attributes {stable_mosaic.version = 11 : i64} {
  func.func @_conv_mm_kernel(%arg0: i32, %arg1: memref<16x128xbf16, #tpu.memory_space<vmem>>, %arg2: memref<32x16xbf16, #tpu.memory_space<vmem>>, %arg3: memref<32x1xf32, #tpu.memory_space<vmem>>, %arg4: memref<32x128xf32, #tpu.memory_space<vmem>>) attributes {dimension_semantics = [#tpu.dimension_semantics<parallel>], iteration_bounds = array<i64: 1>, scalar_prefetch = 0 : i64, scratch_operands = 0 : i64, tpu.core_type = #tpu.core_type<tc>, window_params = [{transform_indices = @transform_0, window_bounds = array<i64: 16, 128>}, {pipeline_mode = #tpu.pipeline_mode<synchronous>, transform_indices = @transform_1, window_bounds = array<i64: 32, 16>}, {pipeline_mode = #tpu.pipeline_mode<synchronous>, transform_indices = @transform_2, window_bounds = array<i64: 32, 1>}, {transform_indices = @transform_3, window_bounds = array<i64: 32, 128>}]} {
    %c0 = arith.constant 0 : index
    %c0_0 = arith.constant 0 : index
    %0 = vector.load %arg2[%c0, %c0_0] : memref<32x16xbf16, #tpu.memory_space<vmem>>, vector<32x16xbf16>
    %1 = arith.extf %0 : vector<32x16xbf16> to vector<32x16xf32>
    %c0_1 = arith.constant 0 : index
    %c0_2 = arith.constant 0 : index
    %2 = vector.load %arg1[%c0_1, %c0_2] : memref<16x128xbf16, #tpu.memory_space<vmem>>, vector<16x128xbf16>
    %3 = arith.extf %2 : vector<16x128xbf16> to vector<16x128xf32>
    %cst = arith.constant dense<0.000000e+00> : vector<32x128xf32>
    %4 = tpu.matmul %1, %3, %cst {dimension_numbers = #tpu.dot_dimension_numbers<[1], [0], [0], [1], [0, 0, 1, 1], [], []>} : vector<32x16xf32>, vector<16x128xf32>, vector<32x128xf32> -> vector<32x128xf32>
    %c0_3 = arith.constant 0 : index
    %c0_4 = arith.constant 0 : index
    %5 = vector.load %arg3[%c0_3, %c0_4] : memref<32x1xf32, #tpu.memory_space<vmem>>, vector<32x1xf32>
    %6 = vector.broadcast %5 : vector<32x1xf32> to vector<32x128xf32>
    %7 = arith.addf %4, %6 : vector<32x128xf32>
    %c0_5 = arith.constant 0 : index
    %c0_6 = arith.constant 0 : index
    %8 = vector.load %arg4[%c0_5, %c0_6] : memref<32x128xf32, #tpu.memory_space<vmem>>, vector<32x128xf32>
    tpu.vector_store %arg4[%c0_5, %c0_6], %7 {strides = array<i32>} : memref<32x128xf32, #tpu.memory_space<vmem>>, vector<32x128xf32>,
    return
  }
  func.func @transform_0(%arg0: i32) -> (i32, i32) {
    %c0_i32 = arith.constant 0 : i32
    %c0_i32_0 = arith.constant 0 : i32
    return %c0_i32, %arg0 : i32, i32
  }
  func.func @transform_1(%arg0: i32) -> (i32, i32) {
    %c0_i32 = arith.constant 0 : i32
    %c0_i32_0 = arith.constant 0 : i32
    %c0_i32_1 = arith.constant 0 : i32
    return %c0_i32, %c0_i32_0 : i32, i32
  }
  func.func @transform_2(%arg0: i32) -> (i32, i32) {
    %c0_i32 = arith.constant 0 : i32
    %c0_i32_0 = arith.constant 0 : i32
    %c0_i32_1 = arith.constant 0 : i32
    return %c0_i32, %c0_i32_0 : i32, i32
  }
  func.func @transform_3(%arg0: i32) -> (i32, i32) {
    %c0_i32 = arith.constant 0 : i32
    %c0_i32_0 = arith.constant 0 : i32
    return %c0_i32, %arg0 : i32, i32
  }
}

module attributes {stable_mosaic.version = 11 : i64} {
  func.func @_conv_mm_kernel(%arg0: i32, %arg1: memref<288x128xbf16, #tpu.memory_space<vmem>>, %arg2: memref<32x288xbf16, #tpu.memory_space<vmem>>, %arg3: memref<32x1xf32, #tpu.memory_space<vmem>>, %arg4: memref<32x128xf32, #tpu.memory_space<vmem>>, %arg5: memref<32x128xf32, #tpu.memory_space<vmem>>) attributes {dimension_semantics = [#tpu.dimension_semantics<parallel>], iteration_bounds = array<i64: 1>, scalar_prefetch = 0 : i64, scratch_operands = 0 : i64, tpu.core_type = #tpu.core_type<tc>, window_params = [{transform_indices = @transform_0, window_bounds = array<i64: 288, 128>}, {pipeline_mode = #tpu.pipeline_mode<synchronous>, transform_indices = @transform_1, window_bounds = array<i64: 32, 288>}, {pipeline_mode = #tpu.pipeline_mode<synchronous>, transform_indices = @transform_2, window_bounds = array<i64: 32, 1>}, {transform_indices = @transform_3, window_bounds = array<i64: 32, 128>}, {transform_indices = @transform_4, window_bounds = array<i64: 32, 128>}]} {
    %c0 = arith.constant 0 : index
    %c0_0 = arith.constant 0 : index
    %0 = vector.load %arg2[%c0, %c0_0] : memref<32x288xbf16, #tpu.memory_space<vmem>>, vector<32x288xbf16>
    %1 = arith.extf %0 : vector<32x288xbf16> to vector<32x288xf32>
    %c0_1 = arith.constant 0 : index
    %c0_2 = arith.constant 0 : index
    %2 = vector.load %arg1[%c0_1, %c0_2] : memref<288x128xbf16, #tpu.memory_space<vmem>>, vector<288x128xbf16>
    %3 = arith.extf %2 : vector<288x128xbf16> to vector<288x128xf32>
    %cst = arith.constant dense<0.000000e+00> : vector<32x128xf32>
    %4 = tpu.matmul %1, %3, %cst {dimension_numbers = #tpu.dot_dimension_numbers<[1], [0], [0], [1], [0, 0, 1, 1], [], []>} : vector<32x288xf32>, vector<288x128xf32>, vector<32x128xf32> -> vector<32x128xf32>
    %c0_3 = arith.constant 0 : index
    %c0_4 = arith.constant 0 : index
    %5 = vector.load %arg3[%c0_3, %c0_4] : memref<32x1xf32, #tpu.memory_space<vmem>>, vector<32x1xf32>
    %6 = vector.broadcast %5 : vector<32x1xf32> to vector<32x128xf32>
    %7 = arith.addf %4, %6 : vector<32x128xf32>
    %c0_5 = arith.constant 0 : index
    %c0_6 = arith.constant 0 : index
    %8 = vector.load %arg4[%c0_5, %c0_6] : memref<32x128xf32, #tpu.memory_space<vmem>>, vector<32x128xf32>
    %9 = arith.addf %7, %8 : vector<32x128xf32>
    %cst_7 = arith.constant 0.000000e+00 : f32
    %10 = vector.broadcast %cst_7 : f32 to vector<32x128xf32>
    %11 = arith.maximumf %9, %10 : vector<32x128xf32>
    %c0_8 = arith.constant 0 : index
    %c0_9 = arith.constant 0 : index
    %12 = vector.load %arg5[%c0_8, %c0_9] : memref<32x128xf32, #tpu.memory_space<vmem>>, vector<32x128xf32>
    tpu.vector_store %arg5[%c0_8, %c0_9], %11 {strides = array<i32>} : memref<32x128xf32, #tpu.memory_space<vmem>>, vector<32x128xf32>,
    return
  }
  func.func @transform_0(%arg0: i32) -> (i32, i32) {
    %c0_i32 = arith.constant 0 : i32
    %c0_i32_0 = arith.constant 0 : i32
    return %c0_i32, %arg0 : i32, i32
  }
  func.func @transform_1(%arg0: i32) -> (i32, i32) {
    %c0_i32 = arith.constant 0 : i32
    %c0_i32_0 = arith.constant 0 : i32
    %c0_i32_1 = arith.constant 0 : i32
    return %c0_i32, %c0_i32_0 : i32, i32
  }
  func.func @transform_2(%arg0: i32) -> (i32, i32) {
    %c0_i32 = arith.constant 0 : i32
    %c0_i32_0 = arith.constant 0 : i32
    %c0_i32_1 = arith.constant 0 : i32
    return %c0_i32, %c0_i32_0 : i32, i32
  }
  func.func @transform_3(%arg0: i32) -> (i32, i32) {
    %c0_i32 = arith.constant 0 : i32
    %c0_i32_0 = arith.constant 0 : i32
    return %c0_i32, %arg0 : i32, i32
  }
  func.func @transform_4(%arg0: i32) -> (i32, i32) {
    %c0_i32 = arith.constant 0 : i32
    %c0_i32_0 = arith.constant 0 : i32
    return %c0_i32, %arg0 : i32, i32
  }
}

module attributes {stable_mosaic.version = 11 : i64} {
  func.func @_conv_mm_kernel(%arg0: i32, %arg1: memref<288x128xbf16, #tpu.memory_space<vmem>>, %arg2: memref<64x288xbf16, #tpu.memory_space<vmem>>, %arg3: memref<64x1xf32, #tpu.memory_space<vmem>>, %arg4: memref<64x128xf32, #tpu.memory_space<vmem>>) attributes {dimension_semantics = [#tpu.dimension_semantics<parallel>], iteration_bounds = array<i64: 1>, scalar_prefetch = 0 : i64, scratch_operands = 0 : i64, tpu.core_type = #tpu.core_type<tc>, window_params = [{transform_indices = @transform_0, window_bounds = array<i64: 288, 128>}, {pipeline_mode = #tpu.pipeline_mode<synchronous>, transform_indices = @transform_1, window_bounds = array<i64: 64, 288>}, {pipeline_mode = #tpu.pipeline_mode<synchronous>, transform_indices = @transform_2, window_bounds = array<i64: 64, 1>}, {transform_indices = @transform_3, window_bounds = array<i64: 64, 128>}]} {
    %c0 = arith.constant 0 : index
    %c0_0 = arith.constant 0 : index
    %0 = vector.load %arg2[%c0, %c0_0] : memref<64x288xbf16, #tpu.memory_space<vmem>>, vector<64x288xbf16>
    %1 = arith.extf %0 : vector<64x288xbf16> to vector<64x288xf32>
    %c0_1 = arith.constant 0 : index
    %c0_2 = arith.constant 0 : index
    %2 = vector.load %arg1[%c0_1, %c0_2] : memref<288x128xbf16, #tpu.memory_space<vmem>>, vector<288x128xbf16>
    %3 = arith.extf %2 : vector<288x128xbf16> to vector<288x128xf32>
    %cst = arith.constant dense<0.000000e+00> : vector<64x128xf32>
    %4 = tpu.matmul %1, %3, %cst {dimension_numbers = #tpu.dot_dimension_numbers<[1], [0], [0], [1], [0, 0, 1, 1], [], []>} : vector<64x288xf32>, vector<288x128xf32>, vector<64x128xf32> -> vector<64x128xf32>
    %c0_3 = arith.constant 0 : index
    %c0_4 = arith.constant 0 : index
    %5 = vector.load %arg3[%c0_3, %c0_4] : memref<64x1xf32, #tpu.memory_space<vmem>>, vector<64x1xf32>
    %6 = vector.broadcast %5 : vector<64x1xf32> to vector<64x128xf32>
    %7 = arith.addf %4, %6 : vector<64x128xf32>
    %cst_5 = arith.constant 0.000000e+00 : f32
    %8 = vector.broadcast %cst_5 : f32 to vector<64x128xf32>
    %9 = arith.maximumf %7, %8 : vector<64x128xf32>
    %c0_6 = arith.constant 0 : index
    %c0_7 = arith.constant 0 : index
    %10 = vector.load %arg4[%c0_6, %c0_7] : memref<64x128xf32, #tpu.memory_space<vmem>>, vector<64x128xf32>
    tpu.vector_store %arg4[%c0_6, %c0_7], %9 {strides = array<i32>} : memref<64x128xf32, #tpu.memory_space<vmem>>, vector<64x128xf32>,
    return
  }
  func.func @transform_0(%arg0: i32) -> (i32, i32) {
    %c0_i32 = arith.constant 0 : i32
    %c0_i32_0 = arith.constant 0 : i32
    return %c0_i32, %arg0 : i32, i32
  }
  func.func @transform_1(%arg0: i32) -> (i32, i32) {
    %c0_i32 = arith.constant 0 : i32
    %c0_i32_0 = arith.constant 0 : i32
    %c0_i32_1 = arith.constant 0 : i32
    return %c0_i32, %c0_i32_0 : i32, i32
  }
  func.func @transform_2(%arg0: i32) -> (i32, i32) {
    %c0_i32 = arith.constant 0 : i32
    %c0_i32_0 = arith.constant 0 : i32
    %c0_i32_1 = arith.constant 0 : i32
    return %c0_i32, %c0_i32_0 : i32, i32
  }
  func.func @transform_3(%arg0: i32) -> (i32, i32) {
    %c0_i32 = arith.constant 0 : i32
    %c0_i32_0 = arith.constant 0 : i32
    return %c0_i32, %arg0 : i32, i32
  }
}

module attributes {stable_mosaic.version = 11 : i64} {
  func.func @_conv_mm_kernel(%arg0: i32, %arg1: memref<32x128xbf16, #tpu.memory_space<vmem>>, %arg2: memref<64x32xbf16, #tpu.memory_space<vmem>>, %arg3: memref<64x1xf32, #tpu.memory_space<vmem>>, %arg4: memref<64x128xf32, #tpu.memory_space<vmem>>) attributes {dimension_semantics = [#tpu.dimension_semantics<parallel>], iteration_bounds = array<i64: 1>, scalar_prefetch = 0 : i64, scratch_operands = 0 : i64, tpu.core_type = #tpu.core_type<tc>, window_params = [{transform_indices = @transform_0, window_bounds = array<i64: 32, 128>}, {pipeline_mode = #tpu.pipeline_mode<synchronous>, transform_indices = @transform_1, window_bounds = array<i64: 64, 32>}, {pipeline_mode = #tpu.pipeline_mode<synchronous>, transform_indices = @transform_2, window_bounds = array<i64: 64, 1>}, {transform_indices = @transform_3, window_bounds = array<i64: 64, 128>}]} {
    %c0 = arith.constant 0 : index
    %c0_0 = arith.constant 0 : index
    %0 = vector.load %arg2[%c0, %c0_0] : memref<64x32xbf16, #tpu.memory_space<vmem>>, vector<64x32xbf16>
    %1 = arith.extf %0 : vector<64x32xbf16> to vector<64x32xf32>
    %c0_1 = arith.constant 0 : index
    %c0_2 = arith.constant 0 : index
    %2 = vector.load %arg1[%c0_1, %c0_2] : memref<32x128xbf16, #tpu.memory_space<vmem>>, vector<32x128xbf16>
    %3 = arith.extf %2 : vector<32x128xbf16> to vector<32x128xf32>
    %cst = arith.constant dense<0.000000e+00> : vector<64x128xf32>
    %4 = tpu.matmul %1, %3, %cst {dimension_numbers = #tpu.dot_dimension_numbers<[1], [0], [0], [1], [0, 0, 1, 1], [], []>} : vector<64x32xf32>, vector<32x128xf32>, vector<64x128xf32> -> vector<64x128xf32>
    %c0_3 = arith.constant 0 : index
    %c0_4 = arith.constant 0 : index
    %5 = vector.load %arg3[%c0_3, %c0_4] : memref<64x1xf32, #tpu.memory_space<vmem>>, vector<64x1xf32>
    %6 = vector.broadcast %5 : vector<64x1xf32> to vector<64x128xf32>
    %7 = arith.addf %4, %6 : vector<64x128xf32>
    %c0_5 = arith.constant 0 : index
    %c0_6 = arith.constant 0 : index
    %8 = vector.load %arg4[%c0_5, %c0_6] : memref<64x128xf32, #tpu.memory_space<vmem>>, vector<64x128xf32>
    tpu.vector_store %arg4[%c0_5, %c0_6], %7 {strides = array<i32>} : memref<64x128xf32, #tpu.memory_space<vmem>>, vector<64x128xf32>,
    return
  }
  func.func @transform_0(%arg0: i32) -> (i32, i32) {
    %c0_i32 = arith.constant 0 : i32
    %c0_i32_0 = arith.constant 0 : i32
    return %c0_i32, %arg0 : i32, i32
  }
  func.func @transform_1(%arg0: i32) -> (i32, i32) {
    %c0_i32 = arith.constant 0 : i32
    %c0_i32_0 = arith.constant 0 : i32
    %c0_i32_1 = arith.constant 0 : i32
    return %c0_i32, %c0_i32_0 : i32, i32
  }
  func.func @transform_2(%arg0: i32) -> (i32, i32) {
    %c0_i32 = arith.constant 0 : i32
    %c0_i32_0 = arith.constant 0 : i32
    %c0_i32_1 = arith.constant 0 : i32
    return %c0_i32, %c0_i32_0 : i32, i32
  }
  func.func @transform_3(%arg0: i32) -> (i32, i32) {
    %c0_i32 = arith.constant 0 : i32
    %c0_i32_0 = arith.constant 0 : i32
    return %c0_i32, %arg0 : i32, i32
  }
}

module attributes {stable_mosaic.version = 11 : i64} {
  func.func @_conv_mm_kernel(%arg0: i32, %arg1: memref<576x128xbf16, #tpu.memory_space<vmem>>, %arg2: memref<64x576xbf16, #tpu.memory_space<vmem>>, %arg3: memref<64x1xf32, #tpu.memory_space<vmem>>, %arg4: memref<64x128xf32, #tpu.memory_space<vmem>>) attributes {dimension_semantics = [#tpu.dimension_semantics<parallel>], iteration_bounds = array<i64: 1>, scalar_prefetch = 0 : i64, scratch_operands = 0 : i64, tpu.core_type = #tpu.core_type<tc>, window_params = [{transform_indices = @transform_0, window_bounds = array<i64: 576, 128>}, {pipeline_mode = #tpu.pipeline_mode<synchronous>, transform_indices = @transform_1, window_bounds = array<i64: 64, 576>}, {pipeline_mode = #tpu.pipeline_mode<synchronous>, transform_indices = @transform_2, window_bounds = array<i64: 64, 1>}, {transform_indices = @transform_3, window_bounds = array<i64: 64, 128>}]} {
    %c0 = arith.constant 0 : index
    %c0_0 = arith.constant 0 : index
    %0 = vector.load %arg2[%c0, %c0_0] : memref<64x576xbf16, #tpu.memory_space<vmem>>, vector<64x576xbf16>
    %1 = arith.extf %0 : vector<64x576xbf16> to vector<64x576xf32>
    %c0_1 = arith.constant 0 : index
    %c0_2 = arith.constant 0 : index
    %2 = vector.load %arg1[%c0_1, %c0_2] : memref<576x128xbf16, #tpu.memory_space<vmem>>, vector<576x128xbf16>
    %3 = arith.extf %2 : vector<576x128xbf16> to vector<576x128xf32>
    %cst = arith.constant dense<0.000000e+00> : vector<64x128xf32>
    %4 = tpu.matmul %1, %3, %cst {dimension_numbers = #tpu.dot_dimension_numbers<[1], [0], [0], [1], [0, 0, 1, 1], [], []>} : vector<64x576xf32>, vector<576x128xf32>, vector<64x128xf32> -> vector<64x128xf32>
    %c0_3 = arith.constant 0 : index
    %c0_4 = arith.constant 0 : index
    %5 = vector.load %arg3[%c0_3, %c0_4] : memref<64x1xf32, #tpu.memory_space<vmem>>, vector<64x1xf32>
    %6 = vector.broadcast %5 : vector<64x1xf32> to vector<64x128xf32>
    %7 = arith.addf %4, %6 : vector<64x128xf32>
    %cst_5 = arith.constant 0.000000e+00 : f32
    %8 = vector.broadcast %cst_5 : f32 to vector<64x128xf32>
    %9 = arith.maximumf %7, %8 : vector<64x128xf32>
    %c0_6 = arith.constant 0 : index
    %c0_7 = arith.constant 0 : index
    %10 = vector.load %arg4[%c0_6, %c0_7] : memref<64x128xf32, #tpu.memory_space<vmem>>, vector<64x128xf32>
    tpu.vector_store %arg4[%c0_6, %c0_7], %9 {strides = array<i32>} : memref<64x128xf32, #tpu.memory_space<vmem>>, vector<64x128xf32>,
    return
  }
  func.func @transform_0(%arg0: i32) -> (i32, i32) {
    %c0_i32 = arith.constant 0 : i32
    %c0_i32_0 = arith.constant 0 : i32
    return %c0_i32, %arg0 : i32, i32
  }
  func.func @transform_1(%arg0: i32) -> (i32, i32) {
    %c0_i32 = arith.constant 0 : i32
    %c0_i32_0 = arith.constant 0 : i32
    %c0_i32_1 = arith.constant 0 : i32
    return %c0_i32, %c0_i32_0 : i32, i32
  }
  func.func @transform_2(%arg0: i32) -> (i32, i32) {
    %c0_i32 = arith.constant 0 : i32
    %c0_i32_0 = arith.constant 0 : i32
    %c0_i32_1 = arith.constant 0 : i32
    return %c0_i32, %c0_i32_0 : i32, i32
  }
  func.func @transform_3(%arg0: i32) -> (i32, i32) {
    %c0_i32 = arith.constant 0 : i32
    %c0_i32_0 = arith.constant 0 : i32
    return %c0_i32, %arg0 : i32, i32
  }
}

module attributes {stable_mosaic.version = 11 : i64} {
  func.func @_conv_mm_kernel(%arg0: i32, %arg1: memref<576x128xbf16, #tpu.memory_space<vmem>>, %arg2: memref<64x576xbf16, #tpu.memory_space<vmem>>, %arg3: memref<64x1xf32, #tpu.memory_space<vmem>>, %arg4: memref<64x128xf32, #tpu.memory_space<vmem>>, %arg5: memref<64x128xf32, #tpu.memory_space<vmem>>) attributes {dimension_semantics = [#tpu.dimension_semantics<parallel>], iteration_bounds = array<i64: 1>, scalar_prefetch = 0 : i64, scratch_operands = 0 : i64, tpu.core_type = #tpu.core_type<tc>, window_params = [{transform_indices = @transform_0, window_bounds = array<i64: 576, 128>}, {pipeline_mode = #tpu.pipeline_mode<synchronous>, transform_indices = @transform_1, window_bounds = array<i64: 64, 576>}, {pipeline_mode = #tpu.pipeline_mode<synchronous>, transform_indices = @transform_2, window_bounds = array<i64: 64, 1>}, {transform_indices = @transform_3, window_bounds = array<i64: 64, 128>}, {transform_indices = @transform_4, window_bounds = array<i64: 64, 128>}]} {
    %c0 = arith.constant 0 : index
    %c0_0 = arith.constant 0 : index
    %0 = vector.load %arg2[%c0, %c0_0] : memref<64x576xbf16, #tpu.memory_space<vmem>>, vector<64x576xbf16>
    %1 = arith.extf %0 : vector<64x576xbf16> to vector<64x576xf32>
    %c0_1 = arith.constant 0 : index
    %c0_2 = arith.constant 0 : index
    %2 = vector.load %arg1[%c0_1, %c0_2] : memref<576x128xbf16, #tpu.memory_space<vmem>>, vector<576x128xbf16>
    %3 = arith.extf %2 : vector<576x128xbf16> to vector<576x128xf32>
    %cst = arith.constant dense<0.000000e+00> : vector<64x128xf32>
    %4 = tpu.matmul %1, %3, %cst {dimension_numbers = #tpu.dot_dimension_numbers<[1], [0], [0], [1], [0, 0, 1, 1], [], []>} : vector<64x576xf32>, vector<576x128xf32>, vector<64x128xf32> -> vector<64x128xf32>
    %c0_3 = arith.constant 0 : index
    %c0_4 = arith.constant 0 : index
    %5 = vector.load %arg3[%c0_3, %c0_4] : memref<64x1xf32, #tpu.memory_space<vmem>>, vector<64x1xf32>
    %6 = vector.broadcast %5 : vector<64x1xf32> to vector<64x128xf32>
    %7 = arith.addf %4, %6 : vector<64x128xf32>
    %c0_5 = arith.constant 0 : index
    %c0_6 = arith.constant 0 : index
    %8 = vector.load %arg4[%c0_5, %c0_6] : memref<64x128xf32, #tpu.memory_space<vmem>>, vector<64x128xf32>
    %9 = arith.addf %7, %8 : vector<64x128xf32>
    %cst_7 = arith.constant 0.000000e+00 : f32
    %10 = vector.broadcast %cst_7 : f32 to vector<64x128xf32>
    %11 = arith.maximumf %9, %10 : vector<64x128xf32>
    %c0_8 = arith.constant 0 : index
    %c0_9 = arith.constant 0 : index
    %12 = vector.load %arg5[%c0_8, %c0_9] : memref<64x128xf32, #tpu.memory_space<vmem>>, vector<64x128xf32>
    tpu.vector_store %arg5[%c0_8, %c0_9], %11 {strides = array<i32>} : memref<64x128xf32, #tpu.memory_space<vmem>>, vector<64x128xf32>,
    return
  }
  func.func @transform_0(%arg0: i32) -> (i32, i32) {
    %c0_i32 = arith.constant 0 : i32
    %c0_i32_0 = arith.constant 0 : i32
    return %c0_i32, %arg0 : i32, i32
  }
  func.func @transform_1(%arg0: i32) -> (i32, i32) {
    %c0_i32 = arith.constant 0 : i32
    %c0_i32_0 = arith.constant 0 : i32
    %c0_i32_1 = arith.constant 0 : i32
    return %c0_i32, %c0_i32_0 : i32, i32
  }
  func.func @transform_2(%arg0: i32) -> (i32, i32) {
    %c0_i32 = arith.constant 0 : i32
    %c0_i32_0 = arith.constant 0 : i32
    %c0_i32_1 = arith.constant 0 : i32
    return %c0_i32, %c0_i32_0 : i32, i32
  }
  func.func @transform_3(%arg0: i32) -> (i32, i32) {
    %c0_i32 = arith.constant 0 : i32
    %c0_i32_0 = arith.constant 0 : i32
    return %c0_i32, %arg0 : i32, i32
  }
  func.func @transform_4(%arg0: i32) -> (i32, i32) {
    %c0_i32 = arith.constant 0 : i32
    %c0_i32_0 = arith.constant 0 : i32
    return %c0_i32, %arg0 : i32, i32
  }
}

module attributes {stable_mosaic.version = 11 : i64} {
  func.func @_head_kernel(%arg0: i32, %arg1: memref<64x2x16xf32, #tpu.memory_space<vmem>>, %arg2: memref<10x64xf32, #tpu.memory_space<vmem>>, %arg3: memref<10x2xf32, #tpu.memory_space<vmem>>) attributes {dimension_semantics = [#tpu.dimension_semantics<arbitrary>], iteration_bounds = array<i64: 1>, scalar_prefetch = 0 : i64, scratch_operands = 0 : i64, tpu.core_type = #tpu.core_type<tc>, window_params = [{pipeline_mode = #tpu.pipeline_mode<synchronous>, transform_indices = @transform_0, window_bounds = array<i64: 64, 2, 16>}, {pipeline_mode = #tpu.pipeline_mode<synchronous>, transform_indices = @transform_1, window_bounds = array<i64: 10, 64>}, {pipeline_mode = #tpu.pipeline_mode<synchronous>, transform_indices = @transform_2, window_bounds = array<i64: 10, 2>}]} {
    %c0 = arith.constant 0 : index
    %c0_0 = arith.constant 0 : index
    %c0_1 = arith.constant 0 : index
    %0 = vector.load %arg1[%c0, %c0_0, %c0_1] : memref<64x2x16xf32, #tpu.memory_space<vmem>>, vector<64x2x16xf32>
    %cst = arith.constant dense<0.000000e+00> : vector<64x2xf32>
    %1 = vector.multi_reduction <add>, %0, %cst [2] : vector<64x2x16xf32> to vector<64x2xf32>
    %cst_2 = arith.constant 6.250000e-02 : f32
    %2 = vector.broadcast %cst_2 : f32 to vector<64x2xf32>
    %3 = arith.mulf %1, %2 : vector<64x2xf32>
    %c0_3 = arith.constant 0 : index
    %c0_4 = arith.constant 0 : index
    %4 = vector.load %arg2[%c0_3, %c0_4] : memref<10x64xf32, #tpu.memory_space<vmem>>, vector<10x64xf32>
    %cst_5 = arith.constant dense<0.000000e+00> : vector<10x2xf32>
    %5 = tpu.matmul %4, %3, %cst_5 {dimension_numbers = #tpu.dot_dimension_numbers<[1], [0], [0], [1], [0, 0, 1, 1], [], []>} : vector<10x64xf32>, vector<64x2xf32>, vector<10x2xf32> -> vector<10x2xf32>
    %c0_6 = arith.constant 0 : index
    %c0_7 = arith.constant 0 : index
    %6 = vector.load %arg3[%c0_6, %c0_7] : memref<10x2xf32, #tpu.memory_space<vmem>>, vector<10x2xf32>
    tpu.vector_store %arg3[%c0_6, %c0_7], %5 {strides = array<i32>} : memref<10x2xf32, #tpu.memory_space<vmem>>, vector<10x2xf32>,
    return
  }
  func.func @transform_0(%arg0: i32) -> (i32, i32, i32) {
    %c0_i32 = arith.constant 0 : i32
    %c0_i32_0 = arith.constant 0 : i32
    %c0_i32_1 = arith.constant 0 : i32
    %c0_i32_2 = arith.constant 0 : i32
    return %c0_i32, %c0_i32_0, %c0_i32_1 : i32, i32, i32
  }
  func.func @transform_1(%arg0: i32) -> (i32, i32) {
    %c0_i32 = arith.constant 0 : i32
    %c0_i32_0 = arith.constant 0 : i32
    %c0_i32_1 = arith.constant 0 : i32
    return %c0_i32, %c0_i32_0 : i32, i32
  }
  func.func @transform_2(%arg0: i32) -> (i32, i32) {
    %c0_i32 = arith.constant 0 : i32
    %c0_i32_0 = arith.constant 0 : i32
    %c0_i32_1 = arith.constant 0 : i32
    return %c0_i32, %c0_i32_0 : i32, i32
  }
}

</mosaic_0001>

<bundles_post_ra>
// kernel: forward.12
= control target key start
LH: loop header
LB: loop body
LE: loop exit
PB: predicated region body
PF: predicated region fallthrough
CT: control target
= control target key end

     0   :  { %vm61_vm0 = vcmask 1042432   ;;  %v304_v1 = vmov 0.0   ;;  %v305_v3 = vmov 0   ;;  %vm306_vm1 = vmmov 1   ;;  %s384_s0 = inlined_call_operand.vmem [shape: bf16[27,512], index: 0, kind: input, shape index: {}]   ;;  %s385_s1 = inlined_call_operand.vmem [shape: bf16[16,27], index: 1, kind: input, shape index: {}]   ;;  %s386_s2 = inlined_call_operand.vmem [shape: f32[16,1], index: 2, kind: input, shape index: {}]   ;;  %s387_s3 = inlined_call_operand.vmem [shape: f32[16,512], index: 3, kind: output, shape index: {}]  }
   0x1   :  { %v292_v0 = vld [vmem:[%s384_s0 + $0x4] ss:$16 sps:$4 sm:$0xff]   ;;  %138 = vmatprep.mubr.f32.mxu0 %v304_v1  ;;  %215 = vmatprep.mubr.f32.mxu1 %v304_v1  ;;  %v294_v2 = vld [vmem:[%s384_s0 + $0xc] ss:$16 sps:$4 sm:$0xff]   ;;  %v296_v4 = vld [vmem:[%s384_s0] ss:$16 sps:$4 sm:$0xff]  }
   0x2   :  { %291 = vset.pattern.permute.xlu0 %v305_v3  ;;  %261 = vmatprep.subr.bf16.mxu0 %v292_v0  ;;  %v297_v5 = vld [vmem:[%s384_s0 + $0x8] ss:$16 sps:$4 sm:$0xff]   ;;  %v298_v6 = vld [vmem:[%s384_s0 + $0x24] ss:$16 sps:$4 sm:$0x3f]   ;;  %vm265_vm2 = vmpackc.low %vm61_vm0, %vm306_vm1  ;;  %vm54_vm3 = vcmask 220160  }
   0x3   :  { %271 = vmatprep.subr.bf16.mxu1 %v294_v2  ;;  %263 = vmatpush1.bf16.msra.mxu0 %v296_v4  ;;  %v300_v7 = vld [vmem:[%s384_s0 + $0x2c] ss:$16 sps:$4 sm:$0x3f]   ;;  %v302_v8 = vld [vmem:[%s384_s0 + $0x20] ss:$16 sps:$4 sm:$0x3f]  }
   0x4   :  { %273 = vmatpush1.bf16.msra.mxu1 %v297_v5  ;;  %266 = vmatprep.subr.msk.bf16.mxu0 %vm265_vm2, %v298_v6  ;;  %v303_v9 = vld [vmem:[%s384_s0 + $0x28] ss:$16 sps:$4 sm:$0x3f]   ;;  %v257_v10 = vld [vmem:[%s385_s1] sm:$0xff]  }
   0x5   :  { %276 = vmatprep.subr.msk.bf16.mxu1 %vm265_vm2, %v300_v7  ;;  %v42_v11 = vld [vmem:[%s386_s2] sm:$0xff]  ;;  %v258_v12 = vunpack.c.l.bf16 %v257_v10  ;;  %v43_v13 = vld [vmem:[%s386_s2 + $0x8] sm:$0xff]  ;;  %v259_v14 = vunpack.c.h.bf16 %v257_v10 }
   0x6   :  { %46 = vperm.xlu0 %291, %v42_v11  }
   0x7   :  { %269 = vmatpush1.bf16.msk.msra.mxu0 %vm265_vm2, %v302_v8 }
   0x8   :  { %279 = vmatpush1.bf16.msk.msra.mxu1 %vm265_vm2, %v303_v9 }
   0xa   :  { %250 = vmatmul.mubr.msk.f32.vlgmr.msra.gmra.mrb[0].mxu0 %vm54_vm3, %v258_v12  ;;  %51 = vperm.xlu0 %291, %v43_v13  }
   0xb   :  { %254 = vmatmul.mubr.msk.f32.vlgmr.msra.gmra.mrb[0].mxu1 %vm54_vm3, %v258_v12  ;;  %144 = vmatprep.mubr.f32.mxu0 %v304_v1 }
   0xc   :  { %221 = vmatprep.mubr.f32.mxu1 %v304_v1 }
   0xe   :  { %251 = vmatmul.mubr.msk.f32.gmra.mrb[2].mxu0 %vm54_vm3, %v259_v14 }
   0xf   :  { %255 = vmatmul.mubr.msk.f32.gmra.mrb[2].mxu1 %vm54_vm3, %v259_v14 }
  0x85   :  { %v47_v15 = vpop.permute.xlu0 %46 }
  0x89   :  { %v52_v26 = vpop.permute.xlu0 %51 }
  0xdd   :  { %v140_v16 = vpop.f32.mrb[0].mxu0 }
  0xde   :  { %v217_v17 = vpop.f32.mrb[0].mxu1  ;;  %v141_v18 = vadd.f32 %v140_v16, %v47_v15  ;;  %v142_v20 = vpop.f32.mrb[1].mxu0 }
  0xdf   :  { %v218_v19 = vadd.f32 %v217_v17, %v47_v15  ;;  %v219_v21 = vpop.f32.mrb[1].mxu1  ;;  %v143_v22 = vadd.f32 %v142_v20, %v47_v15 }
  0xe0   :  { %v220_v23 = vadd.f32 %v219_v21, %v47_v15  ;;  %v228_v24 = vmax.f32 %v141_v18, 0.0 }
  0xe1   :  { %v230_v25 = vmax.f32 %v218_v19, 0.0  ;;  %v229_v27 = vmax.f32 %v143_v22, 0.0  ;;  %v146_v29 = vpop.f32.mrb[2].mxu0 }
  0xe2   :  { %v231_v28 = vmax.f32 %v220_v23, 0.0  ;;  %v223_v30 = vpop.f32.mrb[2].mxu1  ;;  %236 = vst [vmem:[%s387_s3] sm:$0xff] %v228_v24  ;;  %v147_v31 = vadd.f32 %v146_v29, %v52_v26  ;;  %v148_v33 = vpop.f32.mrb[3].mxu0 }
  0xe3   :  { %238 = vst [vmem:[%s387_s3 + $0x10] sm:$0xff] %v230_v25  ;;  %v224_v32 = vadd.f32 %v223_v30, %v52_v26  ;;  %v225_v34 = vpop.f32.mrb[3].mxu1  ;;  %237 = vst [vmem:[%s387_s3 + $0x8] sm:$0xff] %v229_v27  ;;  %v149_v35 = vadd.f32 %v148_v33, %v52_v26 }
  0xe4   :  { %239 = vst [vmem:[%s387_s3 + $0x18] sm:$0xff] %v231_v28  ;;  %v226_v36 = vadd.f32 %v225_v34, %v52_v26  ;;  %v232_v37 = vmax.f32 %v147_v31, 0.0 }
  0xe5   :  { %v234_v38 = vmax.f32 %v224_v32, 0.0  ;;  %v233_v39 = vmax.f32 %v149_v35, 0.0 }
  0xe6   :  { %v235_v40 = vmax.f32 %v226_v36, 0.0  ;;  %240 = vst [vmem:[%s387_s3 + $0x20] sm:$0xff] %v232_v37 }
  0xe7   :  { %242 = vst [vmem:[%s387_s3 + $0x30] sm:$0xff] %v234_v38  ;;  %241 = vst [vmem:[%s387_s3 + $0x28] sm:$0xff] %v233_v39 }
  0xe8   :  { %243 = vst [vmem:[%s387_s3 + $0x38] sm:$0xff] %v235_v40 }

// kernel: forward.13
= control target key start
LH: loop header
LB: loop body
LE: loop exit
PB: predicated region body
PF: predicated region fallthrough
CT: control target
= control target key end

     0   :  { %v489_v1 = vmov 0   ;;  %vm140_vm0 = vcmask 130048   ;;  %s658_s0 = inlined_call_operand.vmem [shape: bf16[144,512], index: 0, kind: input, shape index: {}]   ;;  %s659_s1 = inlined_call_operand.vmem [shape: bf16[16,144], index: 1, kind: input, shape index: {}]   ;;  %s660_s2 = inlined_call_operand.vmem [shape: f32[16,1], index: 2, kind: input, shape index: {}]   ;;  %s661_s3 = inlined_call_operand.vmem [shape: f32[16,512], index: 3, kind: output, shape index: {}]  }
   0x1   :  { %v435_v0 = vld [vmem:[%s658_s0 + $0x4] ss:$16 sps:$4 sm:$0xff]   ;;  %434 = vset.pattern.permute.xlu0 %v489_v1  ;;  %v437_v2 = vld [vmem:[%s658_s0 + $0xc] ss:$16 sps:$4 sm:$0xff]   ;;  %v439_v3 = vld [vmem:[%s658_s0] ss:$16 sps:$4 sm:$0xff]  }
   0x2   :  { %326 = vmatprep.subr.bf16.mxu0 %v435_v0  ;;  %v440_v4 = vld [vmem:[%s658_s0 + $0x8] ss:$16 sps:$4 sm:$0xff]   ;;  %362 = vmatprep.subr.bf16.mxu1 %v437_v2  ;;  %v441_v5 = vld [vmem:[%s658_s0 + $0x24] ss:$16 sps:$4 sm:$0xff]   ;;  %v443_v6 = vld [vmem:[%s658_s0 + $0x2c] ss:$16 sps:$4 sm:$0xff]  }
   0x3   :  { %328 = vmatpush1.bf16.msra.mxu0 %v439_v3  ;;  %364 = vmatpush1.bf16.msra.mxu1 %v440_v4  ;;  %v445_v7 = vld [vmem:[%s658_s0 + $0x20] ss:$16 sps:$4 sm:$0xff]   ;;  %v446_v8 = vld [vmem:[%s658_s0 + $0x28] ss:$16 sps:$4 sm:$0xff]   ;;  %v447_v9 = vld [vmem:[%s658_s0 + $0x44] ss:$16 sps:$4 sm:$0xff]  }
   0x4   :  { %330 = vmatprep.subr.bf16.mxu0 %v441_v5  ;;  %366 = vmatprep.subr.bf16.mxu1 %v443_v6  ;;  %v449_v10 = vld [vmem:[%s658_s0 + $0x4c] ss:$16 sps:$4 sm:$0xff]   ;;  %v451_v11 = vld [vmem:[%s658_s0 + $0x40] ss:$16 sps:$4 sm:$0xff]   ;;  %v452_v12 = vld [vmem:[%s658_s0 + $0x48] ss:$16 sps:$4 sm:$0xff]  }
   0x5   :  { %v453_v13 = vld [vmem:[%s658_s0 + $0x64] ss:$16 sps:$4 sm:$0xff]   ;;  %v455_v14 = vld [vmem:[%s658_s0 + $0x6c] ss:$16 sps:$4 sm:$0xff]   ;;  %v457_v15 = vld [vmem:[%s658_s0 + $0x60] ss:$16 sps:$4 sm:$0xff]  }
   0x6   :  { %v458_v16 = vld [vmem:[%s658_s0 + $0x68] ss:$16 sps:$4 sm:$0xff]   ;;  %v459_v17 = vld [vmem:[%s658_s0 + $0x84] ss:$16 sps:$4 sm:$0xff]   ;;  %v461_v18 = vld [vmem:[%s658_s0 + $0x8c] ss:$16 sps:$4 sm:$0xff]  }
   0x7   :  { %332 = vmatpush1.bf16.msra.mxu0 %v445_v7  ;;  %368 = vmatpush1.bf16.msra.mxu1 %v446_v8  ;;  %v463_v19 = vld [vmem:[%s658_s0 + $0x80] ss:$16 sps:$4 sm:$0xff]   ;;  %v464_v20 = vld [vmem:[%s658_s0 + $0x88] ss:$16 sps:$4 sm:$0xff]   ;;  %v465_v21 = vld [vmem:[%s658_s0 + $0xa4] ss:$16 sps:$4 sm:$0xff]  }
   0x8   :  { %334 = vmatprep.subr.bf16.mxu0 %v447_v9  ;;  %370 = vmatprep.subr.bf16.mxu1 %v449_v10  ;;  %v467_v22 = vld [vmem:[%s658_s0 + $0xac] ss:$16 sps:$4 sm:$0xff]   ;;  %v469_v23 = vld [vmem:[%s658_s0 + $0xa0] ss:$16 sps:$4 sm:$0xff]   ;;  %v470_v24 = vld [vmem:[%s658_s0 + $0xa8] ss:$16 sps:$4 sm:$0xff]  }
   0x9   :  { %v471_v25 = vld [vmem:[%s658_s0 + $0xc4] ss:$16 sps:$4 sm:$0xff]   ;;  %v473_v26 = vld [vmem:[%s658_s0 + $0xcc] ss:$16 sps:$4 sm:$0xff]   ;;  %v475_v27 = vld [vmem:[%s658_s0 + $0xc0] ss:$16 sps:$4 sm:$0xff]  }
   0xa   :  { %v476_v28 = vld [vmem:[%s658_s0 + $0xc8] ss:$16 sps:$4 sm:$0xff]   ;;  %v14_v29 = vld [vmem:[%s659_s1] sm:$0xff]  ;;  %v479_v32 = vld [vmem:[%s658_s0 + $0xec] ss:$16 sps:$4 sm:$0xff]  }
   0xb   :  { %336 = vmatpush1.bf16.msra.mxu0 %v451_v11  ;;  %372 = vmatpush1.bf16.msra.mxu1 %v452_v12  ;;  %v128_v30 = vld [vmem:[%s660_s2] sm:$0xff]  ;;  %v17_v33 = vunpack.c.h.bf16 %v14_v29  ;;  %v129_v34 = vld [vmem:[%s660_s2 + $0x8] sm:$0xff]  ;;  %v16_v42 = vunpack.c.l.bf16 %v14_v29 }
   0xc   :  { %338 = vmatprep.subr.bf16.mxu0 %v453_v13  ;;  %374 = vmatprep.subr.bf16.mxu1 %v455_v14  ;;  %v477_v31 = vld [vmem:[%s658_s0 + $0xe4] ss:$16 sps:$4 sm:$0xff]   ;;  %v481_v35 = vld [vmem:[%s658_s0 + $0xe0] ss:$16 sps:$4 sm:$0xff]   ;;  %v482_v36 = vld [vmem:[%s658_s0 + $0xe8] ss:$16 sps:$4 sm:$0xff]  }
   0xd   :  { %132 = vperm.xlu0 %434, %v128_v30   ;;  %321 = vmatprep.mubr.msk.f32.mxu0 %vm140_vm0, %v17_v33  ;;  %v483_v37 = vld [vmem:[%s658_s0 + $0x104] ss:$16 sps:$4 sm:$0xff]   ;;  %v485_v38 = vld [vmem:[%s658_s0 + $0x10c] ss:$16 sps:$4 sm:$0xff]   ;;  %v487_v39 = vld [vmem:[%s658_s0 + $0x100] ss:$16 sps:$4 sm:$0xff]  }
   0xe   :  { %323 = vmatprep.mubr.msk.f32.mxu1 %vm140_vm0, %v17_v33  ;;  %v488_v40 = vld [vmem:[%s658_s0 + $0x108] ss:$16 sps:$4 sm:$0xff]  }
   0xf   :  { %340 = vmatpush1.bf16.msra.mxu0 %v457_v15  ;;  %376 = vmatpush1.bf16.msra.mxu1 %v458_v16  ;;  %v15_v41 = vld [vmem:[%s659_s1 + $0x8] sm:$0xff] }
  0x10   :  { %342 = vmatprep.subr.bf16.mxu0 %v459_v17  ;;  %378 = vmatprep.subr.bf16.mxu1 %v461_v18  ;;  %v19_v43 = vunpack.c.h.bf16 %v15_v41  ;;  %v18_v44 = vunpack.c.l.bf16 %v15_v41 }
  0x11   :  { %137 = vperm.xlu0 %434, %v129_v34  }
  0x13   :  { %344 = vmatpush1.bf16.msra.mxu0 %v463_v19  ;;  %380 = vmatpush1.bf16.msra.mxu1 %v464_v20 }
  0x14   :  { %346 = vmatprep.subr.bf16.mxu0 %v465_v21  ;;  %382 = vmatprep.subr.bf16.mxu1 %v467_v22 }
  0x17   :  { %348 = vmatpush1.bf16.msra.mxu0 %v469_v23  ;;  %384 = vmatpush1.bf16.msra.mxu1 %v470_v24 }
  0x18   :  { %350 = vmatprep.subr.bf16.mxu0 %v471_v25  ;;  %386 = vmatprep.subr.bf16.mxu1 %v473_v26 }
  0x1b   :  { %352 = vmatpush1.bf16.msra.mxu0 %v475_v27  ;;  %388 = vmatpush1.bf16.msra.mxu1 %v476_v28 }
  0x1c   :  { %354 = vmatprep.subr.bf16.mxu0 %v477_v31  ;;  %390 = vmatprep.subr.bf16.mxu1 %v479_v32 }
  0x1f   :  { %356 = vmatpush1.bf16.msra.mxu0 %v481_v35  ;;  %392 = vmatpush1.bf16.msra.mxu1 %v482_v36 }
  0x20   :  { %358 = vmatprep.subr.bf16.mxu0 %v483_v37  ;;  %394 = vmatprep.subr.bf16.mxu1 %v485_v38 }
  0x23   :  { %360 = vmatpush1.bf16.msra.mxu0 %v487_v39  ;;  %396 = vmatpush1.bf16.msra.mxu1 %v488_v40 }
  0x26   :  { %212 = vmatmul.mubr.f32.vlgmr.msra.gmra.mrb[0].mxu0 %v16_v42  ;;  %289 = vmatmul.mubr.f32.vlgmr.msra.gmra.mrb[0].mxu1 %v16_v42 }
  0x27   :  { %322 = vmatprep.mubr.msk.f32.mxu0 %vm140_vm0, %v19_v43  ;;  %324 = vmatprep.mubr.msk.f32.mxu1 %vm140_vm0, %v19_v43 }
  0x2a   :  { %218 = vmatmul.mubr.f32.gmra.mrb[2].mxu0 %v18_v44  ;;  %295 = vmatmul.mubr.f32.gmra.mrb[2].mxu1 %v18_v44 }
  0x8c   :  { %v133_v45 = vpop.permute.xlu0 %132 }
  0x90   :  { %v138_v56 = vpop.permute.xlu0 %137 }
  0xf9   :  { %v213_v46 = vpop.f32.mrb[0].mxu0  ;;  %v290_v47 = vpop.f32.mrb[0].mxu1 }
  0xfa   :  { %v214_v48 = vadd.f32 %v213_v46, %v133_v45  ;;  %v291_v49 = vadd.f32 %v290_v47, %v133_v45  ;;  %v215_v50 = vpop.f32.mrb[1].mxu0  ;;  %v292_v51 = vpop.f32.mrb[1].mxu1 }
  0xfb   :  { %v216_v52 = vadd.f32 %v215_v50, %v133_v45  ;;  %v293_v53 = vadd.f32 %v292_v51, %v133_v45 }
  0xfc   :  { %v301_v54 = vmax.f32 %v214_v48, 0.0  ;;  %v303_v55 = vmax.f32 %v291_v49, 0.0 }
  0xfd   :  { %v302_v57 = vmax.f32 %v216_v52, 0.0  ;;  %v304_v58 = vmax.f32 %v293_v53, 0.0  ;;  %v219_v59 = vpop.f32.mrb[2].mxu0  ;;  %v296_v60 = vpop.f32.mrb[2].mxu1 }
  0xfe   :  { %309 = vst [vmem:[%s661_s3] sm:$0xff] %v301_v54  ;;  %311 = vst [vmem:[%s661_s3 + $0x10] sm:$0xff] %v303_v55  ;;  %v220_v61 = vadd.f32 %v219_v59, %v138_v56  ;;  %v297_v62 = vadd.f32 %v296_v60, %v138_v56  ;;  %v221_v63 = vpop.f32.mrb[3].mxu0  ;;  %v298_v0 = vpop.f32.mrb[3].mxu1 }
  0xff   :  { %310 = vst [vmem:[%s661_s3 + $0x8] sm:$0xff] %v302_v57  ;;  %312 = vst [vmem:[%s661_s3 + $0x18] sm:$0xff] %v304_v58  ;;  %v222_v1 = vadd.f32 %v221_v63, %v138_v56  ;;  %v299_v2 = vadd.f32 %v298_v0, %v138_v56 }
 0x100   :  { %v305_v3 = vmax.f32 %v220_v61, 0.0  ;;  %v307_v4 = vmax.f32 %v297_v62, 0.0 }
 0x101   :  { %v306_v5 = vmax.f32 %v222_v1, 0.0  ;;  %v308_v6 = vmax.f32 %v299_v2, 0.0 }
 0x102   :  { %313 = vst [vmem:[%s661_s3 + $0x20] sm:$0xff] %v305_v3  ;;  %315 = vst [vmem:[%s661_s3 + $0x30] sm:$0xff] %v307_v4 }
 0x103   :  { %314 = vst [vmem:[%s661_s3 + $0x28] sm:$0xff] %v306_v5  ;;  %316 = vst [vmem:[%s661_s3 + $0x38] sm:$0xff] %v308_v6 }

// kernel: forward.14
= control target key start
LH: loop header
LB: loop body
LE: loop exit
PB: predicated region body
PF: predicated region fallthrough
CT: control target
= control target key end

     0   :  { %v508_v1 = vmov 0   ;;  %vm143_vm0 = vcmask 130048   ;;  %s706_s0 = inlined_call_operand.vmem [shape: bf16[144,512], index: 0, kind: input, shape index: {}]   ;;  %s707_s1 = inlined_call_operand.vmem [shape: bf16[16,144], index: 1, kind: input, shape index: {}]   ;;  %s708_s2 = inlined_call_operand.vmem [shape: f32[16,1], index: 2, kind: input, shape index: {}]   ;;  %s709_s3 = inlined_call_operand.vmem [shape: f32[16,512], index: 3, kind: input, shape index: {}]   ;;  %s710_s4 = inlined_call_operand.vmem [shape: f32[16,512], index: 4, kind: output, shape index: {}]  }
   0x1   :  { %v454_v0 = vld [vmem:[%s706_s0 + $0x4] ss:$16 sps:$4 sm:$0xff]   ;;  %453 = vset.pattern.permute.xlu0 %v508_v1  ;;  %v456_v2 = vld [vmem:[%s706_s0 + $0xc] ss:$16 sps:$4 sm:$0xff]   ;;  %v458_v3 = vld [vmem:[%s706_s0] ss:$16 sps:$4 sm:$0xff]  }
   0x2   :  { %345 = vmatprep.subr.bf16.mxu0 %v454_v0  ;;  %v459_v4 = vld [vmem:[%s706_s0 + $0x8] ss:$16 sps:$4 sm:$0xff]   ;;  %381 = vmatprep.subr.bf16.mxu1 %v456_v2  ;;  %v460_v5 = vld [vmem:[%s706_s0 + $0x24] ss:$16 sps:$4 sm:$0xff]   ;;  %v462_v6 = vld [vmem:[%s706_s0 + $0x2c] ss:$16 sps:$4 sm:$0xff]  }
   0x3   :  { %347 = vmatpush1.bf16.msra.mxu0 %v458_v3  ;;  %383 = vmatpush1.bf16.msra.mxu1 %v459_v4  ;;  %v464_v7 = vld [vmem:[%s706_s0 + $0x20] ss:$16 sps:$4 sm:$0xff]   ;;  %v465_v8 = vld [vmem:[%s706_s0 + $0x28] ss:$16 sps:$4 sm:$0xff]   ;;  %v466_v9 = vld [vmem:[%s706_s0 + $0x44] ss:$16 sps:$4 sm:$0xff]  }
   0x4   :  { %349 = vmatprep.subr.bf16.mxu0 %v460_v5  ;;  %385 = vmatprep.subr.bf16.mxu1 %v462_v6  ;;  %v468_v10 = vld [vmem:[%s706_s0 + $0x4c] ss:$16 sps:$4 sm:$0xff]   ;;  %v470_v11 = vld [vmem:[%s706_s0 + $0x40] ss:$16 sps:$4 sm:$0xff]   ;;  %v471_v12 = vld [vmem:[%s706_s0 + $0x48] ss:$16 sps:$4 sm:$0xff]  }
   0x5   :  { %v472_v13 = vld [vmem:[%s706_s0 + $0x64] ss:$16 sps:$4 sm:$0xff]   ;;  %v474_v14 = vld [vmem:[%s706_s0 + $0x6c] ss:$16 sps:$4 sm:$0xff]   ;;  %v476_v15 = vld [vmem:[%s706_s0 + $0x60] ss:$16 sps:$4 sm:$0xff]  }
   0x6   :  { %v477_v16 = vld [vmem:[%s706_s0 + $0x68] ss:$16 sps:$4 sm:$0xff]   ;;  %v478_v17 = vld [vmem:[%s706_s0 + $0x84] ss:$16 sps:$4 sm:$0xff]   ;;  %v480_v18 = vld [vmem:[%s706_s0 + $0x8c] ss:$16 sps:$4 sm:$0xff]  }
   0x7   :  { %351 = vmatpush1.bf16.msra.mxu0 %v464_v7  ;;  %387 = vmatpush1.bf16.msra.mxu1 %v465_v8  ;;  %v482_v19 = vld [vmem:[%s706_s0 + $0x80] ss:$16 sps:$4 sm:$0xff]   ;;  %v483_v20 = vld [vmem:[%s706_s0 + $0x88] ss:$16 sps:$4 sm:$0xff]   ;;  %v484_v21 = vld [vmem:[%s706_s0 + $0xa4] ss:$16 sps:$4 sm:$0xff]  }
   0x8   :  { %353 = vmatprep.subr.bf16.mxu0 %v466_v9  ;;  %389 = vmatprep.subr.bf16.mxu1 %v468_v10  ;;  %v486_v22 = vld [vmem:[%s706_s0 + $0xac] ss:$16 sps:$4 sm:$0xff]   ;;  %v488_v23 = vld [vmem:[%s706_s0 + $0xa0] ss:$16 sps:$4 sm:$0xff]   ;;  %v489_v24 = vld [vmem:[%s706_s0 + $0xa8] ss:$16 sps:$4 sm:$0xff]  }
   0x9   :  { %v490_v25 = vld [vmem:[%s706_s0 + $0xc4] ss:$16 sps:$4 sm:$0xff]   ;;  %v492_v26 = vld [vmem:[%s706_s0 + $0xcc] ss:$16 sps:$4 sm:$0xff]   ;;  %v494_v27 = vld [vmem:[%s706_s0 + $0xc0] ss:$16 sps:$4 sm:$0xff]  }
   0xa   :  { %v495_v28 = vld [vmem:[%s706_s0 + $0xc8] ss:$16 sps:$4 sm:$0xff]   ;;  %v17_v29 = vld [vmem:[%s707_s1] sm:$0xff]  ;;  %v498_v32 = vld [vmem:[%s706_s0 + $0xec] ss:$16 sps:$4 sm:$0xff]  }
   0xb   :  { %355 = vmatpush1.bf16.msra.mxu0 %v470_v11  ;;  %391 = vmatpush1.bf16.msra.mxu1 %v471_v12  ;;  %v131_v30 = vld [vmem:[%s708_s2] sm:$0xff]  ;;  %v20_v33 = vunpack.c.h.bf16 %v17_v29  ;;  %v132_v34 = vld [vmem:[%s708_s2 + $0x8] sm:$0xff]  ;;  %v19_v42 = vunpack.c.l.bf16 %v17_v29  ;;  %v306_v49 = vld [vmem:[%s709_s3 + $0x10] sm:$0xff] }
   0xc   :  { %357 = vmatprep.subr.bf16.mxu0 %v472_v13  ;;  %393 = vmatprep.subr.bf16.mxu1 %v474_v14  ;;  %v496_v31 = vld [vmem:[%s706_s0 + $0xe4] ss:$16 sps:$4 sm:$0xff]   ;;  %v500_v35 = vld [vmem:[%s706_s0 + $0xe0] ss:$16 sps:$4 sm:$0xff]   ;;  %v501_v36 = vld [vmem:[%s706_s0 + $0xe8] ss:$16 sps:$4 sm:$0xff]  }
   0xd   :  { %135 = vperm.xlu0 %453, %v131_v30   ;;  %340 = vmatprep.mubr.msk.f32.mxu0 %vm143_vm0, %v20_v33  ;;  %v502_v37 = vld [vmem:[%s706_s0 + $0x104] ss:$16 sps:$4 sm:$0xff]   ;;  %v504_v38 = vld [vmem:[%s706_s0 + $0x10c] ss:$16 sps:$4 sm:$0xff]   ;;  %v506_v39 = vld [vmem:[%s706_s0 + $0x100] ss:$16 sps:$4 sm:$0xff]  }
   0xe   :  { %342 = vmatprep.mubr.msk.f32.mxu1 %vm143_vm0, %v20_v33  ;;  %v507_v40 = vld [vmem:[%s706_s0 + $0x108] ss:$16 sps:$4 sm:$0xff]   ;;  %v304_v47 = vld [vmem:[%s709_s3] sm:$0xff]  ;;  %v310_v2 = vld [vmem:[%s709_s3 + $0x30] sm:$0xff] }
   0xf   :  { %359 = vmatpush1.bf16.msra.mxu0 %v476_v15  ;;  %395 = vmatpush1.bf16.msra.mxu1 %v477_v16  ;;  %v18_v41 = vld [vmem:[%s707_s1 + $0x8] sm:$0xff]  ;;  %v307_v55 = vld [vmem:[%s709_s3 + $0x18] sm:$0xff]  ;;  %v308_v0 = vld [vmem:[%s709_s3 + $0x20] sm:$0xff] }
  0x10   :  { %361 = vmatprep.subr.bf16.mxu0 %v478_v17  ;;  %397 = vmatprep.subr.bf16.mxu1 %v480_v18  ;;  %v22_v43 = vunpack.c.h.bf16 %v18_v41  ;;  %v21_v44 = vunpack.c.l.bf16 %v18_v41  ;;  %v305_v53 = vld [vmem:[%s709_s3 + $0x8] sm:$0xff]  ;;  %v311_v10 = vld [vmem:[%s709_s3 + $0x38] sm:$0xff] }
  0x11   :  { %140 = vperm.xlu0 %453, %v132_v34   ;;  %v309_v8 = vld [vmem:[%s709_s3 + $0x28] sm:$0xff] }
  0x13   :  { %363 = vmatpush1.bf16.msra.mxu0 %v482_v19  ;;  %399 = vmatpush1.bf16.msra.mxu1 %v483_v20 }
  0x14   :  { %365 = vmatprep.subr.bf16.mxu0 %v484_v21  ;;  %401 = vmatprep.subr.bf16.mxu1 %v486_v22 }
  0x17   :  { %367 = vmatpush1.bf16.msra.mxu0 %v488_v23  ;;  %403 = vmatpush1.bf16.msra.mxu1 %v489_v24 }
  0x18   :  { %369 = vmatprep.subr.bf16.mxu0 %v490_v25  ;;  %405 = vmatprep.subr.bf16.mxu1 %v492_v26 }
  0x1b   :  { %371 = vmatpush1.bf16.msra.mxu0 %v494_v27  ;;  %407 = vmatpush1.bf16.msra.mxu1 %v495_v28 }
  0x1c   :  { %373 = vmatprep.subr.bf16.mxu0 %v496_v31  ;;  %409 = vmatprep.subr.bf16.mxu1 %v498_v32 }
  0x1f   :  { %375 = vmatpush1.bf16.msra.mxu0 %v500_v35  ;;  %411 = vmatpush1.bf16.msra.mxu1 %v501_v36 }
  0x20   :  { %377 = vmatprep.subr.bf16.mxu0 %v502_v37  ;;  %413 = vmatprep.subr.bf16.mxu1 %v504_v38 }
  0x23   :  { %379 = vmatpush1.bf16.msra.mxu0 %v506_v39  ;;  %415 = vmatpush1.bf16.msra.mxu1 %v507_v40 }
  0x26   :  { %215 = vmatmul.mubr.f32.vlgmr.msra.gmra.mrb[0].mxu0 %v19_v42  ;;  %292 = vmatmul.mubr.f32.vlgmr.msra.gmra.mrb[0].mxu1 %v19_v42 }
  0x27   :  { %341 = vmatprep.mubr.msk.f32.mxu0 %vm143_vm0, %v22_v43  ;;  %343 = vmatprep.mubr.msk.f32.mxu1 %vm143_vm0, %v22_v43 }
  0x2a   :  { %221 = vmatmul.mubr.f32.gmra.mrb[2].mxu0 %v21_v44  ;;  %298 = vmatmul.mubr.f32.gmra.mrb[2].mxu1 %v21_v44 }
  0x8c   :  { %v136_v45 = vpop.permute.xlu0 %135 }
  0x90   :  { %v141_v60 = vpop.permute.xlu0 %140 }
  0xf9   :  { %v216_v46 = vpop.f32.mrb[0].mxu0  ;;  %v293_v48 = vpop.f32.mrb[0].mxu1 }
  0xfa   :  { %v217_v50 = vadd.f32 %v216_v46, %v136_v45  ;;  %v294_v51 = vadd.f32 %v293_v48, %v136_v45  ;;  %v218_v52 = vpop.f32.mrb[1].mxu0  ;;  %v295_v54 = vpop.f32.mrb[1].mxu1 }
  0xfb   :  { %v219_v56 = vadd.f32 %v218_v52, %v136_v45  ;;  %v296_v57 = vadd.f32 %v295_v54, %v136_v45 }
  0xfc   :  { %v312_v58 = vadd.f32 %v304_v47, %v217_v50  ;;  %v314_v59 = vadd.f32 %v306_v49, %v294_v51 }
  0xfd   :  { %v313_v61 = vadd.f32 %v305_v53, %v219_v56  ;;  %v315_v62 = vadd.f32 %v307_v55, %v296_v57  ;;  %v222_v63 = vpop.f32.mrb[2].mxu0  ;;  %v299_v1 = vpop.f32.mrb[2].mxu1 }
  0xfe   :  { %v320_v3 = vmax.f32 %v312_v58, 0.0  ;;  %v322_v4 = vmax.f32 %v314_v59, 0.0  ;;  %v223_v5 = vadd.f32 %v222_v63, %v141_v60  ;;  %v300_v6 = vadd.f32 %v299_v1, %v141_v60  ;;  %v224_v7 = vpop.f32.mrb[3].mxu0  ;;  %v301_v9 = vpop.f32.mrb[3].mxu1 }
  0xff   :  { %v321_v11 = vmax.f32 %v313_v61, 0.0  ;;  %v323_v12 = vmax.f32 %v315_v62, 0.0  ;;  %v225_v13 = vadd.f32 %v224_v7, %v141_v60  ;;  %v302_v14 = vadd.f32 %v301_v9, %v141_v60 }
 0x100   :  { %328 = vst [vmem:[%s710_s4] sm:$0xff] %v320_v3  ;;  %330 = vst [vmem:[%s710_s4 + $0x10] sm:$0xff] %v322_v4  ;;  %v316_v15 = vadd.f32 %v308_v0, %v223_v5  ;;  %v318_v16 = vadd.f32 %v310_v2, %v300_v6 }
 0x101   :  { %329 = vst [vmem:[%s710_s4 + $0x8] sm:$0xff] %v321_v11  ;;  %331 = vst [vmem:[%s710_s4 + $0x18] sm:$0xff] %v323_v12  ;;  %v317_v17 = vadd.f32 %v309_v8, %v225_v13  ;;  %v319_v18 = vadd.f32 %v311_v10, %v302_v14 }
 0x102   :  { %v324_v19 = vmax.f32 %v316_v15, 0.0  ;;  %v326_v20 = vmax.f32 %v318_v16, 0.0 }
 0x103   :  { %v325_v21 = vmax.f32 %v317_v17, 0.0  ;;  %v327_v22 = vmax.f32 %v319_v18, 0.0 }
 0x104   :  { %332 = vst [vmem:[%s710_s4 + $0x20] sm:$0xff] %v324_v19  ;;  %334 = vst [vmem:[%s710_s4 + $0x30] sm:$0xff] %v326_v20 }
 0x105   :  { %333 = vst [vmem:[%s710_s4 + $0x28] sm:$0xff] %v325_v21  ;;  %335 = vst [vmem:[%s710_s4 + $0x38] sm:$0xff] %v327_v22 }

// kernel: forward.16
= control target key start
LH: loop header
LB: loop body
LE: loop exit
PB: predicated region body
PF: predicated region fallthrough
CT: control target
= control target key end

     0   :  { %v293_v0 = vmov 0.0|0.0   ;;  %v294_v5 = vmov 0   ;;  %vm86_vm0 = vcmask 130048   ;;  %s382_s0 = inlined_call_operand.vmem [shape: bf16[144,128], index: 0, kind: input, shape index: {}]   ;;  %s383_s1 = inlined_call_operand.vmem [shape: bf16[32,144], index: 1, kind: input, shape index: {}]   ;;  %s384_s2 = inlined_call_operand.vmem [shape: f32[32,1], index: 2, kind: input, shape index: {}]   ;;  %s385_s3 = inlined_call_operand.vmem [shape: f32[32,128], index: 3, kind: output, shape index: {}]  }
   0x1   :  { %244 = vmatprep.subr.bf16.mxu0 %v293_v0  ;;  %271 = vmatprep.subr.bf16.mxu1 %v293_v0  ;;  %v201_v1 = vld [vmem:[%s382_s0] sm:$0xff]   ;;  %v236_v2 = vld [vmem:[%s382_s0 + $0x8] sm:$0xff]   ;;  %v16_v4 = vld [vmem:[%s383_s1 + $0x10] sm:$0xff] }
   0x2   :  { %246 = vmatpush1.bf16.msra.mxu0 %v201_v1  ;;  %280 = vmatpush1.bf16.msra.mxu1 %v201_v1  ;;  %v14_v3 = vld [vmem:[%s383_s1] sm:$0xff]  ;;  %v23_v7 = vunpack.c.h.bf16 %v16_v4  ;;  %v64_v8 = vld [vmem:[%s384_s2 + $0x10] sm:$0xff]  ;;  %v65_v11 = vld [vmem:[%s384_s2 + $0x18] sm:$0xff]  ;;  %v22_v22 = vunpack.c.l.bf16 %v16_v4 }
   0x3   :  { %247 = vmatprep.subr.bf16.mxu0 %v293_v0  ;;  %272 = vmatprep.subr.bf16.mxu1 %v293_v0  ;;  %v19_v6 = vunpack.c.h.bf16 %v14_v3  ;;  %v62_v9 = vld [vmem:[%s384_s2] sm:$0xff]  ;;  %v237_v10 = vld [vmem:[%s382_s0 + $0x10] sm:$0xff]   ;;  %v63_v12 = vld [vmem:[%s384_s2 + $0x8] sm:$0xff]  ;;  %v18_v21 = vunpack.c.l.bf16 %v14_v3 }
   0x4   :  { %292 = vset.pattern.permute.xlu1 %v294_v5  ;;  %291 = vset.pattern.permute.xlu0 %v294_v5  ;;  %v238_v13 = vld [vmem:[%s382_s0 + $0x18] sm:$0xff]   ;;  %v239_v14 = vld [vmem:[%s382_s0 + $0x20] sm:$0xff]   ;;  %v240_v15 = vld [vmem:[%s382_s0 + $0x28] sm:$0xff]  }
   0x5   :  { %196 = vmatprep.mubr.msk.f32.mxu0 %vm86_vm0, %v19_v6  ;;  %198 = vmatprep.mubr.msk.f32.mxu1 %vm86_vm0, %v23_v7  ;;  %v241_v16 = vld [vmem:[%s382_s0 + $0x30] sm:$0xff]   ;;  %v242_v17 = vld [vmem:[%s382_s0 + $0x38] sm:$0xff]   ;;  %v243_v18 = vld [vmem:[%s382_s0 + $0x40] sm:$0xff]  }
   0x6   :  { %249 = vmatpush1.bf16.msra.mxu0 %v236_v2  ;;  %281 = vmatpush1.bf16.msra.mxu1 %v236_v2  ;;  %v15_v19 = vld [vmem:[%s383_s1 + $0x8] sm:$0xff]  ;;  %v17_v20 = vld [vmem:[%s383_s1 + $0x18] sm:$0xff] }
   0x7   :  { %250 = vmatprep.subr.bf16.mxu0 %v293_v0  ;;  %273 = vmatprep.subr.bf16.mxu1 %v293_v0  ;;  %v21_v23 = vunpack.c.h.bf16 %v15_v19  ;;  %v25_v24 = vunpack.c.h.bf16 %v17_v20  ;;  %v20_v25 = vunpack.c.l.bf16 %v15_v19  ;;  %v24_v26 = vunpack.c.l.bf16 %v17_v20 }
   0x8   :  { %78 = vperm.xlu1 %292, %v64_v8   ;;  %68 = vperm.xlu0 %291, %v62_v9  }
   0xa   :  { %252 = vmatpush1.bf16.msra.mxu0 %v237_v10  ;;  %282 = vmatpush1.bf16.msra.mxu1 %v237_v10 }
   0xb   :  { %253 = vmatprep.subr.bf16.mxu0 %v293_v0  ;;  %274 = vmatprep.subr.bf16.mxu1 %v293_v0 }
   0xc   :  { %83 = vperm.xlu1 %292, %v65_v11   ;;  %73 = vperm.xlu0 %291, %v63_v12  }
   0xe   :  { %255 = vmatpush1.bf16.msra.mxu0 %v238_v13  ;;  %283 = vmatpush1.bf16.msra.mxu1 %v238_v13 }
   0xf   :  { %256 = vmatprep.subr.bf16.mxu0 %v293_v0  ;;  %275 = vmatprep.subr.bf16.mxu1 %v293_v0 }
  0x12   :  { %258 = vmatpush1.bf16.msra.mxu0 %v239_v14  ;;  %284 = vmatpush1.bf16.msra.mxu1 %v239_v14 }
  0x13   :  { %259 = vmatprep.subr.bf16.mxu0 %v293_v0  ;;  %276 = vmatprep.subr.bf16.mxu1 %v293_v0 }
  0x16   :  { %261 = vmatpush1.bf16.msra.mxu0 %v240_v15  ;;  %285 = vmatpush1.bf16.msra.mxu1 %v240_v15 }
  0x17   :  { %262 = vmatprep.subr.bf16.mxu0 %v293_v0  ;;  %277 = vmatprep.subr.bf16.mxu1 %v293_v0 }
  0x1a   :  { %264 = vmatpush1.bf16.msra.mxu0 %v241_v16  ;;  %286 = vmatpush1.bf16.msra.mxu1 %v241_v16 }
  0x1b   :  { %265 = vmatprep.subr.bf16.mxu0 %v293_v0  ;;  %278 = vmatprep.subr.bf16.mxu1 %v293_v0 }
  0x1e   :  { %267 = vmatpush1.bf16.msra.mxu0 %v242_v17  ;;  %287 = vmatpush1.bf16.msra.mxu1 %v242_v17 }
  0x1f   :  { %268 = vmatprep.subr.bf16.mxu0 %v293_v0  ;;  %279 = vmatprep.subr.bf16.mxu1 %v293_v0 }
  0x22   :  { %270 = vmatpush1.bf16.msra.mxu0 %v243_v18  ;;  %288 = vmatpush1.bf16.msra.mxu1 %v243_v18 }
  0x25   :  { %164 = vmatmul.mubr.f32.vlgmr.msra.gmra.mrb[0].mxu0 %v18_v21  ;;  %174 = vmatmul.mubr.f32.vlgmr.msra.gmra.mrb[0].mxu1 %v22_v22 }
  0x26   :  { %197 = vmatprep.mubr.msk.f32.mxu0 %vm86_vm0, %v21_v23  ;;  %199 = vmatprep.mubr.msk.f32.mxu1 %vm86_vm0, %v25_v24 }
  0x29   :  { %169 = vmatmul.mubr.f32.gmra.mrb[2].mxu0 %v20_v25  ;;  %179 = vmatmul.mubr.f32.gmra.mrb[2].mxu1 %v24_v26 }
  0x87   :  { %v79_v27 = vpop.permute.xlu1 %78  ;;  %v69_v28 = vpop.permute.xlu0 %68 }
  0x8b   :  { %v84_v35 = vpop.permute.xlu1 %83  ;;  %v74_v36 = vpop.permute.xlu0 %73 }
  0xf8   :  { %v165_v29 = vpop.f32.mrb[0].mxu0  ;;  %v175_v30 = vpop.f32.mrb[0].mxu1 }
  0xf9   :  { %v166_v31 = vadd.f32 %v165_v29, %v69_v28  ;;  %v176_v32 = vadd.f32 %v175_v30, %v79_v27  ;;  %v167_v33 = vpop.f32.mrb[1].mxu0  ;;  %v177_v34 = vpop.f32.mrb[1].mxu1 }
  0xfb   :  { %v184_v37 = vmax.f32 %v166_v31, 0.0  ;;  %v186_v38 = vmax.f32 %v176_v32, 0.0 }
  0xfc   :  { %v170_v39 = vpop.f32.mrb[2].mxu0  ;;  %v180_v40 = vpop.f32.mrb[2].mxu1 }
  0xfd   :  { %188 = vst [vmem:[%s385_s3] sm:$0xff] %v184_v37  ;;  %190 = vst [vmem:[%s385_s3 + $0x10] sm:$0xff] %v186_v38  ;;  %v171_v41 = vadd.f32 %v170_v39, %v74_v36  ;;  %v181_v42 = vadd.f32 %v180_v40, %v84_v35  ;;  %v172_v43 = vpop.f32.mrb[3].mxu0  ;;  %v182_v44 = vpop.f32.mrb[3].mxu1 }
  0xff   :  { %v185_v45 = vmax.f32 %v171_v41, 0.0  ;;  %v187_v46 = vmax.f32 %v181_v42, 0.0 }
 0x101   :  { %189 = vst [vmem:[%s385_s3 + $0x8] sm:$0xff] %v185_v45  ;;  %191 = vst [vmem:[%s385_s3 + $0x18] sm:$0xff] %v187_v46 }

// kernel: forward.15
= control target key start
LH: loop header
LB: loop body
LE: loop exit
PB: predicated region body
PF: predicated region fallthrough
CT: control target
= control target key end

     0   :  { %vm50_vm0 = vcmask 130048   ;;  %v198_v3 = vmov 0   ;;  %s256_s0 = inlined_call_operand.vmem [shape: bf16[16,128], index: 0, kind: input, shape index: {}]   ;;  %s257_s1 = inlined_call_operand.vmem [shape: bf16[32,16], index: 1, kind: input, shape index: {}]   ;;  %s258_s2 = inlined_call_operand.vmem [shape: f32[32,1], index: 2, kind: input, shape index: {}]   ;;  %s259_s3 = inlined_call_operand.vmem [shape: f32[32,128], index: 3, kind: output, shape index: {}]  }
   0x1   :  { %v169_v0 = vld [vmem:[%s256_s0] sm:$0xff]   ;;  %v172_v2 = vld [vmem:[%s257_s1 + $0x8] sm:$0xff]   ;;  %197 = vset.pattern.permute.xlu1 %v198_v3  ;;  %196 = vset.pattern.permute.xlu0 %v198_v3  ;;  %v28_v8 = vld [vmem:[%s258_s2 + $0x10] sm:$0xff] }
   0x2   :  { %v161_v1 = vld [vmem:[%s257_s1] sm:$0xff]   ;;  %190 = vmatprep.subr.bf16.mxu0 %v169_v0  ;;  %193 = vmatprep.subr.bf16.mxu1 %v169_v0  ;;  %v166_v6 = vunpack.c.l.bf16 %v172_v2  ;;  %v167_v7 = vunpack.c.h.bf16 %v172_v2  ;;  %v29_v10 = vld [vmem:[%s258_s2 + $0x18] sm:$0xff]  ;;  %v27_v11 = vld [vmem:[%s258_s2 + $0x8] sm:$0xff] }
   0x3   :  { %v162_v4 = vunpack.c.l.bf16 %v161_v1  ;;  %v163_v5 = vunpack.c.h.bf16 %v161_v1  ;;  %v26_v9 = vld [vmem:[%s258_s2] sm:$0xff]  ;;  %192 = vmatpush3.bf16.msra.mxu0 %v169_v0  ;;  %194 = vmatpush3.bf16.msra.mxu1 %v169_v0 }
   0x4   :  { %186 = vmatprep.mubr.msk.f32.mxu1 %vm50_vm0, %v166_v6  ;;  %42 = vperm.xlu1 %197, %v28_v8  }
   0x5   :  { %183 = vmatprep.mubr.msk.f32.mxu0 %vm50_vm0, %v162_v4  ;;  %32 = vperm.xlu0 %196, %v26_v9  }
   0x6   :  { %184 = vmatmul.mubr.msk.f32.vlgmr.msra.gmra.mrb[0].mxu0 %vm50_vm0, %v163_v5  ;;  %187 = vmatmul.mubr.msk.f32.vlgmr.msra.gmra.mrb[0].mxu1 %vm50_vm0, %v167_v7 }
   0x8   :  { %47 = vperm.xlu1 %197, %v29_v10  }
   0x9   :  { %37 = vperm.xlu0 %196, %v27_v11  }
  0x83   :  { %v43_v12 = vpop.permute.xlu1 %42 }
  0x84   :  { %v33_v13 = vpop.permute.xlu0 %32 }
  0x87   :  { %v48_v14 = vpop.permute.xlu1 %47 }
  0x88   :  { %v38_v15 = vpop.permute.xlu0 %37 }
  0xd9   :  { %v185_v16 = vpop.f32.mrb[0].mxu0  ;;  %v188_v17 = vpop.f32.mrb[0].mxu1 }
  0xda   :  { %v135_v18 = vadd.f32 %v185_v16, %v38_v15  ;;  %v145_v19 = vadd.f32 %v188_v17, %v48_v14  ;;  %v129_v20 = vpop.f32.mrb[1].mxu0  ;;  %v139_v21 = vpop.f32.mrb[1].mxu1 }
  0xdb   :  { %v130_v22 = vadd.f32 %v129_v20, %v33_v13  ;;  %v140_v23 = vadd.f32 %v139_v21, %v43_v12 }
  0xdc   :  { %149 = vst [vmem:[%s259_s3 + $0x8] sm:$0xff] %v135_v18  ;;  %151 = vst [vmem:[%s259_s3 + $0x18] sm:$0xff] %v145_v19 }
  0xdd   :  { %148 = vst [vmem:[%s259_s3] sm:$0xff] %v130_v22  ;;  %150 = vst [vmem:[%s259_s3 + $0x10] sm:$0xff] %v140_v23 }

// kernel: forward.17
= control target key start
LH: loop header
LB: loop body
LE: loop exit
PB: predicated region body
PF: predicated region fallthrough
CT: control target
= control target key end

     0   :  { %v538_v3 = vmov 0   ;;  %vm133_vm0 = vcmask 261120   ;;  %s676_s0 = inlined_call_operand.vmem [shape: bf16[288,128], index: 0, kind: input, shape index: {}]   ;;  %s677_s1 = inlined_call_operand.vmem [shape: bf16[32,288], index: 1, kind: input, shape index: {}]   ;;  %s678_s2 = inlined_call_operand.vmem [shape: f32[32,1], index: 2, kind: input, shape index: {}]   ;;  %s679_s3 = inlined_call_operand.vmem [shape: f32[32,128], index: 3, kind: input, shape index: {}]   ;;  %s680_s4 = inlined_call_operand.vmem [shape: f32[32,128], index: 4, kind: output, shape index: {}]  }
   0x1   :  { %v419_v0 = vld [vmem:[%s676_s0 + $0x40] sm:$0xff]   ;;  %v420_v2 = vld [vmem:[%s676_s0 + $0x48] sm:$0xff]   ;;  %536 = vset.pattern.permute.xlu0 %v538_v3  ;;  %537 = vset.pattern.permute.xlu1 %v538_v3  ;;  %v421_v5 = vld [vmem:[%s676_s0 + $0x50] sm:$0xff]  }
   0x2   :  { %v341_v1 = vld [vmem:[%s676_s0] sm:$0xff]   ;;  %496 = vmatprep.subr.bf16.mxu0 %v419_v0  ;;  %v412_v4 = vld [vmem:[%s676_s0 + $0x8] sm:$0xff]   ;;  %v413_v11 = vld [vmem:[%s676_s0 + $0x10] sm:$0xff]  }
   0x3   :  { %498 = vmatpush3.bf16.msra.mxu0 %v341_v1  ;;  %v427_v6 = vld [vmem:[%s676_s0 + $0x80] sm:$0xff]   ;;  %v428_v9 = vld [vmem:[%s676_s0 + $0x88] sm:$0xff]   ;;  %v422_v12 = vld [vmem:[%s676_s0 + $0x58] sm:$0xff]  }
   0x4   :  { %500 = vmatprep.subr.bf16.mxu0 %v420_v2  ;;  %v17_v7 = vld [vmem:[%s677_s1] sm:$0xff]  ;;  %528 = vmatprep.subr.bf16.mxu1 %v427_v6  ;;  %v18_v10 = vld [vmem:[%s677_s1 + $0x8] ss:$12 sps:$4 sm:$0xff]   ;;  %v414_v19 = vld [vmem:[%s676_s0 + $0x18] sm:$0xff]  }
   0x5   :  { %v26_v8 = vunpack.c.h.bf16 %v17_v7  ;;  %530 = vmatpush3.bf16.msra.mxu1 %v427_v6  ;;  %v27_v13 = vunpack.c.l.bf16 %v18_v10  ;;  %v22_v14 = vld [vmem:[%s677_s1 + $0x20] ss:$12 sps:$4 sm:$0xff]   ;;  %v111_v16 = vld [vmem:[%s678_s2 + $0x10] sm:$0xff]  ;;  %v30_v17 = vunpack.c.h.bf16 %v18_v10  ;;  %v112_v22 = vld [vmem:[%s678_s2 + $0x18] sm:$0xff]  ;;  %v25_v32 = vunpack.c.l.bf16 %v17_v7 }
   0x6   :  { %532 = vmatprep.subr.bf16.mxu1 %v428_v9  ;;  %v109_v15 = vld [vmem:[%s678_s2] sm:$0xff]  ;;  %125 = vperm.xlu1 %537, %v111_v16   ;;  %v110_v18 = vld [vmem:[%s678_s2 + $0x8] sm:$0xff]  ;;  %v33_v20 = vunpack.c.l.bf16 %v22_v14  ;;  %v36_v23 = vunpack.c.h.bf16 %v22_v14  ;;  %v425_v27 = vld [vmem:[%s676_s0 + $0x70] sm:$0xff]  }
   0x7   :  { %502 = vmatpush3.bf16.msra.mxu0 %v412_v4  ;;  %210 = vmatprep.mubr.f32.mxu0 %v26_v8  ;;  %v423_v21 = vld [vmem:[%s676_s0 + $0x60] sm:$0xff]   ;;  %v424_v25 = vld [vmem:[%s676_s0 + $0x68] sm:$0xff]   ;;  %v417_v28 = vld [vmem:[%s676_s0 + $0x30] sm:$0xff]  }
   0x8   :  { %504 = vmatprep.subr.bf16.mxu0 %v421_v5  ;;  %489 = vmatprep.mubr.msk.f32.mxu1 %vm133_vm0, %v27_v13  ;;  %v415_v24 = vld [vmem:[%s676_s0 + $0x20] sm:$0xff]   ;;  %v416_v26 = vld [vmem:[%s676_s0 + $0x28] sm:$0xff]   ;;  %v426_v29 = vld [vmem:[%s676_s0 + $0x78] sm:$0xff]  }
   0x9   :  { %115 = vperm.xlu0 %536, %v109_v15   ;;  %534 = vmatpush3.bf16.msra.mxu1 %v428_v9  ;;  %v418_v30 = vld [vmem:[%s676_s0 + $0x38] sm:$0xff]   ;;  %v19_v31 = vld [vmem:[%s677_s1 + $0xc] sm:$0xff]  ;;  %v23_v37 = vld [vmem:[%s677_s1 + $0x24] sm:$0xff] }
   0xa   :  { %130 = vperm.xlu1 %537, %v112_v22   ;;  %v29_v33 = vunpack.c.h.bf16 %v19_v31  ;;  %v21_v34 = vld [vmem:[%s677_s1 + $0x18] sm:$0xff]  ;;  %v28_v35 = vunpack.c.l.bf16 %v19_v31  ;;  %v35_v39 = vunpack.c.h.bf16 %v23_v37  ;;  %v34_v40 = vunpack.c.l.bf16 %v23_v37  ;;  %v316_v52 = vld [vmem:[%s679_s3] sm:$0xff]  ;;  %v317_v60 = vld [vmem:[%s679_s3 + $0x8] sm:$0xff] }
   0xb   :  { %506 = vmatpush3.bf16.msra.mxu0 %v413_v11  ;;  %v32_v36 = vunpack.c.h.bf16 %v21_v34  ;;  %v31_v38 = vunpack.c.l.bf16 %v21_v34  ;;  %v318_v5 = vld [vmem:[%s679_s3 + $0x10] sm:$0xff] }
   0xc   :  { %508 = vmatprep.subr.bf16.mxu0 %v422_v12  ;;  %490 = vmatmul.mubr.msk.f32.vlgmr.msra.gmra.mrb[0].mxu1 %vm133_vm0, %v30_v17  ;;  %v319_v12 = vld [vmem:[%s679_s3 + $0x18] sm:$0xff] }
   0xd   :  { %120 = vperm.xlu0 %536, %v110_v18   ;;  %492 = vmatprep.mubr.msk.f32.mxu1 %vm133_vm0, %v33_v20 }
   0xf   :  { %510 = vmatpush3.bf16.msra.mxu0 %v414_v19 }
  0x10   :  { %512 = vmatprep.subr.bf16.mxu0 %v423_v21  ;;  %493 = vmatmul.mubr.msk.f32.gmra.mrb[2].mxu1 %vm133_vm0, %v36_v23 }
  0x13   :  { %514 = vmatpush3.bf16.msra.mxu0 %v415_v24 }
  0x14   :  { %516 = vmatprep.subr.bf16.mxu0 %v424_v25 }
  0x17   :  { %518 = vmatpush3.bf16.msra.mxu0 %v416_v26 }
  0x18   :  { %520 = vmatprep.subr.bf16.mxu0 %v425_v27 }
  0x1b   :  { %522 = vmatpush3.bf16.msra.mxu0 %v417_v28 }
  0x1c   :  { %524 = vmatprep.subr.bf16.mxu0 %v426_v29 }
  0x1f   :  { %526 = vmatpush3.bf16.msra.mxu0 %v418_v30 }
  0x22   :  { %211 = vmatmul.mubr.f32.vlgmr.msra.gmra.mrb[0].mxu0 %v25_v32 }
  0x23   :  { %215 = vmatprep.mubr.f32.mxu0 %v29_v33 }
  0x26   :  { %216 = vmatmul.mubr.f32.gmra.mrb[2].mxu0 %v28_v35 }
  0x27   :  { %220 = vmatprep.mubr.f32.mxu0 %v32_v36 }
  0x2a   :  { %221 = vmatmul.mubr.f32.gmra.mrb[4].mxu0 %v31_v38 }
  0x2b   :  { %225 = vmatprep.mubr.f32.mxu0 %v35_v39 }
  0x2e   :  { %226 = vmatmul.mubr.f32.gmra.mrb[6].mxu0 %v34_v40 }
  0x85   :  { %v126_v59 = vpop.permute.xlu1 %125 }
  0x88   :  { %v116_v45 = vpop.permute.xlu0 %115 }
  0x89   :  { %v131_v9 = vpop.permute.xlu1 %130 }
  0x8c   :  { %v121_v53 = vpop.permute.xlu0 %120 }
  0xdf   :  { %v491_v41 = vpop.f32.mrb[0].mxu1 }
  0xe0   :  { %v297_v42 = vpop.f32.mrb[1].mxu1 }
  0xe3   :  { %v494_v43 = vpop.f32.mrb[2].mxu1 }
  0xe4   :  { %v307_v44 = vpop.f32.mrb[3].mxu1 }
  0xf5   :  { %v461_v46 = vpop.f32.mrb[0].mxu0 }
  0xf6   :  { %v462_v47 = vpop.f32.mrb[1].mxu0 }
  0xf7   :  { %v463_v48 = vadd.f32 %v462_v47, %v461_v46 }
  0xf9   :  { %v213_v49 = vadd.f32 %v463_v48, %v116_v45  ;;  %v464_v50 = vpop.f32.mrb[2].mxu0 }
  0xfa   :  { %v465_v51 = vpop.f32.mrb[3].mxu0 }
  0xfb   :  { %v466_v54 = vadd.f32 %v465_v51, %v464_v50  ;;  %v298_v55 = vadd.f32 %v297_v42, %v213_v49 }
  0xfd   :  { %v320_v56 = vadd.f32 %v316_v52, %v298_v55  ;;  %v218_v57 = vadd.f32 %v466_v54, %v121_v53  ;;  %v467_v58 = vpop.f32.mrb[4].mxu0 }
  0xfe   :  { %v468_v61 = vpop.f32.mrb[5].mxu0 }
  0xff   :  { %v324_v62 = vmax.f32 %v320_v56, 0.0  ;;  %v303_v63 = vadd.f32 %v491_v41, %v218_v57  ;;  %v469_v0 = vadd.f32 %v468_v61, %v467_v58 }
 0x101   :  { %328 = vst [vmem:[%s680_s4] sm:$0xff] %v324_v62  ;;  %v321_v1 = vadd.f32 %v317_v60, %v303_v63  ;;  %v470_v2 = vpop.f32.mrb[6].mxu0  ;;  %v223_v3 = vadd.f32 %v469_v0, %v126_v59 }
 0x102   :  { %v471_v4 = vpop.f32.mrb[7].mxu0 }
 0x103   :  { %v325_v6 = vmax.f32 %v321_v1, 0.0  ;;  %v472_v7 = vadd.f32 %v471_v4, %v470_v2  ;;  %v308_v8 = vadd.f32 %v307_v44, %v223_v3 }
 0x105   :  { %329 = vst [vmem:[%s680_s4 + $0x8] sm:$0xff] %v325_v6  ;;  %v228_v10 = vadd.f32 %v472_v7, %v131_v9  ;;  %v322_v11 = vadd.f32 %v318_v5, %v308_v8 }
 0x107   :  { %v313_v13 = vadd.f32 %v494_v43, %v228_v10  ;;  %v326_v14 = vmax.f32 %v322_v11, 0.0 }
 0x109   :  { %v323_v15 = vadd.f32 %v319_v12, %v313_v13  ;;  %330 = vst [vmem:[%s680_s4 + $0x10] sm:$0xff] %v326_v14 }
 0x10b   :  { %v327_v16 = vmax.f32 %v323_v15, 0.0 }
 0x10d   :  { %331 = vst [vmem:[%s680_s4 + $0x18] sm:$0xff] %v327_v16 }

// kernel: forward.19
= control target key start
LH: loop header
LB: loop body
LE: loop exit
PB: predicated region body
PF: predicated region fallthrough
CT: control target
= control target key end

     0   :  { %v673_v3 = vmov 0   ;;  %vm174_vm0 = vcmask 261120   ;;  %s848_s0 = inlined_call_operand.vmem [shape: bf16[288,128], index: 0, kind: input, shape index: {}]   ;;  %s849_s1 = inlined_call_operand.vmem [shape: bf16[64,288], index: 1, kind: input, shape index: {}]   ;;  %s850_s2 = inlined_call_operand.vmem [shape: f32[64,1], index: 2, kind: input, shape index: {}]   ;;  %s851_s3 = inlined_call_operand.vmem [shape: f32[64,128], index: 3, kind: output, shape index: {}]  }
   0x1   :  { %v516_v0 = vld [vmem:[%s848_s0 + $0x40] sm:$0xff]   ;;  %v517_v2 = vld [vmem:[%s848_s0 + $0x48] sm:$0xff]   ;;  %671 = vset.pattern.permute.xlu0 %v673_v3  ;;  %672 = vset.pattern.permute.xlu1 %v673_v3  ;;  %v518_v5 = vld [vmem:[%s848_s0 + $0x50] sm:$0xff]  }
   0x2   :  { %v438_v1 = vld [vmem:[%s848_s0] sm:$0xff]   ;;  %615 = vmatprep.subr.bf16.mxu0 %v516_v0  ;;  %654 = vmatprep.subr.bf16.mxu1 %v516_v0  ;;  %v509_v4 = vld [vmem:[%s848_s0 + $0x8] sm:$0xff]   ;;  %v510_v10 = vld [vmem:[%s848_s0 + $0x10] sm:$0xff]  }
   0x3   :  { %617 = vmatpush3.bf16.msra.mxu0 %v438_v1  ;;  %662 = vmatpush3.bf16.msra.mxu1 %v438_v1  ;;  %v712_v6 = vld [vmem:[%s849_s1] sm:$0xff]  ;;  %v717_v7 = vld [vmem:[%s849_s1 + $0x48] sm:$0xff]  ;;  %v519_v11 = vld [vmem:[%s848_s0 + $0x58] sm:$0xff]  }
   0x4   :  { %619 = vmatprep.subr.bf16.mxu0 %v517_v2  ;;  %655 = vmatprep.subr.bf16.mxu1 %v517_v2  ;;  %v31_v8 = vunpack.c.h.bf16 %v712_v6  ;;  %v49_v9 = vunpack.c.h.bf16 %v717_v7  ;;  %v126_v12 = vld [vmem:[%s850_s2] sm:$0xff]  ;;  %v128_v13 = vld [vmem:[%s850_s2 + $0x10] sm:$0xff]  ;;  %v511_v14 = vld [vmem:[%s848_s0 + $0x18] sm:$0xff]   ;;  %v30_v32 = vunpack.c.l.bf16 %v712_v6  ;;  %v48_v33 = vunpack.c.l.bf16 %v717_v7 }
   0x5   :  { %v520_v15 = vld [vmem:[%s848_s0 + $0x60] sm:$0xff]   ;;  %136 = vperm.xlu0 %671, %v126_v12   ;;  %146 = vperm.xlu1 %672, %v128_v13   ;;  %v127_v16 = vld [vmem:[%s850_s2 + $0x8] sm:$0xff]  ;;  %v129_v17 = vld [vmem:[%s850_s2 + $0x18] sm:$0xff] }
   0x6   :  { %263 = vmatprep.mubr.f32.mxu0 %v31_v8  ;;  %293 = vmatprep.mubr.f32.mxu1 %v49_v9  ;;  %v512_v18 = vld [vmem:[%s848_s0 + $0x20] sm:$0xff]   ;;  %v521_v19 = vld [vmem:[%s848_s0 + $0x68] sm:$0xff]   ;;  %v522_v23 = vld [vmem:[%s848_s0 + $0x70] sm:$0xff]  }
   0x7   :  { %621 = vmatpush3.bf16.msra.mxu0 %v509_v4  ;;  %663 = vmatpush3.bf16.msra.mxu1 %v509_v4  ;;  %v130_v20 = vld [vmem:[%s850_s2 + $0x20] sm:$0xff]  ;;  %v131_v21 = vld [vmem:[%s850_s2 + $0x28] sm:$0xff]  ;;  %v132_v24 = vld [vmem:[%s850_s2 + $0x30] sm:$0xff] }
   0x8   :  { %623 = vmatprep.subr.bf16.mxu0 %v518_v5  ;;  %656 = vmatprep.subr.bf16.mxu1 %v518_v5  ;;  %v513_v22 = vld [vmem:[%s848_s0 + $0x28] sm:$0xff]   ;;  %v133_v25 = vld [vmem:[%s850_s2 + $0x38] sm:$0xff]  ;;  %v514_v26 = vld [vmem:[%s848_s0 + $0x30] sm:$0xff]  }
   0x9   :  { %141 = vperm.xlu0 %671, %v127_v16   ;;  %151 = vperm.xlu1 %672, %v129_v17   ;;  %v523_v27 = vld [vmem:[%s848_s0 + $0x78] sm:$0xff]   ;;  %v16_v29 = vld [vmem:[%s849_s1 + $0xc] sm:$0xff]  ;;  %v524_v30 = vld [vmem:[%s848_s0 + $0x80] sm:$0xff]  }
   0xa   :  { %v515_v28 = vld [vmem:[%s848_s0 + $0x38] sm:$0xff]   ;;  %v34_v34 = vunpack.c.h.bf16 %v16_v29  ;;  %v525_v37 = vld [vmem:[%s848_s0 + $0x88] sm:$0xff]   ;;  %v33_v39 = vunpack.c.l.bf16 %v16_v29  ;;  %v22_v49 = vld [vmem:[%s849_s1 + $0x30] sm:$0xff] }
   0xb   :  { %625 = vmatpush3.bf16.msra.mxu0 %v510_v10  ;;  %664 = vmatpush3.bf16.msra.mxu1 %v510_v10  ;;  %v28_v31 = vld [vmem:[%s849_s1 + $0x54] sm:$0xff]  ;;  %v20_v43 = vld [vmem:[%s849_s1 + $0x24] sm:$0xff]  ;;  %v19_v44 = vld [vmem:[%s849_s1 + $0x20] ss:$12 sps:$4 sm:$0xff]   ;;  %v43_v53 = vunpack.c.h.bf16 %v22_v49  ;;  %v42_v57 = vunpack.c.l.bf16 %v22_v49 }
   0xc   :  { %627 = vmatprep.subr.bf16.mxu0 %v519_v11  ;;  %657 = vmatprep.subr.bf16.mxu1 %v519_v11  ;;  %v52_v35 = vunpack.c.h.bf16 %v28_v31  ;;  %v18_v36 = vld [vmem:[%s849_s1 + $0x18] sm:$0xff]  ;;  %v15_v38 = vld [vmem:[%s849_s1 + $0x8] ss:$12 sps:$4 sm:$0xff]   ;;  %v51_v40 = vunpack.c.l.bf16 %v28_v31  ;;  %v40_v47 = vunpack.c.h.bf16 %v20_v43  ;;  %v38_v48 = vunpack.c.l.bf16 %v19_v44 }
   0xd   :  { %156 = vperm.xlu0 %671, %v130_v20   ;;  %161 = vperm.xlu1 %672, %v131_v21   ;;  %v37_v41 = vunpack.c.h.bf16 %v18_v36  ;;  %v32_v42 = vunpack.c.l.bf16 %v15_v38  ;;  %v36_v45 = vunpack.c.l.bf16 %v18_v36  ;;  %v35_v46 = vunpack.c.h.bf16 %v15_v38  ;;  %v23_v50 = vld [vmem:[%s849_s1 + $0x38] ss:$12 sps:$4 sm:$0xff]   ;;  %v24_v55 = vld [vmem:[%s849_s1 + $0x3c] sm:$0xff] }
   0xe   :  { %v39_v51 = vunpack.c.l.bf16 %v20_v43  ;;  %v41_v52 = vunpack.c.h.bf16 %v19_v44  ;;  %v44_v54 = vunpack.c.l.bf16 %v23_v50  ;;  %v27_v56 = vld [vmem:[%s849_s1 + $0x50] ss:$12 sps:$4 sm:$0xff]   ;;  %v47_v58 = vunpack.c.h.bf16 %v23_v50 }
   0xf   :  { %629 = vmatpush3.bf16.msra.mxu0 %v511_v14  ;;  %665 = vmatpush3.bf16.msra.mxu1 %v511_v14  ;;  %v46_v59 = vunpack.c.h.bf16 %v24_v55  ;;  %v50_v60 = vunpack.c.l.bf16 %v27_v56  ;;  %v45_v61 = vunpack.c.l.bf16 %v24_v55  ;;  %v53_v62 = vunpack.c.h.bf16 %v27_v56 }
  0x10   :  { %631 = vmatprep.subr.bf16.mxu0 %v520_v15  ;;  %658 = vmatprep.subr.bf16.mxu1 %v520_v15 }
  0x11   :  { %166 = vperm.xlu0 %671, %v132_v24   ;;  %171 = vperm.xlu1 %672, %v133_v25  }
  0x13   :  { %633 = vmatpush3.bf16.msra.mxu0 %v512_v18  ;;  %666 = vmatpush3.bf16.msra.mxu1 %v512_v18 }
  0x14   :  { %635 = vmatprep.subr.bf16.mxu0 %v521_v19  ;;  %659 = vmatprep.subr.bf16.mxu1 %v521_v19 }
  0x17   :  { %637 = vmatpush3.bf16.msra.mxu0 %v513_v22  ;;  %667 = vmatpush3.bf16.msra.mxu1 %v513_v22 }
  0x18   :  { %639 = vmatprep.subr.bf16.mxu0 %v522_v23  ;;  %660 = vmatprep.subr.bf16.mxu1 %v522_v23 }
  0x1b   :  { %641 = vmatpush3.bf16.msra.mxu0 %v514_v26  ;;  %668 = vmatpush3.bf16.msra.mxu1 %v514_v26 }
  0x1c   :  { %643 = vmatprep.subr.bf16.mxu0 %v523_v27  ;;  %661 = vmatprep.subr.bf16.mxu1 %v523_v27 }
  0x1f   :  { %645 = vmatpush3.bf16.msra.mxu0 %v515_v28  ;;  %669 = vmatpush3.bf16.msra.mxu1 %v515_v28 }
  0x20   :  { %647 = vmatprep.subr.bf16.mxu1 %v524_v30 }
  0x22   :  { %264 = vmatmul.mubr.f32.vlgmr.msra.gmra.mrb[0].mxu0 %v30_v32  ;;  %294 = vmatmul.mubr.f32.vlgmr.msra.gmra.mrb[0].mxu1 %v48_v33 }
  0x23   :  { %649 = vmatpush3.bf16.msra.mxu1 %v524_v30  ;;  %268 = vmatprep.mubr.f32.mxu0 %v34_v34 }
  0x24   :  { %298 = vmatprep.mubr.f32.mxu1 %v52_v35  ;;  %651 = vmatprep.subr.bf16.mxu1 %v525_v37 }
  0x26   :  { %269 = vmatmul.mubr.f32.gmra.mrb[2].mxu0 %v33_v39  ;;  %299 = vmatmul.mubr.f32.gmra.mrb[2].mxu1 %v51_v40 }
  0x27   :  { %653 = vmatpush3.bf16.msra.mxu1 %v525_v37  ;;  %273 = vmatprep.mubr.f32.mxu0 %v37_v41 }
  0x28   :  { %602 = vmatprep.mubr.msk.f32.mxu1 %vm174_vm0, %v32_v42 }
  0x2a   :  { %274 = vmatmul.mubr.f32.gmra.mrb[4].mxu0 %v36_v45  ;;  %603 = vmatmul.mubr.msk.f32.vlgmr.msra.gmra.mrb[4].mxu1 %vm174_vm0, %v35_v46 }
  0x2b   :  { %278 = vmatprep.mubr.f32.mxu0 %v40_v47  ;;  %605 = vmatprep.mubr.msk.f32.mxu1 %vm174_vm0, %v38_v48 }
  0x2e   :  { %279 = vmatmul.mubr.f32.gmra.mrb[6].mxu0 %v39_v51  ;;  %606 = vmatmul.mubr.msk.f32.gmra.mrb[6].mxu1 %vm174_vm0, %v41_v52 }
  0x2f   :  { %283 = vmatprep.mubr.f32.mxu0 %v43_v53  ;;  %608 = vmatprep.mubr.msk.f32.mxu1 %vm174_vm0, %v44_v54 }
  0x32   :  { %284 = vmatmul.mubr.f32.gmra.mrb[8].mxu0 %v42_v57  ;;  %609 = vmatmul.mubr.msk.f32.gmra.mrb[8].mxu1 %vm174_vm0, %v47_v58 }
  0x33   :  { %288 = vmatprep.mubr.f32.mxu0 %v46_v59  ;;  %611 = vmatprep.mubr.msk.f32.mxu1 %vm174_vm0, %v50_v60 }
  0x36   :  { %289 = vmatmul.mubr.f32.gmra.mrb[10].mxu0 %v45_v61  ;;  %612 = vmatmul.mubr.msk.f32.gmra.mrb[10].mxu1 %vm174_vm0, %v53_v62 }
  0x84   :  { %v137_v63 = vpop.permute.xlu0 %136  ;;  %v147_v0 = vpop.permute.xlu1 %146 }
  0x88   :  { %v142_v1 = vpop.permute.xlu0 %141  ;;  %v152_v2 = vpop.permute.xlu1 %151 }
  0x8c   :  { %v157_v15 = vpop.permute.xlu0 %156  ;;  %v162_v16 = vpop.permute.xlu1 %161 }
  0x90   :  { %v167_v35 = vpop.permute.xlu0 %166  ;;  %v172_v36 = vpop.permute.xlu1 %171 }
  0xf5   :  { %v558_v3 = vpop.f32.mrb[0].mxu0  ;;  %v576_v4 = vpop.f32.mrb[0].mxu1 }
  0xf6   :  { %v559_v5 = vpop.f32.mrb[1].mxu0  ;;  %v577_v6 = vpop.f32.mrb[1].mxu1 }
  0xf7   :  { %v560_v7 = vadd.f32 %v559_v5, %v558_v3  ;;  %v578_v8 = vadd.f32 %v577_v6, %v576_v4 }
  0xf9   :  { %v561_v9 = vpop.f32.mrb[2].mxu0  ;;  %v579_v10 = vpop.f32.mrb[2].mxu1  ;;  %v266_v20 = vadd.f32 %v560_v7, %v137_v63  ;;  %v296_v46 = vadd.f32 %v578_v8, %v167_v35 }
  0xfa   :  { %v562_v11 = vpop.f32.mrb[3].mxu0  ;;  %v580_v12 = vpop.f32.mrb[3].mxu1 }
  0xfb   :  { %v563_v13 = vadd.f32 %v562_v11, %v561_v9  ;;  %v581_v14 = vadd.f32 %v580_v12, %v579_v10 }
  0xfd   :  { %v564_v17 = vpop.f32.mrb[4].mxu0  ;;  %v271_v18 = vadd.f32 %v563_v13, %v142_v1  ;;  %v604_v19 = vpop.f32.mrb[4].mxu1  ;;  %v301_v45 = vadd.f32 %v581_v14, %v172_v36 }
  0xfe   :  { %v565_v21 = vpop.f32.mrb[5].mxu0  ;;  %v370_v22 = vpop.f32.mrb[5].mxu1 }
  0xff   :  { %v376_v23 = vadd.f32 %v604_v19, %v271_v18  ;;  %v566_v24 = vadd.f32 %v565_v21, %v564_v17  ;;  %v371_v25 = vadd.f32 %v370_v22, %v266_v20 }
 0x101   :  { %v410_v26 = vmax.f32 %v376_v23, 0.0  ;;  %v409_v27 = vmax.f32 %v371_v25, 0.0  ;;  %v567_v28 = vpop.f32.mrb[6].mxu0  ;;  %v607_v29 = vpop.f32.mrb[6].mxu1  ;;  %v276_v30 = vadd.f32 %v566_v24, %v147_v0 }
 0x102   :  { %v568_v31 = vpop.f32.mrb[7].mxu0  ;;  %v380_v32 = vpop.f32.mrb[7].mxu1 }
 0x103   :  { %418 = vst [vmem:[%s851_s3 + $0x8] sm:$0xff] %v410_v26  ;;  %417 = vst [vmem:[%s851_s3] sm:$0xff] %v409_v27  ;;  %v569_v33 = vadd.f32 %v568_v31, %v567_v28  ;;  %v381_v34 = vadd.f32 %v380_v32, %v276_v30 }
 0x105   :  { %v281_v37 = vadd.f32 %v569_v33, %v152_v2  ;;  %v411_v38 = vmax.f32 %v381_v34, 0.0  ;;  %v570_v39 = vpop.f32.mrb[8].mxu0  ;;  %v610_v40 = vpop.f32.mrb[8].mxu1 }
 0x106   :  { %v571_v41 = vpop.f32.mrb[9].mxu0  ;;  %v390_v42 = vpop.f32.mrb[9].mxu1 }
 0x107   :  { %v386_v43 = vadd.f32 %v607_v29, %v281_v37  ;;  %419 = vst [vmem:[%s851_s3 + $0x10] sm:$0xff] %v411_v38  ;;  %v572_v44 = vadd.f32 %v571_v41, %v570_v39 }
 0x109   :  { %v412_v47 = vmax.f32 %v386_v43, 0.0  ;;  %v286_v48 = vadd.f32 %v572_v44, %v157_v15  ;;  %v573_v49 = vpop.f32.mrb[10].mxu0  ;;  %v613_v50 = vpop.f32.mrb[10].mxu1 }
 0x10a   :  { %v406_v51 = vadd.f32 %v613_v50, %v301_v45  ;;  %v574_v52 = vpop.f32.mrb[11].mxu0  ;;  %v400_v53 = vpop.f32.mrb[11].mxu1 }
 0x10b   :  { %420 = vst [vmem:[%s851_s3 + $0x18] sm:$0xff] %v412_v47  ;;  %v391_v54 = vadd.f32 %v390_v42, %v286_v48  ;;  %v575_v55 = vadd.f32 %v574_v52, %v573_v49  ;;  %v401_v56 = vadd.f32 %v400_v53, %v296_v46 }
 0x10c   :  { %v416_v57 = vmax.f32 %v406_v51, 0.0 }
 0x10d   :  { %v413_v58 = vmax.f32 %v391_v54, 0.0  ;;  %v291_v59 = vadd.f32 %v575_v55, %v162_v16  ;;  %v415_v60 = vmax.f32 %v401_v56, 0.0 }
 0x10e   :  { %424 = vst [vmem:[%s851_s3 + $0x38] sm:$0xff] %v416_v57 }
 0x10f   :  { %421 = vst [vmem:[%s851_s3 + $0x20] sm:$0xff] %v413_v58  ;;  %v396_v61 = vadd.f32 %v610_v40, %v291_v59  ;;  %423 = vst [vmem:[%s851_s3 + $0x30] sm:$0xff] %v415_v60 }
 0x111   :  { %v414_v62 = vmax.f32 %v396_v61, 0.0 }
 0x113   :  { %422 = vst [vmem:[%s851_s3 + $0x28] sm:$0xff] %v414_v62 }

// kernel: forward.18
= control target key start
LH: loop header
LB: loop body
LE: loop exit
PB: predicated region body
PF: predicated region fallthrough
CT: control target
= control target key end

     0   :  { %v311_v3 = vmov 0   ;;  %vm86_vm0 = vcmask 261120   ;;  %s406_s0 = inlined_call_operand.vmem [shape: bf16[32,128], index: 0, kind: input, shape index: {}]   ;;  %s407_s1 = inlined_call_operand.vmem [shape: bf16[64,32], index: 1, kind: input, shape index: {}]   ;;  %s408_s2 = inlined_call_operand.vmem [shape: f32[64,1], index: 2, kind: input, shape index: {}]   ;;  %s409_s3 = inlined_call_operand.vmem [shape: f32[64,128], index: 3, kind: output, shape index: {}]  }
   0x1   :  { %v253_v0 = vld [vmem:[%s406_s0] sm:$0xff]   ;;  %v263_v1 = vld [vmem:[%s406_s0 + $0x8] sm:$0xff]   ;;  %310 = vset.pattern.permute.xlu1 %v311_v3  ;;  %309 = vset.pattern.permute.xlu0 %v311_v3  ;;  %v261_v5 = vld [vmem:[%s407_s1 + $0x10] sm:$0xff]  }
   0x2   :  { %v237_v2 = vld [vmem:[%s407_s1] sm:$0xff]   ;;  %297 = vmatprep.subr.bf16.mxu0 %v253_v0  ;;  %304 = vmatprep.subr.bf16.mxu1 %v253_v0  ;;  %v246_v6 = vunpack.c.l.bf16 %v261_v5  ;;  %v40_v7 = vld [vmem:[%s408_s2 + $0x10] sm:$0xff]  ;;  %v260_v9 = vld [vmem:[%s407_s1 + $0x8] sm:$0xff]   ;;  %v247_v12 = vunpack.c.h.bf16 %v261_v5 }
   0x3   :  { %v238_v4 = vunpack.c.l.bf16 %v237_v2  ;;  %299 = vmatpush3.bf16.msra.mxu0 %v253_v0  ;;  %306 = vmatpush3.bf16.msra.mxu1 %v253_v0  ;;  %v38_v8 = vld [vmem:[%s408_s2] sm:$0xff]  ;;  %v262_v10 = vld [vmem:[%s407_s1 + $0x18] sm:$0xff]   ;;  %v239_v11 = vunpack.c.h.bf16 %v237_v2  ;;  %v242_v13 = vunpack.c.l.bf16 %v260_v9  ;;  %v39_v16 = vld [vmem:[%s408_s2 + $0x8] sm:$0xff]  ;;  %v243_v17 = vunpack.c.h.bf16 %v260_v9 }
   0x4   :  { %301 = vmatprep.subr.bf16.mxu0 %v263_v1  ;;  %305 = vmatprep.subr.bf16.mxu1 %v263_v1  ;;  %v250_v14 = vunpack.c.l.bf16 %v262_v10  ;;  %v41_v15 = vld [vmem:[%s408_s2 + $0x18] sm:$0xff]  ;;  %v251_v18 = vunpack.c.h.bf16 %v262_v10  ;;  %v43_v19 = vld [vmem:[%s408_s2 + $0x28] sm:$0xff]  ;;  %v42_v20 = vld [vmem:[%s408_s2 + $0x20] sm:$0xff] }
   0x5   :  { %284 = vmatprep.mubr.msk.f32.mxu0 %vm86_vm0, %v238_v4  ;;  %290 = vmatprep.mubr.msk.f32.mxu1 %vm86_vm0, %v246_v6  ;;  %v45_v21 = vld [vmem:[%s408_s2 + $0x38] sm:$0xff]  ;;  %v44_v22 = vld [vmem:[%s408_s2 + $0x30] sm:$0xff] }
   0x6   :  { %58 = vperm.xlu1 %310, %v40_v7   ;;  %48 = vperm.xlu0 %309, %v38_v8  }
   0x7   :  { %303 = vmatpush3.bf16.msra.mxu0 %v263_v1  ;;  %307 = vmatpush3.bf16.msra.mxu1 %v263_v1 }
   0xa   :  { %285 = vmatmul.mubr.msk.f32.vlgmr.msra.gmra.mrb[0].mxu0 %vm86_vm0, %v239_v11  ;;  %291 = vmatmul.mubr.msk.f32.vlgmr.msra.gmra.mrb[0].mxu1 %vm86_vm0, %v247_v12 }
   0xb   :  { %287 = vmatprep.mubr.msk.f32.mxu0 %vm86_vm0, %v242_v13  ;;  %293 = vmatprep.mubr.msk.f32.mxu1 %vm86_vm0, %v250_v14 }
   0xc   :  { %63 = vperm.xlu1 %310, %v41_v15   ;;  %53 = vperm.xlu0 %309, %v39_v16  }
   0xe   :  { %288 = vmatmul.mubr.msk.f32.gmra.mrb[2].mxu0 %vm86_vm0, %v243_v17  ;;  %294 = vmatmul.mubr.msk.f32.gmra.mrb[2].mxu1 %vm86_vm0, %v251_v18 }
  0x10   :  { %73 = vperm.xlu1 %310, %v43_v19   ;;  %68 = vperm.xlu0 %309, %v42_v20  }
  0x14   :  { %83 = vperm.xlu1 %310, %v45_v21   ;;  %78 = vperm.xlu0 %309, %v44_v22  }
  0x85   :  { %v59_v23 = vpop.permute.xlu1 %58  ;;  %v49_v24 = vpop.permute.xlu0 %48 }
  0x8b   :  { %v64_v25 = vpop.permute.xlu1 %63  ;;  %v54_v26 = vpop.permute.xlu0 %53 }
  0x8f   :  { %v74_v27 = vpop.permute.xlu1 %73  ;;  %v69_v28 = vpop.permute.xlu0 %68 }
  0x93   :  { %v84_v37 = vpop.permute.xlu1 %83  ;;  %v79_v38 = vpop.permute.xlu0 %78 }
  0xdd   :  { %v286_v29 = vpop.f32.mrb[0].mxu0  ;;  %v292_v30 = vpop.f32.mrb[0].mxu1 }
  0xde   :  { %v183_v31 = vadd.f32 %v286_v29, %v54_v26  ;;  %v203_v32 = vadd.f32 %v292_v30, %v74_v27  ;;  %v177_v33 = vpop.f32.mrb[1].mxu0  ;;  %v197_v34 = vpop.f32.mrb[1].mxu1 }
  0xdf   :  { %v178_v35 = vadd.f32 %v177_v33, %v49_v24  ;;  %v198_v36 = vadd.f32 %v197_v34, %v69_v28 }
  0xe0   :  { %217 = vst [vmem:[%s409_s3 + $0x8] sm:$0xff] %v183_v31  ;;  %221 = vst [vmem:[%s409_s3 + $0x28] sm:$0xff] %v203_v32 }
  0xe1   :  { %216 = vst [vmem:[%s409_s3] sm:$0xff] %v178_v35  ;;  %220 = vst [vmem:[%s409_s3 + $0x20] sm:$0xff] %v198_v36  ;;  %v289_v39 = vpop.f32.mrb[2].mxu0  ;;  %v295_v40 = vpop.f32.mrb[2].mxu1 }
  0xe2   :  { %v193_v41 = vadd.f32 %v289_v39, %v64_v25  ;;  %v213_v42 = vadd.f32 %v295_v40, %v84_v37  ;;  %v187_v43 = vpop.f32.mrb[3].mxu0  ;;  %v207_v44 = vpop.f32.mrb[3].mxu1 }
  0xe3   :  { %v188_v45 = vadd.f32 %v187_v43, %v59_v23  ;;  %v208_v46 = vadd.f32 %v207_v44, %v79_v38 }
  0xe4   :  { %219 = vst [vmem:[%s409_s3 + $0x18] sm:$0xff] %v193_v41  ;;  %223 = vst [vmem:[%s409_s3 + $0x38] sm:$0xff] %v213_v42 }
  0xe5   :  { %218 = vst [vmem:[%s409_s3 + $0x10] sm:$0xff] %v188_v45  ;;  %222 = vst [vmem:[%s409_s3 + $0x30] sm:$0xff] %v208_v46 }

// kernel: forward.21
= control target key start
LH: loop header
LB: loop body
LE: loop exit
PB: predicated region body
PF: predicated region fallthrough
CT: control target
= control target key end

     0   :  { %v1064_v3 = vmov 0   ;;  %vm270_vm0 = vcmask 523264   ;;  %s1323_s0 = inlined_call_operand.vmem [shape: bf16[576,128], index: 0, kind: input, shape index: {}]   ;;  %s1324_s1 = inlined_call_operand.vmem [shape: bf16[64,576], index: 1, kind: input, shape index: {}]   ;;  %s1325_s2 = inlined_call_operand.vmem [shape: f32[64,1], index: 2, kind: input, shape index: {}]   ;;  %s1326_s3 = inlined_call_operand.vmem [shape: f32[64,128], index: 3, kind: output, shape index: {}]  }
   0x1   :  { %v789_v0 = vld [vmem:[%s1323_s0 + $0x40] sm:$0xff]   ;;  %1062 = vset.pattern.permute.xlu0 %v1064_v3  ;;  %1063 = vset.pattern.permute.xlu1 %v1064_v3  ;;  %v790_v5 = vld [vmem:[%s1323_s0 + $0x48] sm:$0xff]   ;;  %v791_v9 = vld [vmem:[%s1323_s0 + $0x50] sm:$0xff]  }
   0x2   :  { %v805_v1 = vld [vmem:[%s1323_s0 + $0xc0] sm:$0xff]   ;;  %974 = vmatprep.subr.bf16.mxu0 %v789_v0  ;;  %v806_v6 = vld [vmem:[%s1323_s0 + $0xc8] sm:$0xff]   ;;  %v807_v10 = vld [vmem:[%s1323_s0 + $0xd0] sm:$0xff]  }
   0x3   :  { %v639_v2 = vld [vmem:[%s1323_s0] sm:$0xff]   ;;  %1006 = vmatprep.subr.bf16.mxu1 %v805_v1  ;;  %v782_v7 = vld [vmem:[%s1323_s0 + $0x8] sm:$0xff]   ;;  %v783_v11 = vld [vmem:[%s1323_s0 + $0x10] sm:$0xff]  }
   0x4   :  { %v797_v4 = vld [vmem:[%s1323_s0 + $0x80] sm:$0xff]   ;;  %976 = vmatpush3.bf16.msra.mxu0 %v639_v2  ;;  %v798_v8 = vld [vmem:[%s1323_s0 + $0x88] sm:$0xff]   ;;  %v799_v12 = vld [vmem:[%s1323_s0 + $0x90] sm:$0xff]  }
   0x5   :  { %1008 = vmatpush3.bf16.msra.mxu1 %v797_v4  ;;  %978 = vmatprep.subr.bf16.mxu0 %v790_v5  ;;  %v792_v13 = vld [vmem:[%s1323_s0 + $0x58] sm:$0xff]   ;;  %v1130_v15 = vld [vmem:[%s1324_s1] sm:$0xff]  ;;  %v1142_v19 = vld [vmem:[%s1324_s1 + $0x8] sm:$0xff] }
   0x6   :  { %1010 = vmatprep.subr.bf16.mxu1 %v806_v6  ;;  %v808_v14 = vld [vmem:[%s1323_s0 + $0xd8] sm:$0xff]   ;;  %v39_v18 = vunpack.c.h.bf16 %v1130_v15  ;;  %v793_v20 = vld [vmem:[%s1323_s0 + $0x60] sm:$0xff]   ;;  %v41_v22 = vunpack.c.h.bf16 %v1142_v19  ;;  %v794_v25 = vld [vmem:[%s1323_s0 + $0x68] sm:$0xff]   ;;  %v38_v46 = vunpack.c.l.bf16 %v1130_v15  ;;  %v40_v47 = vunpack.c.l.bf16 %v1142_v19 }
   0x7   :  { %v784_v16 = vld [vmem:[%s1323_s0 + $0x18] sm:$0xff]   ;;  %v809_v21 = vld [vmem:[%s1323_s0 + $0xe0] sm:$0xff]   ;;  %v810_v26 = vld [vmem:[%s1323_s0 + $0xe8] sm:$0xff]  }
   0x8   :  { %980 = vmatpush3.bf16.msra.mxu0 %v782_v7  ;;  %v800_v17 = vld [vmem:[%s1323_s0 + $0x98] sm:$0xff]   ;;  %359 = vmatprep.mubr.f32.mxu0 %v39_v18  ;;  %v785_v23 = vld [vmem:[%s1323_s0 + $0x20] sm:$0xff]   ;;  %v786_v28 = vld [vmem:[%s1323_s0 + $0x28] sm:$0xff]  }
   0x9   :  { %1012 = vmatpush3.bf16.msra.mxu1 %v798_v8  ;;  %982 = vmatprep.subr.bf16.mxu0 %v791_v9  ;;  %v801_v24 = vld [vmem:[%s1323_s0 + $0xa0] sm:$0xff]   ;;  %v802_v29 = vld [vmem:[%s1323_s0 + $0xa8] sm:$0xff]   ;;  %v224_v30 = vld [vmem:[%s1325_s2 + $0x10] sm:$0xff] }
   0xa   :  { %1014 = vmatprep.subr.bf16.mxu1 %v807_v10  ;;  %464 = vmatprep.mubr.f32.mxu1 %v41_v22  ;;  %v222_v27 = vld [vmem:[%s1325_s2] sm:$0xff]  ;;  %v795_v31 = vld [vmem:[%s1323_s0 + $0x70] sm:$0xff]   ;;  %v223_v33 = vld [vmem:[%s1325_s2 + $0x8] sm:$0xff] }
   0xb   :  { %v811_v32 = vld [vmem:[%s1323_s0 + $0xf0] sm:$0xff]   ;;  %232 = vperm.xlu0 %1062, %v222_v27   ;;  %242 = vperm.xlu1 %1063, %v224_v30   ;;  %v225_v34 = vld [vmem:[%s1325_s2 + $0x18] sm:$0xff]  ;;  %v227_v39 = vld [vmem:[%s1325_s2 + $0x28] sm:$0xff] }
   0xc   :  { %984 = vmatpush3.bf16.msra.mxu0 %v783_v11  ;;  %v787_v35 = vld [vmem:[%s1323_s0 + $0x30] sm:$0xff]   ;;  %v796_v37 = vld [vmem:[%s1323_s0 + $0x78] sm:$0xff]   ;;  %v226_v40 = vld [vmem:[%s1325_s2 + $0x20] sm:$0xff] }
   0xd   :  { %1016 = vmatpush3.bf16.msra.mxu1 %v799_v12  ;;  %986 = vmatprep.subr.bf16.mxu0 %v792_v13  ;;  %v803_v36 = vld [vmem:[%s1323_s0 + $0xb0] sm:$0xff]   ;;  %v812_v38 = vld [vmem:[%s1323_s0 + $0xf8] sm:$0xff]   ;;  %v813_v43 = vld [vmem:[%s1323_s0 + $0x100] sm:$0xff]  }
   0xe   :  { %1018 = vmatprep.subr.bf16.mxu1 %v808_v14  ;;  %v788_v41 = vld [vmem:[%s1323_s0 + $0x38] sm:$0xff]   ;;  %v228_v49 = vld [vmem:[%s1325_s2 + $0x30] sm:$0xff]  ;;  %v20_v52 = vld [vmem:[%s1324_s1 + $0x28] sm:$0xff] }
   0xf   :  { %237 = vperm.xlu0 %1062, %v223_v33   ;;  %247 = vperm.xlu1 %1063, %v225_v34   ;;  %v804_v42 = vld [vmem:[%s1323_s0 + $0xb8] sm:$0xff]   ;;  %v21_v53 = vld [vmem:[%s1324_s1 + $0x30] sm:$0xff]  ;;  %v814_v56 = vld [vmem:[%s1323_s0 + $0x108] sm:$0xff]   ;;  %v49_v57 = vunpack.c.h.bf16 %v20_v52  ;;  %v48_v61 = vunpack.c.l.bf16 %v20_v52 }
  0x10   :  { %988 = vmatpush3.bf16.msra.mxu0 %v784_v16  ;;  %v17_v44 = vld [vmem:[%s1324_s1 + $0x14] sm:$0xff]  ;;  %v18_v45 = vld [vmem:[%s1324_s1 + $0x1c] sm:$0xff]  ;;  %v51_v58 = vunpack.c.h.bf16 %v21_v53  ;;  %v24_v60 = vld [vmem:[%s1324_s1 + $0x44] sm:$0xff]  ;;  %v50_v62 = vunpack.c.l.bf16 %v21_v53 }
  0x11   :  { %1020 = vmatpush3.bf16.msra.mxu1 %v800_v17  ;;  %990 = vmatprep.subr.bf16.mxu0 %v793_v20  ;;  %v229_v48 = vld [vmem:[%s1325_s2 + $0x38] sm:$0xff]  ;;  %v44_v50 = vunpack.c.h.bf16 %v17_v44  ;;  %v46_v51 = vunpack.c.h.bf16 %v18_v45  ;;  %v43_v54 = vunpack.c.l.bf16 %v17_v44  ;;  %v45_v55 = vunpack.c.l.bf16 %v18_v45  ;;  %v815_v63 = vld [vmem:[%s1323_s0 + $0x110] sm:$0xff]   ;;  %v29_v9 = vld [vmem:[%s1324_s1 + $0x64] sm:$0xff] }
  0x12   :  { %1022 = vmatprep.subr.bf16.mxu1 %v809_v21  ;;  %v23_v59 = vld [vmem:[%s1324_s1 + $0x3c] sm:$0xff]  ;;  %v56_v1 = vunpack.c.h.bf16 %v24_v60  ;;  %v26_v2 = vld [vmem:[%s1324_s1 + $0x50] sm:$0xff]  ;;  %v55_v5 = vunpack.c.l.bf16 %v24_v60  ;;  %v64_v13 = vunpack.c.h.bf16 %v29_v9  ;;  %v63_v17 = vunpack.c.l.bf16 %v29_v9  ;;  %v22_v33 = vld [vmem:[%s1324_s1 + $0x38] ss:$80 sps:$4 sm:$0xff]  }
  0x13   :  { %257 = vperm.xlu1 %1063, %v227_v39   ;;  %252 = vperm.xlu0 %1062, %v226_v40   ;;  %v54_v0 = vunpack.c.h.bf16 %v23_v59  ;;  %v27_v3 = vld [vmem:[%s1324_s1 + $0x58] sm:$0xff]  ;;  %v53_v4 = vunpack.c.l.bf16 %v23_v59  ;;  %v59_v7 = vunpack.c.h.bf16 %v26_v2  ;;  %v30_v10 = vld [vmem:[%s1324_s1 + $0x6c] sm:$0xff]  ;;  %v58_v11 = vunpack.c.l.bf16 %v26_v2  ;;  %v33_v16 = vld [vmem:[%s1324_s1 + $0x80] sm:$0xff] }
  0x14   :  { %992 = vmatpush3.bf16.msra.mxu0 %v785_v23  ;;  %v816_v6 = vld [vmem:[%s1323_s0 + $0x118] sm:$0xff]   ;;  %v61_v8 = vunpack.c.h.bf16 %v27_v3  ;;  %v60_v12 = vunpack.c.l.bf16 %v27_v3  ;;  %v66_v14 = vunpack.c.h.bf16 %v30_v10  ;;  %v65_v18 = vunpack.c.l.bf16 %v30_v10  ;;  %v35_v21 = vld [vmem:[%s1324_s1 + $0x8c] sm:$0xff] }
  0x15   :  { %1024 = vmatpush3.bf16.msra.mxu1 %v801_v24  ;;  %994 = vmatprep.subr.bf16.mxu0 %v794_v25  ;;  %v32_v15 = vld [vmem:[%s1324_s1 + $0x78] sm:$0xff]  ;;  %v71_v20 = vunpack.c.h.bf16 %v33_v16  ;;  %v70_v24 = vunpack.c.l.bf16 %v33_v16  ;;  %v74_v25 = vunpack.c.h.bf16 %v35_v21  ;;  %v16_v27 = vld [vmem:[%s1324_s1 + $0x10] ss:$80 sps:$4 sm:$0xff]  }
  0x16   :  { %1026 = vmatprep.subr.bf16.mxu1 %v810_v26  ;;  %v69_v19 = vunpack.c.h.bf16 %v32_v15  ;;  %v36_v22 = vld [vmem:[%s1324_s1 + $0x94] sm:$0xff]  ;;  %v68_v23 = vunpack.c.l.bf16 %v32_v15  ;;  %v42_v30 = vunpack.c.l.bf16 %v16_v27 }
  0x17   :  { %267 = vperm.xlu1 %1063, %v229_v48   ;;  %262 = vperm.xlu0 %1062, %v228_v49   ;;  %v76_v26 = vunpack.c.h.bf16 %v36_v22 }
  0x18   :  { %996 = vmatpush3.bf16.msra.mxu0 %v786_v28  ;;  %v73_v28 = vunpack.c.l.bf16 %v35_v21 }
  0x19   :  { %1028 = vmatpush3.bf16.msra.mxu1 %v802_v29  ;;  %998 = vmatprep.subr.bf16.mxu0 %v795_v31  ;;  %v75_v29 = vunpack.c.l.bf16 %v36_v22  ;;  %v62_v31 = vunpack.c.h.bf16 %v16_v27 }
  0x1a   :  { %1030 = vmatprep.subr.bf16.mxu1 %v811_v32  ;;  %v19_v32 = vld [vmem:[%s1324_s1 + $0x24] ss:$80 sps:$4 sm:$0xff]  }
  0x1b   :  { %v47_v34 = vunpack.c.l.bf16 %v19_v32 }
  0x1c   :  { %1000 = vmatpush3.bf16.msra.mxu0 %v787_v35  ;;  %v67_v35 = vunpack.c.h.bf16 %v19_v32 }
  0x1d   :  { %1032 = vmatpush3.bf16.msra.mxu1 %v803_v36  ;;  %1002 = vmatprep.subr.bf16.mxu0 %v796_v37  ;;  %v52_v36 = vunpack.c.l.bf16 %v22_v33  ;;  %v72_v37 = vunpack.c.h.bf16 %v22_v33 }
  0x1e   :  { %1034 = vmatprep.subr.bf16.mxu1 %v812_v38  ;;  %v25_v38 = vld [vmem:[%s1324_s1 + $0x4c] ss:$80 sps:$4 sm:$0xff]  }
  0x1f   :  { %v57_v39 = vunpack.c.l.bf16 %v25_v38  ;;  %v77_v40 = vunpack.c.h.bf16 %v25_v38 }
  0x20   :  { %1004 = vmatpush3.bf16.msra.mxu0 %v788_v41 }
  0x21   :  { %1036 = vmatpush3.bf16.msra.mxu1 %v804_v42  ;;  %1038 = vmatprep.subr.bf16.mxu0 %v813_v43 }
  0x22   :  { %1053 = vmatprep.subr.bf16.mxu1 %v813_v43 }
  0x23   :  { %360 = vmatmul.mubr.f32.vlgmr.msra.gmra.mrb[0].mxu0 %v38_v46 }
  0x24   :  { %465 = vmatmul.mubr.f32.vlgmr.msra.gmra.mrb[0].mxu1 %v40_v47  ;;  %1040 = vmatpush3.bf16.msra.mxu0 %v813_v43 }
  0x25   :  { %1057 = vmatpush3.bf16.msra.mxu1 %v813_v43  ;;  %364 = vmatprep.mubr.f32.mxu0 %v44_v50 }
  0x26   :  { %469 = vmatprep.mubr.f32.mxu1 %v46_v51  ;;  %1042 = vmatprep.subr.bf16.mxu0 %v814_v56 }
  0x27   :  { %1054 = vmatprep.subr.bf16.mxu1 %v814_v56  ;;  %365 = vmatmul.mubr.f32.gmra.mrb[2].mxu0 %v43_v54 }
  0x28   :  { %470 = vmatmul.mubr.f32.gmra.mrb[2].mxu1 %v45_v55  ;;  %369 = vmatprep.mubr.f32.mxu0 %v49_v57 }
  0x29   :  { %474 = vmatprep.mubr.f32.mxu1 %v51_v58  ;;  %1044 = vmatpush3.bf16.msra.mxu0 %v814_v56 }
  0x2a   :  { %1058 = vmatpush3.bf16.msra.mxu1 %v814_v56  ;;  %1046 = vmatprep.subr.bf16.mxu0 %v815_v63 }
  0x2b   :  { %1055 = vmatprep.subr.bf16.mxu1 %v815_v63  ;;  %370 = vmatmul.mubr.f32.gmra.mrb[4].mxu0 %v48_v61 }
  0x2c   :  { %475 = vmatmul.mubr.f32.gmra.mrb[4].mxu1 %v50_v62  ;;  %374 = vmatprep.mubr.f32.mxu0 %v54_v0 }
  0x2d   :  { %479 = vmatprep.mubr.f32.mxu1 %v56_v1  ;;  %1048 = vmatpush3.bf16.msra.mxu0 %v815_v63 }
  0x2e   :  { %1059 = vmatpush3.bf16.msra.mxu1 %v815_v63  ;;  %1050 = vmatprep.subr.bf16.mxu0 %v816_v6 }
  0x2f   :  { %1056 = vmatprep.subr.bf16.mxu1 %v816_v6  ;;  %375 = vmatmul.mubr.f32.gmra.mrb[6].mxu0 %v53_v4 }
  0x30   :  { %480 = vmatmul.mubr.f32.gmra.mrb[6].mxu1 %v55_v5  ;;  %379 = vmatprep.mubr.f32.mxu0 %v59_v7 }
  0x31   :  { %484 = vmatprep.mubr.f32.mxu1 %v61_v8  ;;  %1052 = vmatpush3.bf16.msra.mxu0 %v816_v6 }
  0x32   :  { %1060 = vmatpush3.bf16.msra.mxu1 %v816_v6 }
  0x33   :  { %380 = vmatmul.mubr.f32.gmra.mrb[8].mxu0 %v58_v11 }
  0x34   :  { %485 = vmatmul.mubr.f32.gmra.mrb[8].mxu1 %v60_v12  ;;  %384 = vmatprep.mubr.f32.mxu0 %v64_v13 }
  0x35   :  { %489 = vmatprep.mubr.f32.mxu1 %v66_v14 }
  0x37   :  { %385 = vmatmul.mubr.f32.gmra.mrb[10].mxu0 %v63_v17 }
  0x38   :  { %490 = vmatmul.mubr.f32.gmra.mrb[10].mxu1 %v65_v18  ;;  %389 = vmatprep.mubr.f32.mxu0 %v69_v19 }
  0x39   :  { %494 = vmatprep.mubr.f32.mxu1 %v71_v20 }
  0x3b   :  { %390 = vmatmul.mubr.f32.gmra.mrb[12].mxu0 %v68_v23 }
  0x3c   :  { %495 = vmatmul.mubr.f32.gmra.mrb[12].mxu1 %v70_v24  ;;  %394 = vmatprep.mubr.f32.mxu0 %v74_v25 }
  0x3d   :  { %499 = vmatprep.mubr.f32.mxu1 %v76_v26 }
  0x3f   :  { %395 = vmatmul.mubr.f32.gmra.mrb[14].mxu0 %v73_v28 }
  0x40   :  { %500 = vmatmul.mubr.f32.gmra.mrb[14].mxu1 %v75_v29  ;;  %961 = vmatprep.mubr.msk.f32.mxu0 %vm270_vm0, %v42_v30 }
  0x41   :  { %967 = vmatprep.mubr.msk.f32.mxu1 %vm270_vm0, %v62_v31 }
  0x43   :  { %962 = vmatmul.mubr.msk.f32.vlgmr.msra.gmra.mrb[16].mxu0 %vm270_vm0, %v47_v34 }
  0x44   :  { %968 = vmatmul.mubr.msk.f32.vlgmr.msra.gmra.mrb[16].mxu1 %vm270_vm0, %v67_v35  ;;  %964 = vmatprep.mubr.msk.f32.mxu0 %vm270_vm0, %v52_v36 }
  0x45   :  { %970 = vmatprep.mubr.msk.f32.mxu1 %vm270_vm0, %v72_v37 }
  0x47   :  { %965 = vmatmul.mubr.msk.f32.gmra.mrb[18].mxu0 %vm270_vm0, %v57_v39 }
  0x48   :  { %971 = vmatmul.mubr.msk.f32.gmra.mrb[18].mxu1 %vm270_vm0, %v77_v40 }
  0x8a   :  { %v233_v41 = vpop.permute.xlu0 %232  ;;  %v243_v57 = vpop.permute.xlu1 %242 }
  0x8e   :  { %v238_v48 = vpop.permute.xlu0 %237  ;;  %v248_v10 = vpop.permute.xlu1 %247 }
  0x92   :  { %v253_v19 = vpop.permute.xlu0 %252  ;;  %v258_v28 = vpop.permute.xlu1 %257 }
  0x96   :  { %v263_v37 = vpop.permute.xlu0 %262 }
  0xf6   :  { %v849_v42 = vpop.f32.mrb[0].mxu0 }
  0xf7   :  { %v905_v43 = vpop.f32.mrb[0].mxu1  ;;  %v850_v44 = vpop.f32.mrb[1].mxu0 }
  0xf8   :  { %v906_v45 = vpop.f32.mrb[1].mxu1  ;;  %v851_v46 = vadd.f32 %v850_v44, %v849_v42 }
  0xf9   :  { %v907_v47 = vadd.f32 %v906_v45, %v905_v43 }
  0xfa   :  { %v362_v49 = vadd.f32 %v851_v46, %v233_v41  ;;  %v852_v50 = vpop.f32.mrb[2].mxu0  ;;  %v268_v46 = vpop.permute.xlu1 %267 }
  0xfb   :  { %v908_v51 = vpop.f32.mrb[2].mxu1  ;;  %v853_v52 = vpop.f32.mrb[3].mxu0 }
  0xfc   :  { %v909_v53 = vpop.f32.mrb[3].mxu1  ;;  %v854_v54 = vadd.f32 %v853_v52, %v852_v50  ;;  %v1293_v56 = vadd.f32 %v907_v47, %v362_v49 }
  0xfd   :  { %v910_v55 = vadd.f32 %v909_v53, %v908_v51 }
  0xfe   :  { %v367_v58 = vadd.f32 %v854_v54, %v238_v48  ;;  %v855_v59 = vpop.f32.mrb[4].mxu0 }
  0xff   :  { %v911_v60 = vpop.f32.mrb[4].mxu1  ;;  %v856_v61 = vpop.f32.mrb[5].mxu0 }
 0x100   :  { %v912_v62 = vpop.f32.mrb[5].mxu1  ;;  %v857_v63 = vadd.f32 %v856_v61, %v855_v59  ;;  %v472_v1 = vadd.f32 %v910_v55, %v367_v58 }
 0x101   :  { %v913_v0 = vadd.f32 %v912_v62, %v911_v60 }
 0x102   :  { %v372_v2 = vadd.f32 %v857_v63, %v243_v57  ;;  %v858_v3 = vpop.f32.mrb[6].mxu0 }
 0x103   :  { %v914_v4 = vpop.f32.mrb[6].mxu1  ;;  %v859_v5 = vpop.f32.mrb[7].mxu0 }
 0x104   :  { %v915_v6 = vpop.f32.mrb[7].mxu1  ;;  %v860_v7 = vadd.f32 %v859_v5, %v858_v3  ;;  %v1295_v9 = vadd.f32 %v913_v0, %v372_v2 }
 0x105   :  { %v916_v8 = vadd.f32 %v915_v6, %v914_v4 }
 0x106   :  { %v377_v11 = vadd.f32 %v860_v7, %v248_v10  ;;  %v861_v12 = vpop.f32.mrb[8].mxu0 }
 0x107   :  { %v917_v13 = vpop.f32.mrb[8].mxu1  ;;  %v862_v14 = vpop.f32.mrb[9].mxu0 }
 0x108   :  { %v918_v15 = vpop.f32.mrb[9].mxu1  ;;  %v863_v16 = vadd.f32 %v862_v14, %v861_v12  ;;  %v482_v18 = vadd.f32 %v916_v8, %v377_v11 }
 0x109   :  { %v919_v17 = vadd.f32 %v918_v15, %v917_v13 }
 0x10a   :  { %v382_v20 = vadd.f32 %v863_v16, %v253_v19  ;;  %v864_v21 = vpop.f32.mrb[10].mxu0 }
 0x10b   :  { %v920_v22 = vpop.f32.mrb[10].mxu1  ;;  %v865_v23 = vpop.f32.mrb[11].mxu0 }
 0x10c   :  { %v921_v24 = vpop.f32.mrb[11].mxu1  ;;  %v866_v25 = vadd.f32 %v865_v23, %v864_v21  ;;  %v487_v27 = vadd.f32 %v919_v17, %v382_v20 }
 0x10d   :  { %v922_v26 = vadd.f32 %v921_v24, %v920_v22 }
 0x10e   :  { %v387_v29 = vadd.f32 %v866_v25, %v258_v28  ;;  %v867_v30 = vpop.f32.mrb[12].mxu0 }
 0x10f   :  { %v923_v31 = vpop.f32.mrb[12].mxu1  ;;  %v868_v32 = vpop.f32.mrb[13].mxu0 }
 0x110   :  { %v924_v33 = vpop.f32.mrb[13].mxu1  ;;  %v869_v34 = vadd.f32 %v868_v32, %v867_v30  ;;  %v492_v36 = vadd.f32 %v922_v26, %v387_v29 }
 0x111   :  { %v925_v35 = vadd.f32 %v924_v33, %v923_v31 }
 0x112   :  { %v392_v38 = vadd.f32 %v869_v34, %v263_v37  ;;  %v870_v39 = vpop.f32.mrb[14].mxu0 }
 0x113   :  { %v926_v40 = vpop.f32.mrb[14].mxu1  ;;  %v871_v41 = vpop.f32.mrb[15].mxu0 }
 0x114   :  { %v927_v42 = vpop.f32.mrb[15].mxu1  ;;  %v872_v43 = vadd.f32 %v871_v41, %v870_v39  ;;  %v497_v45 = vadd.f32 %v925_v35, %v392_v38 }
 0x115   :  { %v928_v44 = vadd.f32 %v927_v42, %v926_v40 }
 0x116   :  { %v397_v47 = vadd.f32 %v872_v43, %v268_v46  ;;  %v963_v48 = vpop.f32.mrb[16].mxu0 }
 0x117   :  { %v969_v49 = vpop.f32.mrb[16].mxu1  ;;  %v577_v50 = vadd.f32 %v963_v48, %v472_v1  ;;  %v571_v52 = vpop.f32.mrb[17].mxu0 }
 0x118   :  { %v597_v51 = vadd.f32 %v969_v49, %v492_v36  ;;  %v591_v53 = vpop.f32.mrb[17].mxu1  ;;  %v572_v54 = vadd.f32 %v571_v52, %v1293_v56  ;;  %v502_v57 = vadd.f32 %v928_v44, %v397_v47 }
 0x119   :  { %v592_v55 = vadd.f32 %v591_v53, %v487_v27  ;;  %v611_v58 = vmax.f32 %v577_v50, 0.0 }
 0x11a   :  { %v615_v59 = vmax.f32 %v597_v51, 0.0  ;;  %v610_v60 = vmax.f32 %v572_v54, 0.0  ;;  %v966_v62 = vpop.f32.mrb[18].mxu0 }
 0x11b   :  { %v614_v61 = vmax.f32 %v592_v55, 0.0  ;;  %v972_v63 = vpop.f32.mrb[18].mxu1  ;;  %619 = vst [vmem:[%s1326_s3 + $0x8] sm:$0xff] %v611_v58  ;;  %v587_v0 = vadd.f32 %v966_v62, %v482_v18  ;;  %v581_v2 = vpop.f32.mrb[19].mxu0 }
 0x11c   :  { %623 = vst [vmem:[%s1326_s3 + $0x28] sm:$0xff] %v615_v59  ;;  %v607_v1 = vadd.f32 %v972_v63, %v502_v57  ;;  %v601_v56 = vpop.f32.mrb[19].mxu1  ;;  %618 = vst [vmem:[%s1326_s3] sm:$0xff] %v610_v60  ;;  %v582_v3 = vadd.f32 %v581_v2, %v1295_v9 }
 0x11d   :  { %622 = vst [vmem:[%s1326_s3 + $0x20] sm:$0xff] %v614_v61  ;;  %v602_v4 = vadd.f32 %v601_v56, %v497_v45  ;;  %v613_v5 = vmax.f32 %v587_v0, 0.0 }
 0x11e   :  { %v617_v6 = vmax.f32 %v607_v1, 0.0  ;;  %v612_v7 = vmax.f32 %v582_v3, 0.0 }
 0x11f   :  { %v616_v8 = vmax.f32 %v602_v4, 0.0  ;;  %621 = vst [vmem:[%s1326_s3 + $0x18] sm:$0xff] %v613_v5 }
 0x120   :  { %625 = vst [vmem:[%s1326_s3 + $0x38] sm:$0xff] %v617_v6  ;;  %620 = vst [vmem:[%s1326_s3 + $0x10] sm:$0xff] %v612_v7 }
 0x121   :  { %624 = vst [vmem:[%s1326_s3 + $0x30] sm:$0xff] %v616_v8 }

// kernel: forward.20
= control target key start
LH: loop header
LB: loop body
LE: loop exit
PB: predicated region body
PF: predicated region fallthrough
CT: control target
= control target key end

     0   :  { %v1083_v3 = vmov 0   ;;  %vm273_vm0 = vcmask 523264   ;;  %s1371_s0 = inlined_call_operand.vmem [shape: bf16[576,128], index: 0, kind: input, shape index: {}]   ;;  %s1372_s1 = inlined_call_operand.vmem [shape: bf16[64,576], index: 1, kind: input, shape index: {}]   ;;  %s1373_s2 = inlined_call_operand.vmem [shape: f32[64,1], index: 2, kind: input, shape index: {}]   ;;  %s1374_s3 = inlined_call_operand.vmem [shape: f32[64,128], index: 3, kind: input, shape index: {}]   ;;  %s1375_s4 = inlined_call_operand.vmem [shape: f32[64,128], index: 4, kind: output, shape index: {}]  }
   0x1   :  { %v808_v0 = vld [vmem:[%s1371_s0 + $0x40] sm:$0xff]   ;;  %1081 = vset.pattern.permute.xlu0 %v1083_v3  ;;  %1082 = vset.pattern.permute.xlu1 %v1083_v3  ;;  %v809_v5 = vld [vmem:[%s1371_s0 + $0x48] sm:$0xff]   ;;  %v810_v9 = vld [vmem:[%s1371_s0 + $0x50] sm:$0xff]  }
   0x2   :  { %v824_v1 = vld [vmem:[%s1371_s0 + $0xc0] sm:$0xff]   ;;  %993 = vmatprep.subr.bf16.mxu0 %v808_v0  ;;  %v825_v6 = vld [vmem:[%s1371_s0 + $0xc8] sm:$0xff]   ;;  %v826_v10 = vld [vmem:[%s1371_s0 + $0xd0] sm:$0xff]  }
   0x3   :  { %v658_v2 = vld [vmem:[%s1371_s0] sm:$0xff]   ;;  %1025 = vmatprep.subr.bf16.mxu1 %v824_v1  ;;  %v801_v7 = vld [vmem:[%s1371_s0 + $0x8] sm:$0xff]   ;;  %v802_v11 = vld [vmem:[%s1371_s0 + $0x10] sm:$0xff]  }
   0x4   :  { %v816_v4 = vld [vmem:[%s1371_s0 + $0x80] sm:$0xff]   ;;  %995 = vmatpush3.bf16.msra.mxu0 %v658_v2  ;;  %v817_v8 = vld [vmem:[%s1371_s0 + $0x88] sm:$0xff]   ;;  %v818_v12 = vld [vmem:[%s1371_s0 + $0x90] sm:$0xff]  }
   0x5   :  { %1027 = vmatpush3.bf16.msra.mxu1 %v816_v4  ;;  %997 = vmatprep.subr.bf16.mxu0 %v809_v5  ;;  %v811_v13 = vld [vmem:[%s1371_s0 + $0x58] sm:$0xff]   ;;  %v1154_v15 = vld [vmem:[%s1372_s1] sm:$0xff]  ;;  %v1166_v19 = vld [vmem:[%s1372_s1 + $0x8] sm:$0xff] }
   0x6   :  { %1029 = vmatprep.subr.bf16.mxu1 %v825_v6  ;;  %v827_v14 = vld [vmem:[%s1371_s0 + $0xd8] sm:$0xff]   ;;  %v42_v18 = vunpack.c.h.bf16 %v1154_v15  ;;  %v812_v20 = vld [vmem:[%s1371_s0 + $0x60] sm:$0xff]   ;;  %v44_v22 = vunpack.c.h.bf16 %v1166_v19  ;;  %v813_v25 = vld [vmem:[%s1371_s0 + $0x68] sm:$0xff]   ;;  %v41_v46 = vunpack.c.l.bf16 %v1154_v15  ;;  %v43_v47 = vunpack.c.l.bf16 %v1166_v19 }
   0x7   :  { %v803_v16 = vld [vmem:[%s1371_s0 + $0x18] sm:$0xff]   ;;  %v828_v21 = vld [vmem:[%s1371_s0 + $0xe0] sm:$0xff]   ;;  %v829_v26 = vld [vmem:[%s1371_s0 + $0xe8] sm:$0xff]  }
   0x8   :  { %999 = vmatpush3.bf16.msra.mxu0 %v801_v7  ;;  %v819_v17 = vld [vmem:[%s1371_s0 + $0x98] sm:$0xff]   ;;  %362 = vmatprep.mubr.f32.mxu0 %v42_v18  ;;  %v804_v23 = vld [vmem:[%s1371_s0 + $0x20] sm:$0xff]   ;;  %v805_v28 = vld [vmem:[%s1371_s0 + $0x28] sm:$0xff]  }
   0x9   :  { %1031 = vmatpush3.bf16.msra.mxu1 %v817_v8  ;;  %1001 = vmatprep.subr.bf16.mxu0 %v810_v9  ;;  %v820_v24 = vld [vmem:[%s1371_s0 + $0xa0] sm:$0xff]   ;;  %v821_v29 = vld [vmem:[%s1371_s0 + $0xa8] sm:$0xff]   ;;  %v227_v30 = vld [vmem:[%s1373_s2 + $0x10] sm:$0xff] }
   0xa   :  { %1033 = vmatprep.subr.bf16.mxu1 %v826_v10  ;;  %467 = vmatprep.mubr.f32.mxu1 %v44_v22  ;;  %v225_v27 = vld [vmem:[%s1373_s2] sm:$0xff]  ;;  %v814_v31 = vld [vmem:[%s1371_s0 + $0x70] sm:$0xff]   ;;  %v226_v33 = vld [vmem:[%s1373_s2 + $0x8] sm:$0xff] }
   0xb   :  { %v830_v32 = vld [vmem:[%s1371_s0 + $0xf0] sm:$0xff]   ;;  %235 = vperm.xlu0 %1081, %v225_v27   ;;  %245 = vperm.xlu1 %1082, %v227_v30   ;;  %v228_v34 = vld [vmem:[%s1373_s2 + $0x18] sm:$0xff]  ;;  %v230_v39 = vld [vmem:[%s1373_s2 + $0x28] sm:$0xff] }
   0xc   :  { %1003 = vmatpush3.bf16.msra.mxu0 %v802_v11  ;;  %v806_v35 = vld [vmem:[%s1371_s0 + $0x30] sm:$0xff]   ;;  %v815_v37 = vld [vmem:[%s1371_s0 + $0x78] sm:$0xff]   ;;  %v229_v40 = vld [vmem:[%s1373_s2 + $0x20] sm:$0xff] }
   0xd   :  { %1035 = vmatpush3.bf16.msra.mxu1 %v818_v12  ;;  %1005 = vmatprep.subr.bf16.mxu0 %v811_v13  ;;  %v822_v36 = vld [vmem:[%s1371_s0 + $0xb0] sm:$0xff]   ;;  %v831_v38 = vld [vmem:[%s1371_s0 + $0xf8] sm:$0xff]   ;;  %v832_v43 = vld [vmem:[%s1371_s0 + $0x100] sm:$0xff]  }
   0xe   :  { %1037 = vmatprep.subr.bf16.mxu1 %v827_v14  ;;  %v807_v41 = vld [vmem:[%s1371_s0 + $0x38] sm:$0xff]   ;;  %v231_v49 = vld [vmem:[%s1373_s2 + $0x30] sm:$0xff]  ;;  %v23_v52 = vld [vmem:[%s1372_s1 + $0x28] sm:$0xff] }
   0xf   :  { %240 = vperm.xlu0 %1081, %v226_v33   ;;  %250 = vperm.xlu1 %1082, %v228_v34   ;;  %v823_v42 = vld [vmem:[%s1371_s0 + $0xb8] sm:$0xff]   ;;  %v24_v53 = vld [vmem:[%s1372_s1 + $0x30] sm:$0xff]  ;;  %v833_v56 = vld [vmem:[%s1371_s0 + $0x108] sm:$0xff]   ;;  %v52_v57 = vunpack.c.h.bf16 %v23_v52  ;;  %v51_v61 = vunpack.c.l.bf16 %v23_v52 }
  0x10   :  { %1007 = vmatpush3.bf16.msra.mxu0 %v803_v16  ;;  %v20_v44 = vld [vmem:[%s1372_s1 + $0x14] sm:$0xff]  ;;  %v21_v45 = vld [vmem:[%s1372_s1 + $0x1c] sm:$0xff]  ;;  %v54_v58 = vunpack.c.h.bf16 %v24_v53  ;;  %v27_v60 = vld [vmem:[%s1372_s1 + $0x44] sm:$0xff]  ;;  %v53_v62 = vunpack.c.l.bf16 %v24_v53 }
  0x11   :  { %1039 = vmatpush3.bf16.msra.mxu1 %v819_v17  ;;  %1009 = vmatprep.subr.bf16.mxu0 %v812_v20  ;;  %v232_v48 = vld [vmem:[%s1373_s2 + $0x38] sm:$0xff]  ;;  %v47_v50 = vunpack.c.h.bf16 %v20_v44  ;;  %v49_v51 = vunpack.c.h.bf16 %v21_v45  ;;  %v46_v54 = vunpack.c.l.bf16 %v20_v44  ;;  %v48_v55 = vunpack.c.l.bf16 %v21_v45  ;;  %v834_v63 = vld [vmem:[%s1371_s0 + $0x110] sm:$0xff]   ;;  %v32_v9 = vld [vmem:[%s1372_s1 + $0x64] sm:$0xff] }
  0x12   :  { %1041 = vmatprep.subr.bf16.mxu1 %v828_v21  ;;  %v26_v59 = vld [vmem:[%s1372_s1 + $0x3c] sm:$0xff]  ;;  %v59_v1 = vunpack.c.h.bf16 %v27_v60  ;;  %v29_v2 = vld [vmem:[%s1372_s1 + $0x50] sm:$0xff]  ;;  %v58_v5 = vunpack.c.l.bf16 %v27_v60  ;;  %v67_v13 = vunpack.c.h.bf16 %v32_v9  ;;  %v66_v17 = vunpack.c.l.bf16 %v32_v9  ;;  %v25_v33 = vld [vmem:[%s1372_s1 + $0x38] ss:$80 sps:$4 sm:$0xff]  }
  0x13   :  { %260 = vperm.xlu1 %1082, %v230_v39   ;;  %255 = vperm.xlu0 %1081, %v229_v40   ;;  %v57_v0 = vunpack.c.h.bf16 %v26_v59  ;;  %v30_v3 = vld [vmem:[%s1372_s1 + $0x58] sm:$0xff]  ;;  %v56_v4 = vunpack.c.l.bf16 %v26_v59  ;;  %v62_v7 = vunpack.c.h.bf16 %v29_v2  ;;  %v33_v10 = vld [vmem:[%s1372_s1 + $0x6c] sm:$0xff]  ;;  %v61_v11 = vunpack.c.l.bf16 %v29_v2  ;;  %v36_v16 = vld [vmem:[%s1372_s1 + $0x80] sm:$0xff] }
  0x14   :  { %1011 = vmatpush3.bf16.msra.mxu0 %v804_v23  ;;  %v835_v6 = vld [vmem:[%s1371_s0 + $0x118] sm:$0xff]   ;;  %v64_v8 = vunpack.c.h.bf16 %v30_v3  ;;  %v63_v12 = vunpack.c.l.bf16 %v30_v3  ;;  %v69_v14 = vunpack.c.h.bf16 %v33_v10  ;;  %v68_v18 = vunpack.c.l.bf16 %v33_v10  ;;  %v38_v21 = vld [vmem:[%s1372_s1 + $0x8c] sm:$0xff] }
  0x15   :  { %1043 = vmatpush3.bf16.msra.mxu1 %v820_v24  ;;  %1013 = vmatprep.subr.bf16.mxu0 %v813_v25  ;;  %v35_v15 = vld [vmem:[%s1372_s1 + $0x78] sm:$0xff]  ;;  %v74_v20 = vunpack.c.h.bf16 %v36_v16  ;;  %v73_v24 = vunpack.c.l.bf16 %v36_v16  ;;  %v77_v25 = vunpack.c.h.bf16 %v38_v21  ;;  %v19_v27 = vld [vmem:[%s1372_s1 + $0x10] ss:$80 sps:$4 sm:$0xff]  }
  0x16   :  { %1045 = vmatprep.subr.bf16.mxu1 %v829_v26  ;;  %v72_v19 = vunpack.c.h.bf16 %v35_v15  ;;  %v39_v22 = vld [vmem:[%s1372_s1 + $0x94] sm:$0xff]  ;;  %v71_v23 = vunpack.c.l.bf16 %v35_v15  ;;  %v45_v30 = vunpack.c.l.bf16 %v19_v27 }
  0x17   :  { %270 = vperm.xlu1 %1082, %v232_v48   ;;  %265 = vperm.xlu0 %1081, %v231_v49   ;;  %v79_v26 = vunpack.c.h.bf16 %v39_v22 }
  0x18   :  { %1015 = vmatpush3.bf16.msra.mxu0 %v805_v28  ;;  %v76_v28 = vunpack.c.l.bf16 %v38_v21 }
  0x19   :  { %1047 = vmatpush3.bf16.msra.mxu1 %v821_v29  ;;  %1017 = vmatprep.subr.bf16.mxu0 %v814_v31  ;;  %v78_v29 = vunpack.c.l.bf16 %v39_v22  ;;  %v65_v31 = vunpack.c.h.bf16 %v19_v27 }
  0x1a   :  { %1049 = vmatprep.subr.bf16.mxu1 %v830_v32  ;;  %v22_v32 = vld [vmem:[%s1372_s1 + $0x24] ss:$80 sps:$4 sm:$0xff]  }
  0x1b   :  { %v50_v34 = vunpack.c.l.bf16 %v22_v32 }
  0x1c   :  { %1019 = vmatpush3.bf16.msra.mxu0 %v806_v35  ;;  %v70_v35 = vunpack.c.h.bf16 %v22_v32 }
  0x1d   :  { %1051 = vmatpush3.bf16.msra.mxu1 %v822_v36  ;;  %1021 = vmatprep.subr.bf16.mxu0 %v815_v37  ;;  %v55_v36 = vunpack.c.l.bf16 %v25_v33  ;;  %v75_v37 = vunpack.c.h.bf16 %v25_v33 }
  0x1e   :  { %1053 = vmatprep.subr.bf16.mxu1 %v831_v38  ;;  %v28_v38 = vld [vmem:[%s1372_s1 + $0x4c] ss:$80 sps:$4 sm:$0xff]  }
  0x1f   :  { %v60_v39 = vunpack.c.l.bf16 %v28_v38  ;;  %v80_v40 = vunpack.c.h.bf16 %v28_v38 }
  0x20   :  { %1023 = vmatpush3.bf16.msra.mxu0 %v807_v41 }
  0x21   :  { %1055 = vmatpush3.bf16.msra.mxu1 %v823_v42  ;;  %1057 = vmatprep.subr.bf16.mxu0 %v832_v43 }
  0x22   :  { %1072 = vmatprep.subr.bf16.mxu1 %v832_v43 }
  0x23   :  { %363 = vmatmul.mubr.f32.vlgmr.msra.gmra.mrb[0].mxu0 %v41_v46 }
  0x24   :  { %468 = vmatmul.mubr.f32.vlgmr.msra.gmra.mrb[0].mxu1 %v43_v47  ;;  %1059 = vmatpush3.bf16.msra.mxu0 %v832_v43 }
  0x25   :  { %1076 = vmatpush3.bf16.msra.mxu1 %v832_v43  ;;  %367 = vmatprep.mubr.f32.mxu0 %v47_v50 }
  0x26   :  { %472 = vmatprep.mubr.f32.mxu1 %v49_v51  ;;  %1061 = vmatprep.subr.bf16.mxu0 %v833_v56 }
  0x27   :  { %1073 = vmatprep.subr.bf16.mxu1 %v833_v56  ;;  %368 = vmatmul.mubr.f32.gmra.mrb[2].mxu0 %v46_v54 }
  0x28   :  { %473 = vmatmul.mubr.f32.gmra.mrb[2].mxu1 %v48_v55  ;;  %372 = vmatprep.mubr.f32.mxu0 %v52_v57 }
  0x29   :  { %477 = vmatprep.mubr.f32.mxu1 %v54_v58  ;;  %1063 = vmatpush3.bf16.msra.mxu0 %v833_v56 }
  0x2a   :  { %1077 = vmatpush3.bf16.msra.mxu1 %v833_v56  ;;  %1065 = vmatprep.subr.bf16.mxu0 %v834_v63 }
  0x2b   :  { %1074 = vmatprep.subr.bf16.mxu1 %v834_v63  ;;  %373 = vmatmul.mubr.f32.gmra.mrb[4].mxu0 %v51_v61 }
  0x2c   :  { %478 = vmatmul.mubr.f32.gmra.mrb[4].mxu1 %v53_v62  ;;  %377 = vmatprep.mubr.f32.mxu0 %v57_v0 }
  0x2d   :  { %482 = vmatprep.mubr.f32.mxu1 %v59_v1  ;;  %1067 = vmatpush3.bf16.msra.mxu0 %v834_v63 }
  0x2e   :  { %1078 = vmatpush3.bf16.msra.mxu1 %v834_v63  ;;  %1069 = vmatprep.subr.bf16.mxu0 %v835_v6 }
  0x2f   :  { %1075 = vmatprep.subr.bf16.mxu1 %v835_v6  ;;  %378 = vmatmul.mubr.f32.gmra.mrb[6].mxu0 %v56_v4 }
  0x30   :  { %483 = vmatmul.mubr.f32.gmra.mrb[6].mxu1 %v58_v5  ;;  %382 = vmatprep.mubr.f32.mxu0 %v62_v7 }
  0x31   :  { %487 = vmatprep.mubr.f32.mxu1 %v64_v8  ;;  %1071 = vmatpush3.bf16.msra.mxu0 %v835_v6 }
  0x32   :  { %1079 = vmatpush3.bf16.msra.mxu1 %v835_v6 }
  0x33   :  { %383 = vmatmul.mubr.f32.gmra.mrb[8].mxu0 %v61_v11 }
  0x34   :  { %488 = vmatmul.mubr.f32.gmra.mrb[8].mxu1 %v63_v12  ;;  %387 = vmatprep.mubr.f32.mxu0 %v67_v13 }
  0x35   :  { %492 = vmatprep.mubr.f32.mxu1 %v69_v14 }
  0x37   :  { %388 = vmatmul.mubr.f32.gmra.mrb[10].mxu0 %v66_v17 }
  0x38   :  { %493 = vmatmul.mubr.f32.gmra.mrb[10].mxu1 %v68_v18  ;;  %392 = vmatprep.mubr.f32.mxu0 %v72_v19 }
  0x39   :  { %497 = vmatprep.mubr.f32.mxu1 %v74_v20 }
  0x3b   :  { %393 = vmatmul.mubr.f32.gmra.mrb[12].mxu0 %v71_v23 }
  0x3c   :  { %498 = vmatmul.mubr.f32.gmra.mrb[12].mxu1 %v73_v24  ;;  %397 = vmatprep.mubr.f32.mxu0 %v77_v25 }
  0x3d   :  { %502 = vmatprep.mubr.f32.mxu1 %v79_v26 }
  0x3f   :  { %398 = vmatmul.mubr.f32.gmra.mrb[14].mxu0 %v76_v28 }
  0x40   :  { %503 = vmatmul.mubr.f32.gmra.mrb[14].mxu1 %v78_v29  ;;  %980 = vmatprep.mubr.msk.f32.mxu0 %vm273_vm0, %v45_v30 }
  0x41   :  { %986 = vmatprep.mubr.msk.f32.mxu1 %vm273_vm0, %v65_v31 }
  0x43   :  { %981 = vmatmul.mubr.msk.f32.vlgmr.msra.gmra.mrb[16].mxu0 %vm273_vm0, %v50_v34 }
  0x44   :  { %987 = vmatmul.mubr.msk.f32.vlgmr.msra.gmra.mrb[16].mxu1 %vm273_vm0, %v70_v35  ;;  %983 = vmatprep.mubr.msk.f32.mxu0 %vm273_vm0, %v55_v36 }
  0x45   :  { %989 = vmatprep.mubr.msk.f32.mxu1 %vm273_vm0, %v75_v37 }
  0x47   :  { %984 = vmatmul.mubr.msk.f32.gmra.mrb[18].mxu0 %vm273_vm0, %v60_v39 }
  0x48   :  { %990 = vmatmul.mubr.msk.f32.gmra.mrb[18].mxu1 %vm273_vm0, %v80_v40 }
  0x8a   :  { %v236_v41 = vpop.permute.xlu0 %235  ;;  %v246_v57 = vpop.permute.xlu1 %245 }
  0x8e   :  { %v241_v48 = vpop.permute.xlu0 %240  ;;  %v251_v10 = vpop.permute.xlu1 %250 }
  0x92   :  { %v256_v19 = vpop.permute.xlu0 %255  ;;  %v261_v28 = vpop.permute.xlu1 %260 }
  0x96   :  { %v266_v37 = vpop.permute.xlu0 %265 }
  0xf6   :  { %v868_v42 = vpop.f32.mrb[0].mxu0 }
  0xf7   :  { %v924_v43 = vpop.f32.mrb[0].mxu1  ;;  %v869_v44 = vpop.f32.mrb[1].mxu0 }
  0xf8   :  { %v925_v45 = vpop.f32.mrb[1].mxu1  ;;  %v870_v46 = vadd.f32 %v869_v44, %v868_v42 }
  0xf9   :  { %v926_v47 = vadd.f32 %v925_v45, %v924_v43 }
  0xfa   :  { %v365_v49 = vadd.f32 %v870_v46, %v236_v41  ;;  %v871_v50 = vpop.f32.mrb[2].mxu0  ;;  %v271_v46 = vpop.permute.xlu1 %270 }
  0xfb   :  { %v927_v51 = vpop.f32.mrb[2].mxu1  ;;  %v872_v52 = vpop.f32.mrb[3].mxu0 }
  0xfc   :  { %v928_v53 = vpop.f32.mrb[3].mxu1  ;;  %v873_v54 = vadd.f32 %v872_v52, %v871_v50  ;;  %v1317_v56 = vadd.f32 %v926_v47, %v365_v49  ;;  %v614_v49 = vld [vmem:[%s1374_s3 + $0x8] sm:$0xff] }
  0xfd   :  { %v929_v55 = vadd.f32 %v928_v53, %v927_v51  ;;  %v618_v51 = vld [vmem:[%s1374_s3 + $0x28] sm:$0xff] }
  0xfe   :  { %v370_v58 = vadd.f32 %v873_v54, %v241_v48  ;;  %v874_v59 = vpop.f32.mrb[4].mxu0 }
  0xff   :  { %v930_v60 = vpop.f32.mrb[4].mxu1  ;;  %v875_v61 = vpop.f32.mrb[5].mxu0 }
 0x100   :  { %v931_v62 = vpop.f32.mrb[5].mxu1  ;;  %v876_v63 = vadd.f32 %v875_v61, %v874_v59  ;;  %v475_v1 = vadd.f32 %v929_v55, %v370_v58  ;;  %v613_v55 = vld [vmem:[%s1374_s3] sm:$0xff] }
 0x101   :  { %v932_v0 = vadd.f32 %v931_v62, %v930_v60  ;;  %v617_v58 = vld [vmem:[%s1374_s3 + $0x20] sm:$0xff] }
 0x102   :  { %v375_v2 = vadd.f32 %v876_v63, %v246_v57  ;;  %v877_v3 = vpop.f32.mrb[6].mxu0 }
 0x103   :  { %v933_v4 = vpop.f32.mrb[6].mxu1  ;;  %v878_v5 = vpop.f32.mrb[7].mxu0 }
 0x104   :  { %v934_v6 = vpop.f32.mrb[7].mxu1  ;;  %v879_v7 = vadd.f32 %v878_v5, %v877_v3  ;;  %v1319_v9 = vadd.f32 %v932_v0, %v375_v2  ;;  %v616_v3 = vld [vmem:[%s1374_s3 + $0x18] sm:$0xff] }
 0x105   :  { %v935_v8 = vadd.f32 %v934_v6, %v933_v4  ;;  %v620_v5 = vld [vmem:[%s1374_s3 + $0x38] sm:$0xff] }
 0x106   :  { %v380_v11 = vadd.f32 %v879_v7, %v251_v10  ;;  %v880_v12 = vpop.f32.mrb[8].mxu0 }
 0x107   :  { %v936_v13 = vpop.f32.mrb[8].mxu1  ;;  %v881_v14 = vpop.f32.mrb[9].mxu0 }
 0x108   :  { %v937_v15 = vpop.f32.mrb[9].mxu1  ;;  %v882_v16 = vadd.f32 %v881_v14, %v880_v12  ;;  %v485_v18 = vadd.f32 %v935_v8, %v380_v11  ;;  %v615_v11 = vld [vmem:[%s1374_s3 + $0x10] sm:$0xff] }
 0x109   :  { %v938_v17 = vadd.f32 %v937_v15, %v936_v13  ;;  %v619_v13 = vld [vmem:[%s1374_s3 + $0x30] sm:$0xff] }
 0x10a   :  { %v385_v20 = vadd.f32 %v882_v16, %v256_v19  ;;  %v883_v21 = vpop.f32.mrb[10].mxu0 }
 0x10b   :  { %v939_v22 = vpop.f32.mrb[10].mxu1  ;;  %v884_v23 = vpop.f32.mrb[11].mxu0 }
 0x10c   :  { %v940_v24 = vpop.f32.mrb[11].mxu1  ;;  %v885_v25 = vadd.f32 %v884_v23, %v883_v21  ;;  %v490_v27 = vadd.f32 %v938_v17, %v385_v20 }
 0x10d   :  { %v941_v26 = vadd.f32 %v940_v24, %v939_v22 }
 0x10e   :  { %v390_v29 = vadd.f32 %v885_v25, %v261_v28  ;;  %v886_v30 = vpop.f32.mrb[12].mxu0 }
 0x10f   :  { %v942_v31 = vpop.f32.mrb[12].mxu1  ;;  %v887_v32 = vpop.f32.mrb[13].mxu0 }
 0x110   :  { %v943_v33 = vpop.f32.mrb[13].mxu1  ;;  %v888_v34 = vadd.f32 %v887_v32, %v886_v30  ;;  %v495_v36 = vadd.f32 %v941_v26, %v390_v29 }
 0x111   :  { %v944_v35 = vadd.f32 %v943_v33, %v942_v31 }
 0x112   :  { %v395_v38 = vadd.f32 %v888_v34, %v266_v37  ;;  %v889_v39 = vpop.f32.mrb[14].mxu0 }
 0x113   :  { %v945_v40 = vpop.f32.mrb[14].mxu1  ;;  %v890_v41 = vpop.f32.mrb[15].mxu0 }
 0x114   :  { %v946_v42 = vpop.f32.mrb[15].mxu1  ;;  %v891_v43 = vadd.f32 %v890_v41, %v889_v39  ;;  %v500_v45 = vadd.f32 %v944_v35, %v395_v38 }
 0x115   :  { %v947_v44 = vadd.f32 %v946_v42, %v945_v40 }
 0x116   :  { %v400_v47 = vadd.f32 %v891_v43, %v271_v46  ;;  %v982_v48 = vpop.f32.mrb[16].mxu0 }
 0x117   :  { %v988_v50 = vpop.f32.mrb[16].mxu1  ;;  %v580_v52 = vadd.f32 %v982_v48, %v475_v1  ;;  %v574_v54 = vpop.f32.mrb[17].mxu0 }
 0x118   :  { %v600_v53 = vadd.f32 %v988_v50, %v495_v36  ;;  %v594_v57 = vpop.f32.mrb[17].mxu1  ;;  %v575_v59 = vadd.f32 %v574_v54, %v1317_v56  ;;  %v505_v61 = vadd.f32 %v947_v44, %v400_v47 }
 0x119   :  { %v595_v60 = vadd.f32 %v594_v57, %v490_v27  ;;  %v622_v62 = vadd.f32 %v614_v49, %v580_v52 }
 0x11a   :  { %v626_v63 = vadd.f32 %v618_v51, %v600_v53  ;;  %v621_v0 = vadd.f32 %v613_v55, %v575_v59  ;;  %v985_v1 = vpop.f32.mrb[18].mxu0 }
 0x11b   :  { %v625_v2 = vadd.f32 %v617_v58, %v595_v60  ;;  %v991_v4 = vpop.f32.mrb[18].mxu1  ;;  %v630_v6 = vmax.f32 %v622_v62, 0.0  ;;  %v590_v8 = vadd.f32 %v985_v1, %v485_v18  ;;  %v584_v10 = vpop.f32.mrb[19].mxu0 }
 0x11c   :  { %v634_v7 = vmax.f32 %v626_v63, 0.0  ;;  %v610_v56 = vadd.f32 %v991_v4, %v505_v61  ;;  %v604_v12 = vpop.f32.mrb[19].mxu1  ;;  %v629_v14 = vmax.f32 %v621_v0, 0.0  ;;  %v585_v16 = vadd.f32 %v584_v10, %v1319_v9 }
 0x11d   :  { %v633_v15 = vmax.f32 %v625_v2, 0.0  ;;  %v605_v17 = vadd.f32 %v604_v12, %v500_v45  ;;  %638 = vst [vmem:[%s1375_s4 + $0x8] sm:$0xff] %v630_v6  ;;  %v624_v18 = vadd.f32 %v616_v3, %v590_v8 }
 0x11e   :  { %642 = vst [vmem:[%s1375_s4 + $0x28] sm:$0xff] %v634_v7  ;;  %v628_v19 = vadd.f32 %v620_v5, %v610_v56  ;;  %637 = vst [vmem:[%s1375_s4] sm:$0xff] %v629_v14  ;;  %v623_v9 = vadd.f32 %v615_v11, %v585_v16 }
 0x11f   :  { %641 = vst [vmem:[%s1375_s4 + $0x20] sm:$0xff] %v633_v15  ;;  %v627_v20 = vadd.f32 %v619_v13, %v605_v17  ;;  %v632_v21 = vmax.f32 %v624_v18, 0.0 }
 0x120   :  { %v636_v22 = vmax.f32 %v628_v19, 0.0  ;;  %v631_v23 = vmax.f32 %v623_v9, 0.0 }
 0x121   :  { %v635_v24 = vmax.f32 %v627_v20, 0.0  ;;  %640 = vst [vmem:[%s1375_s4 + $0x18] sm:$0xff] %v632_v21 }
 0x122   :  { %644 = vst [vmem:[%s1375_s4 + $0x38] sm:$0xff] %v636_v22  ;;  %639 = vst [vmem:[%s1375_s4 + $0x10] sm:$0xff] %v631_v23 }
 0x123   :  { %643 = vst [vmem:[%s1375_s4 + $0x30] sm:$0xff] %v635_v24 }

// kernel: forward.23
= control target key start
LH: loop header
LB: loop body
LE: loop exit
PB: predicated region body
PF: predicated region fallthrough
CT: control target
= control target key end

     0   :  { %vm75_vm0 = vcmask 123904   ;;  %vm727_vm1 = vcmask 523264   ;;  %vm656_vm2 = vcmask 1041409   ;;  %vm658_vm3 = vcmask 1042434   ;;  %s1403_s0 = inlined_call_operand.vmem [shape: f32[64,2,16], index: 0, kind: input, shape index: {}]   ;;  %s1404_s1 = inlined_call_operand.vmem [shape: f32[10,64], index: 1, kind: input, shape index: {}]   ;;  %s1405_s2 = inlined_call_operand.vmem [shape: f32[10,2], index: 2, kind: output, shape index: {}]  }
   0x1   :  { %v19_v0 = vld [vmem:[%s1403_s0 + $0x10] sm:$0x3]  ;;  %v11_v1 = vld [vmem:[%s1403_s0] sm:$0x3]  ;;  %v20_v2 = vld [vmem:[%s1403_s0 + $0x12] sm:$0x3] }
   0x2   :  { %v100_v3 = vsel %vm75_vm0, %v19_v0, 0.0  ;;  %v76_v4 = vsel %vm75_vm0, %v11_v1, 0.0  ;;  %v12_v5 = vld [vmem:[%s1403_s0 + $0x2] sm:$0x3]  ;;  %v103_v6 = vsel %vm75_vm0, %v20_v2, 0.0  ;;  %vm660_vm4 = vcmask 1043459  }
   0x3   :  { %101 = vadd.xlane.f32.xlu1 %v100_v3  ;;  %77 = vadd.xlane.f32.xlu0 %v76_v4  ;;  %v79_v7 = vsel %vm75_vm0, %v12_v5, 0.0  ;;  %v21_v8 = vld [vmem:[%s1403_s0 + $0x14] sm:$0x3]  ;;  %v13_v9 = vld [vmem:[%s1403_s0 + $0x4] sm:$0x3]  ;;  %vm662_vm5 = vcmask 1044484  }
   0x4   :  { %v106_v10 = vsel %vm75_vm0, %v21_v8, 0.0  ;;  %v82_v11 = vsel %vm75_vm0, %v13_v9, 0.0  ;;  %v22_v12 = vld [vmem:[%s1403_s0 + $0x16] sm:$0x3]  ;;  %v14_v13 = vld [vmem:[%s1403_s0 + $0x6] sm:$0x3] }
   0x5   :  { %v109_v14 = vsel %vm75_vm0, %v22_v12, 0.0  ;;  %v85_v15 = vsel %vm75_vm0, %v14_v13, 0.0  ;;  %v23_v16 = vld [vmem:[%s1403_s0 + $0x18] sm:$0x3]  ;;  %v15_v17 = vld [vmem:[%s1403_s0 + $0x8] sm:$0x3] }
   0x6   :  { %v24_v18 = vld [vmem:[%s1403_s0 + $0x1a] sm:$0x3]  ;;  %v16_v19 = vld [vmem:[%s1403_s0 + $0xa] sm:$0x3]  ;;  %v28_v20 = vld [vmem:[%s1403_s0 + $0x22] sm:$0x3] }
   0x7   :  { %104 = vadd.xlane.f32.xlu1 %v103_v6  ;;  %80 = vadd.xlane.f32.xlu0 %v79_v7  ;;  %v27_v21 = vld [vmem:[%s1403_s0 + $0x20] sm:$0x3]  ;;  %v36_v22 = vld [vmem:[%s1403_s0 + $0x32] sm:$0x3]  ;;  %v35_v23 = vld [vmem:[%s1403_s0 + $0x30] sm:$0x3] }
   0x8   :  { %v25_v24 = vld [vmem:[%s1403_s0 + $0x1c] sm:$0x3]  ;;  %v17_v25 = vld [vmem:[%s1403_s0 + $0xc] sm:$0x3]  ;;  %v112_v26 = vsel %vm75_vm0, %v23_v16, 0.0  ;;  %v88_v27 = vsel %vm75_vm0, %v15_v17, 0.0 }
   0x9   :  { %v115_v28 = vsel %vm75_vm0, %v24_v18, 0.0  ;;  %v91_v29 = vsel %vm75_vm0, %v16_v19, 0.0  ;;  %v127_v30 = vsel %vm75_vm0, %v28_v20, 0.0  ;;  %v124_v31 = vsel %vm75_vm0, %v27_v21, 0.0  ;;  %v41_v36 = vld [vmem:[%s1403_s0 + $0x3c] sm:$0x3] }
   0xa   :  { %v948_v32 = vsel %vm75_vm0, %v36_v22, 0.0  ;;  %v951_v33 = vsel %vm75_vm0, %v35_v23, 0.0  ;;  %v954_v34 = vsel %vm75_vm0, %v25_v24, 0.0  ;;  %v957_v35 = vsel %vm75_vm0, %v17_v25, 0.0  ;;  %v33_v37 = vld [vmem:[%s1403_s0 + $0x2c] sm:$0x3] }
   0xb   :  { %107 = vadd.xlane.f32.xlu1 %v106_v10  ;;  %83 = vadd.xlane.f32.xlu0 %v82_v11  ;;  %v966_v38 = vsel %vm75_vm0, %v41_v36, 0.0  ;;  %v969_v39 = vsel %vm75_vm0, %v33_v37, 0.0  ;;  %v53_v40 = vld [vmem:[%s1403_s0 + $0x54] sm:$0x3]  ;;  %v45_v41 = vld [vmem:[%s1403_s0 + $0x44] sm:$0x3] }
   0xc   :  { %v978_v42 = vsel %vm75_vm0, %v53_v40, 0.0  ;;  %v981_v43 = vsel %vm75_vm0, %v45_v41, 0.0  ;;  %v42_v44 = vld [vmem:[%s1403_s0 + $0x3e] sm:$0x3]  ;;  %v34_v45 = vld [vmem:[%s1403_s0 + $0x2e] sm:$0x3] }
   0xd   :  { %v990_v46 = vsel %vm75_vm0, %v42_v44, 0.0  ;;  %v993_v47 = vsel %vm75_vm0, %v34_v45, 0.0  ;;  %v54_v48 = vld [vmem:[%s1403_s0 + $0x56] sm:$0x3]  ;;  %v46_v49 = vld [vmem:[%s1403_s0 + $0x46] sm:$0x3] }
   0xe   :  { %v1002_v50 = vsel %vm75_vm0, %v54_v48, 0.0  ;;  %v1005_v51 = vsel %vm75_vm0, %v46_v49, 0.0  ;;  %v55_v52 = vld [vmem:[%s1403_s0 + $0x58] sm:$0x3]  ;;  %v47_v53 = vld [vmem:[%s1403_s0 + $0x48] sm:$0x3] }
   0xf   :  { %110 = vadd.xlane.f32.xlu1 %v109_v14  ;;  %86 = vadd.xlane.f32.xlu0 %v85_v15  ;;  %v1014_v54 = vsel %vm75_vm0, %v55_v52, 0.0  ;;  %v1017_v55 = vsel %vm75_vm0, %v47_v53, 0.0  ;;  %v56_v56 = vld [vmem:[%s1403_s0 + $0x5a] sm:$0x3]  ;;  %v48_v57 = vld [vmem:[%s1403_s0 + $0x4a] sm:$0x3] }
  0x10   :  { %v1026_v58 = vsel %vm75_vm0, %v56_v56, 0.0  ;;  %v1029_v59 = vsel %vm75_vm0, %v48_v57, 0.0  ;;  %v60_v60 = vld [vmem:[%s1403_s0 + $0x62] sm:$0x3]  ;;  %v59_v61 = vld [vmem:[%s1403_s0 + $0x60] sm:$0x3] }
  0x11   :  { %v1038_v62 = vsel %vm75_vm0, %v60_v60, 0.0  ;;  %v1041_v63 = vsel %vm75_vm0, %v59_v61, 0.0  ;;  %v68_v0 = vld [vmem:[%s1403_s0 + $0x72] sm:$0x3]  ;;  %v67_v1 = vld [vmem:[%s1403_s0 + $0x70] sm:$0x3] }
  0x12   :  { %v1050_v2 = vsel %vm75_vm0, %v68_v0, 0.0  ;;  %v1053_v3 = vsel %vm75_vm0, %v67_v1, 0.0  ;;  %v57_v4 = vld [vmem:[%s1403_s0 + $0x5c] sm:$0x3]  ;;  %v49_v5 = vld [vmem:[%s1403_s0 + $0x4c] sm:$0x3] }
  0x13   :  { %113 = vadd.xlane.f32.xlu1 %v112_v26  ;;  %89 = vadd.xlane.f32.xlu0 %v88_v27  ;;  %v1062_v6 = vsel %vm75_vm0, %v57_v4, 0.0  ;;  %v1065_v7 = vsel %vm75_vm0, %v49_v5, 0.0  ;;  %v69_v8 = vld [vmem:[%s1403_s0 + $0x74] sm:$0x3]  ;;  %v61_v9 = vld [vmem:[%s1403_s0 + $0x64] sm:$0x3] }
  0x14   :  { %v1074_v10 = vsel %vm75_vm0, %v69_v8, 0.0  ;;  %v1077_v11 = vsel %vm75_vm0, %v61_v9, 0.0  ;;  %v58_v12 = vld [vmem:[%s1403_s0 + $0x5e] sm:$0x3]  ;;  %v50_v13 = vld [vmem:[%s1403_s0 + $0x4e] sm:$0x3] }
  0x15   :  { %v1086_v14 = vsel %vm75_vm0, %v58_v12, 0.0  ;;  %v1089_v15 = vsel %vm75_vm0, %v50_v13, 0.0  ;;  %v70_v16 = vld [vmem:[%s1403_s0 + $0x76] sm:$0x3]  ;;  %v62_v17 = vld [vmem:[%s1403_s0 + $0x66] sm:$0x3] }
  0x16   :  { %v1098_v18 = vsel %vm75_vm0, %v70_v16, 0.0  ;;  %v1101_v19 = vsel %vm75_vm0, %v62_v17, 0.0  ;;  %v71_v20 = vld [vmem:[%s1403_s0 + $0x78] sm:$0x3]  ;;  %v63_v21 = vld [vmem:[%s1403_s0 + $0x68] sm:$0x3] }
  0x17   :  { %116 = vadd.xlane.f32.xlu1 %v115_v28  ;;  %92 = vadd.xlane.f32.xlu0 %v91_v29  ;;  %v1110_v22 = vsel %vm75_vm0, %v71_v20, 0.0  ;;  %v1113_v23 = vsel %vm75_vm0, %v63_v21, 0.0  ;;  %v72_v24 = vld [vmem:[%s1403_s0 + $0x7a] sm:$0x3]  ;;  %v64_v25 = vld [vmem:[%s1403_s0 + $0x6a] sm:$0x3] }
  0x18   :  { %v1124_v26 = vsel %vm75_vm0, %v72_v24, 0.0  ;;  %v1127_v27 = vsel %vm75_vm0, %v64_v25, 0.0  ;;  %v73_v28 = vld [vmem:[%s1403_s0 + $0x7c] sm:$0x3]  ;;  %v65_v29 = vld [vmem:[%s1403_s0 + $0x6c] sm:$0x3] }
  0x19   :  { %v37_v36 = vld [vmem:[%s1403_s0 + $0x34] sm:$0x3]  ;;  %v29_v37 = vld [vmem:[%s1403_s0 + $0x24] sm:$0x3]  ;;  %v26_v48 = vld [vmem:[%s1403_s0 + $0x1e] sm:$0x3] }
  0x1a   :  { %v154_v44 = vsel %vm75_vm0, %v37_v36, 0.0  ;;  %v130_v45 = vsel %vm75_vm0, %v29_v37, 0.0  ;;  %v18_v49 = vld [vmem:[%s1403_s0 + $0xe] sm:$0x3]  ;;  %v121_v52 = vsel %vm75_vm0, %v26_v48, 0.0  ;;  %vm664_vm6 = vcmask 1045509  }
  0x1b   :  { %128 = vadd.xlane.f32.xlu1 %v127_v30  ;;  %125 = vadd.xlane.f32.xlu0 %v124_v31  ;;  %v1136_v30 = vsel %vm75_vm0, %v73_v28, 0.0  ;;  %v1139_v31 = vsel %vm75_vm0, %v65_v29, 0.0  ;;  %v30_v53 = vld [vmem:[%s1403_s0 + $0x26] sm:$0x3]  ;;  %v39_v60 = vld [vmem:[%s1403_s0 + $0x38] sm:$0x3] }
  0x1c   :  { %v133_v57 = vsel %vm75_vm0, %v30_v53, 0.0  ;;  %v31_v61 = vld [vmem:[%s1403_s0 + $0x28] sm:$0x3]  ;;  %v160_v0 = vsel %vm75_vm0, %v39_v60, 0.0  ;;  %v40_v4 = vld [vmem:[%s1403_s0 + $0x3a] sm:$0x3] }
  0x1d   :  { %v136_v1 = vsel %vm75_vm0, %v31_v61, 0.0  ;;  %v32_v5 = vld [vmem:[%s1403_s0 + $0x2a] sm:$0x3]  ;;  %v163_v8 = vsel %vm75_vm0, %v40_v4, 0.0  ;;  %v44_v12 = vld [vmem:[%s1403_s0 + $0x42] sm:$0x3] }
  0x1e   :  { %v139_v9 = vsel %vm75_vm0, %v32_v5, 0.0  ;;  %v43_v13 = vld [vmem:[%s1403_s0 + $0x40] sm:$0x3]  ;;  %v175_v16 = vsel %vm75_vm0, %v44_v12, 0.0  ;;  %v52_v20 = vld [vmem:[%s1403_s0 + $0x52] sm:$0x3] }
  0x1f   :  { %152 = vadd.xlane.f32.xlu1 %v948_v32  ;;  %149 = vadd.xlane.f32.xlu0 %v951_v33  ;;  %v74_v32 = vld [vmem:[%s1403_s0 + $0x7e] sm:$0x3]  ;;  %v66_v33 = vld [vmem:[%s1403_s0 + $0x6e] sm:$0x3]  ;;  %v172_v17 = vsel %vm75_vm0, %v43_v13, 0.0  ;;  %v199_v24 = vsel %vm75_vm0, %v52_v20, 0.0 }
  0x20   :  { %v1154_v40 = vsel %vm75_vm0, %v74_v32, 0.0  ;;  %v1157_v41 = vsel %vm75_vm0, %v66_v33, 0.0  ;;  %v51_v21 = vld [vmem:[%s1403_s0 + $0x50] sm:$0x3]  ;;  %vm666_vm7 = vcmask 1046534   ;;  %vm668_vm8 = vcmask 1047559  }
  0x21   :  { %v196_v25 = vsel %vm75_vm0, %v51_v21, 0.0  ;;  %vm811_vm9 = vcmask 9216   ;;  %vm809_vm10 = vcmask 15360  }
  0x23   :  { %119 = vadd.xlane.f32.xlu1 %v954_v34  ;;  %95 = vadd.xlane.f32.xlu0 %v957_v35  ;;  %v97_v34 = vsel %vm75_vm0, %v18_v49, 0.0  ;;  %v38_v35 = vld [vmem:[%s1403_s0 + $0x36] sm:$0x3] }
  0x24   :  { %v157_v56 = vsel %vm75_vm0, %v38_v35, 0.0 }
  0x27   :  { %155 = vadd.xlane.f32.xlu1 %v154_v44  ;;  %131 = vadd.xlane.f32.xlu0 %v130_v45 }
  0x2b   :  { %122 = vadd.xlane.f32.xlu1 %v121_v52  ;;  %98 = vadd.xlane.f32.xlu0 %v97_v34 }
  0x2f   :  { %158 = vadd.xlane.f32.xlu1 %v157_v56  ;;  %134 = vadd.xlane.f32.xlu0 %v133_v57 }
  0x33   :  { %161 = vadd.xlane.f32.xlu1 %v160_v0  ;;  %137 = vadd.xlane.f32.xlu0 %v136_v1 }
  0x37   :  { %164 = vadd.xlane.f32.xlu1 %v163_v8  ;;  %140 = vadd.xlane.f32.xlu0 %v139_v9 }
  0x3b   :  { %176 = vadd.xlane.f32.xlu1 %v175_v16  ;;  %173 = vadd.xlane.f32.xlu0 %v172_v17 }
  0x3f   :  { %200 = vadd.xlane.f32.xlu1 %v199_v24  ;;  %197 = vadd.xlane.f32.xlu0 %v196_v25 }
  0x43   :  { %167 = vadd.xlane.f32.xlu1 %v966_v38  ;;  %143 = vadd.xlane.f32.xlu0 %v969_v39 }
  0x47   :  { %203 = vadd.xlane.f32.xlu1 %v978_v42  ;;  %179 = vadd.xlane.f32.xlu0 %v981_v43 }
  0x4b   :  { %170 = vadd.xlane.f32.xlu1 %v990_v46  ;;  %146 = vadd.xlane.f32.xlu0 %v993_v47  ;;  %v332_v46 = vld [vmem:[%s1404_s1] sm:$0xff] }
  0x4c   :  { %845 = vmatprep.mubr.msk.f32.mxu0 %vm727_vm1, %v332_v46 }
  0x4f   :  { %206 = vadd.xlane.f32.xlu1 %v1002_v50  ;;  %182 = vadd.xlane.f32.xlu0 %v1005_v51 }
  0x53   :  { %209 = vadd.xlane.f32.xlu1 %v1014_v54  ;;  %185 = vadd.xlane.f32.xlu0 %v1017_v55 }
  0x57   :  { %212 = vadd.xlane.f32.xlu1 %v1026_v58  ;;  %188 = vadd.xlane.f32.xlu0 %v1029_v59 }
  0x5b   :  { %224 = vadd.xlane.f32.xlu1 %v1038_v62  ;;  %221 = vadd.xlane.f32.xlu0 %v1041_v63  ;;  %v398_v63 = vlaneseq }
  0x5f   :  { %248 = vadd.xlane.f32.xlu1 %v1050_v2  ;;  %245 = vadd.xlane.f32.xlu0 %v1053_v3 }
  0x63   :  { %215 = vadd.xlane.f32.xlu1 %v1062_v6  ;;  %191 = vadd.xlane.f32.xlu0 %v1065_v7  ;;  %v399_v6 = vand.u32 127, %v398_v63  ;;  %v401_v7 = vshrl.u32 %v398_v63, 7 }
  0x67   :  { %251 = vadd.xlane.f32.xlu1 %v1074_v10  ;;  %227 = vadd.xlane.f32.xlu0 %v1077_v11 }
  0x6b   :  { %218 = vadd.xlane.f32.xlu1 %v1086_v14  ;;  %194 = vadd.xlane.f32.xlu0 %v1089_v15  ;;  %v1255_v14 = vsub.s32 %v399_v6, %v401_v7 }
  0x6f   :  { %254 = vadd.xlane.f32.xlu1 %v1098_v18  ;;  %230 = vadd.xlane.f32.xlu0 %v1101_v19 }
  0x73   :  { %257 = vadd.xlane.f32.xlu1 %v1110_v22  ;;  %233 = vadd.xlane.f32.xlu0 %v1113_v23 }
  0x77   :  { %260 = vadd.xlane.f32.xlu1 %v1124_v26  ;;  %236 = vadd.xlane.f32.xlu0 %v1127_v27 }
  0x7b   :  { %263 = vadd.xlane.f32.xlu1 %v1136_v30  ;;  %239 = vadd.xlane.f32.xlu0 %v1139_v31 }
  0x7f   :  { %266 = vadd.xlane.f32.xlu1 %v1154_v40  ;;  %242 = vadd.xlane.f32.xlu0 %v1157_v41 }
  0x90   :  { %v102_v38 = vpop.xlane.xlu1 %101  ;;  %v78_v39 = vpop.xlane.xlu0 %77 }
  0x91   :  { %v276_v27 = vmul.f32 0.0625, %v102_v38  ;;  %v268_v28 = vmul.f32 0.0625, %v78_v39 }
  0x93   :  { %v435_v34 = vrot.slane %v276_v27, %v1255_v14  ;;  %v403_v35 = vrot.slane %v268_v28, %v1255_v14 }
  0x94   :  { %v105_v42 = vpop.xlane.xlu1 %104  ;;  %v81_v43 = vpop.xlane.xlu0 %80 }
  0x95   :  { %v277_v15 = vmul.f32 0.0625, %v105_v42  ;;  %v269_v18 = vmul.f32 0.0625, %v81_v43 }
  0x97   :  { %v439_v33 = vrot.slane %v277_v15, %v1255_v14  ;;  %v407_v36 = vrot.slane %v269_v18, %v1255_v14 }
  0x98   :  { %v108_v47 = vpop.xlane.xlu1 %107  ;;  %v84_v50 = vpop.xlane.xlu0 %83 }
  0x99   :  { %v278_v19 = vmul.f32 0.0625, %v108_v47  ;;  %v270_v22 = vmul.f32 0.0625, %v84_v50  ;;  %v670_v61 = vsel %vm656_vm2, %v439_v33, %v435_v34  ;;  %v657_v0 = vsel %vm656_vm2, %v407_v36, %v403_v35 }
  0x9b   :  { %v443_v41 = vrot.slane %v278_v19, %v1255_v14  ;;  %v411_v44 = vrot.slane %v270_v22, %v1255_v14 }
  0x9c   :  { %v111_v51 = vpop.xlane.xlu1 %110  ;;  %v87_v54 = vpop.xlane.xlu0 %86 }
  0x9d   :  { %v279_v29 = vmul.f32 0.0625, %v111_v51  ;;  %v271_v30 = vmul.f32 0.0625, %v87_v54  ;;  %v671_v5 = vsel %vm658_vm3, %v443_v41, %v670_v61  ;;  %v659_v8 = vsel %vm658_vm3, %v411_v44, %v657_v0 }
  0x9f   :  { %v447_v53 = vrot.slane %v279_v29, %v1255_v14  ;;  %v415_v56 = vrot.slane %v271_v30, %v1255_v14 }
  0xa0   :  { %v114_v55 = vpop.xlane.xlu1 %113  ;;  %v90_v58 = vpop.xlane.xlu0 %89 }
  0xa1   :  { %v280_v31 = vmul.f32 0.0625, %v114_v55  ;;  %v272_v32 = vmul.f32 0.0625, %v90_v58  ;;  %v672_v17 = vsel %vm660_vm4, %v447_v53, %v671_v5  ;;  %v661_v20 = vsel %vm660_vm4, %v415_v56, %v659_v8 }
  0xa3   :  { %v451_v57 = vrot.slane %v280_v31, %v1255_v14  ;;  %v419_v60 = vrot.slane %v272_v32, %v1255_v14 }
  0xa4   :  { %v117_v59 = vpop.xlane.xlu1 %116  ;;  %v93_v62 = vpop.xlane.xlu0 %92 }
  0xa5   :  { %v281_v37 = vmul.f32 0.0625, %v117_v59  ;;  %v273_v40 = vmul.f32 0.0625, %v93_v62  ;;  %v673_v25 = vsel %vm662_vm5, %v451_v57, %v672_v17  ;;  %v663_v38 = vsel %vm662_vm5, %v419_v60, %v661_v20 }
  0xa7   :  { %v455_v1 = vrot.slane %v281_v37, %v1255_v14  ;;  %v423_v4 = vrot.slane %v273_v40, %v1255_v14 }
  0xa8   :  { %v1247_v2 = vpop.xlane.xlu1 %128  ;;  %v1249_v3 = vpop.xlane.xlu0 %125 }
  0xa9   :  { %v665_v43 = vsel %vm664_vm6, %v423_v4, %v663_v38  ;;  %v674_v46 = vsel %vm664_vm6, %v455_v1, %v673_v25 }
  0xac   :  { %v1251_v10 = vpop.xlane.xlu1 %152  ;;  %v1253_v11 = vpop.xlane.xlu0 %149 }
  0xad   :  { %v293_v27 = vmul.f32 0.0625, %v1251_v10  ;;  %v292_v28 = vmul.f32 0.0625, %v1253_v11 }
  0xb0   :  { %v120_v23 = vpop.xlane.xlu1 %119  ;;  %v96_v26 = vpop.xlane.xlu0 %95 }
  0xb1   :  { %v282_v45 = vmul.f32 0.0625, %v120_v23  ;;  %v274_v48 = vmul.f32 0.0625, %v96_v26  ;;  %v285_v23 = vmul.f32 0.0625, %v1247_v2  ;;  %v284_v26 = vmul.f32 0.0625, %v1249_v3 }
  0xb2   :  { %v503_v2 = vrot.slane %v293_v27, %v1255_v14  ;;  %v499_v3 = vrot.slane %v292_v28, %v1255_v14 }
  0xb3   :  { %v459_v9 = vrot.slane %v282_v45, %v1255_v14  ;;  %v427_v12 = vrot.slane %v274_v48, %v1255_v14  ;;  %v471_v37 = vrot.slane %v285_v23, %v1255_v14  ;;  %v467_v40 = vrot.slane %v284_v26, %v1255_v14 }
  0xb4   :  { %v156_v49 = vpop.xlane.xlu1 %155  ;;  %v132_v52 = vpop.xlane.xlu0 %131  ;;  %v684_v0 = vsel %vm656_vm2, %v503_v2, %v499_v3 }
  0xb5   :  { %v667_v51 = vsel %vm666_vm7, %v427_v12, %v665_v43  ;;  %v675_v54 = vsel %vm666_vm7, %v459_v9, %v674_v46  ;;  %v294_v29 = vmul.f32 0.0625, %v156_v49  ;;  %v286_v30 = vmul.f32 0.0625, %v132_v52 }
  0xb6   :  { %v677_v61 = vsel %vm656_vm2, %v471_v37, %v467_v40 }
  0xb7   :  { %v507_v11 = vrot.slane %v294_v29, %v1255_v14  ;;  %v475_v48 = vrot.slane %v286_v30, %v1255_v14 }
  0xb8   :  { %v123_v13 = vpop.xlane.xlu1 %122  ;;  %v99_v16 = vpop.xlane.xlu0 %98 }
  0xb9   :  { %v283_v21 = vmul.f32 0.0625, %v123_v13  ;;  %v275_v24 = vmul.f32 0.0625, %v99_v16  ;;  %v685_v5 = vsel %vm658_vm3, %v507_v11, %v684_v0  ;;  %v678_v8 = vsel %vm658_vm3, %v475_v48, %v677_v61 }
  0xbb   :  { %v463_v39 = vrot.slane %v283_v21, %v1255_v14  ;;  %v431_v42 = vrot.slane %v275_v24, %v1255_v14 }
  0xbc   :  { %v159_v47 = vpop.xlane.xlu1 %158  ;;  %v135_v50 = vpop.xlane.xlu0 %134 }
  0xbd   :  { %v669_v55 = vsel %vm668_vm8, %v431_v42, %v667_v51  ;;  %v676_v58 = vsel %vm668_vm8, %v463_v39, %v675_v54  ;;  %v295_v33 = vmul.f32 0.0625, %v159_v47  ;;  %v287_v36 = vmul.f32 0.0625, %v135_v50 }
  0xbe   :  { %v848_v59 = vpack.c.bf16 %v676_v58, %v669_v55 }
  0xbf   :  { %v511_v53 = vrot.slane %v295_v33, %v1255_v14  ;;  %v479_v56 = vrot.slane %v287_v36, %v1255_v14 }
  0xc0   :  { %v162_v62 = vpop.xlane.xlu1 %161  ;;  %849 = vmatprep.subr.bf16.mxu0 %v848_v59  ;;  %v138_v63 = vpop.xlane.xlu0 %137 }
  0xc1   :  { %851 = vmatpush3.bf16.msra.mxu0 %v848_v59  ;;  %v296_v41 = vmul.f32 0.0625, %v162_v62  ;;  %v288_v44 = vmul.f32 0.0625, %v138_v63  ;;  %v686_v17 = vsel %vm660_vm4, %v511_v53, %v685_v5  ;;  %v679_v20 = vsel %vm660_vm4, %v479_v56, %v678_v8 }
  0xc3   :  { %v515_v57 = vrot.slane %v296_v41, %v1255_v14  ;;  %v483_v60 = vrot.slane %v288_v44, %v1255_v14 }
  0xc4   :  { %v165_v6 = vpop.xlane.xlu1 %164  ;;  %v141_v7 = vpop.xlane.xlu0 %140 }
  0xc5   :  { %v297_v45 = vmul.f32 0.0625, %v165_v6  ;;  %v289_v10 = vmul.f32 0.0625, %v141_v7  ;;  %v687_v25 = vsel %vm662_vm5, %v515_v57, %v686_v17  ;;  %v680_v38 = vsel %vm662_vm5, %v483_v60, %v679_v20 }
  0xc7   :  { %v519_v1 = vrot.slane %v297_v45, %v1255_v14  ;;  %v487_v4 = vrot.slane %v289_v10, %v1255_v14 }
  0xc8   :  { %v1287_v15 = vpop.xlane.xlu1 %176  ;;  %v1289_v18 = vpop.xlane.xlu0 %173 }
  0xc9   :  { %v688_v39 = vsel %vm664_vm6, %v519_v1, %v687_v25  ;;  %v681_v42 = vsel %vm664_vm6, %v487_v4, %v680_v38  ;;  %v301_v29 = vmul.f32 0.0625, %v1287_v15  ;;  %v300_v30 = vmul.f32 0.0625, %v1289_v18 }
  0xcb   :  { %v535_v2 = vrot.slane %v301_v29, %v1255_v14  ;;  %v531_v3 = vrot.slane %v300_v30, %v1255_v14 }
  0xcc   :  { %v1291_v19 = vpop.xlane.xlu1 %200  ;;  %v1293_v22 = vpop.xlane.xlu0 %197 }
  0xcd   :  { %v691_v61 = vsel %vm656_vm2, %v535_v2, %v531_v3 }
  0xd0   :  { %v168_v31 = vpop.xlane.xlu1 %167  ;;  %v144_v32 = vpop.xlane.xlu0 %143 }
  0xd1   :  { %v298_v49 = vmul.f32 0.0625, %v168_v31  ;;  %v290_v52 = vmul.f32 0.0625, %v144_v32  ;;  %v309_v31 = vmul.f32 0.0625, %v1291_v19  ;;  %v308_v32 = vmul.f32 0.0625, %v1293_v22 }
  0xd3   :  { %v523_v9 = vrot.slane %v298_v49, %v1255_v14  ;;  %v491_v12 = vrot.slane %v290_v52, %v1255_v14  ;;  %v567_v15 = vrot.slane %v309_v31, %v1255_v14  ;;  %v563_v18 = vrot.slane %v308_v32, %v1255_v14 }
  0xd4   :  { %v204_v34 = vpop.xlane.xlu1 %203  ;;  %v180_v35 = vpop.xlane.xlu0 %179 }
  0xd5   :  { %v689_v47 = vsel %vm666_vm7, %v523_v9, %v688_v39  ;;  %v682_v50 = vsel %vm666_vm7, %v491_v12, %v681_v42  ;;  %v310_v33 = vmul.f32 0.0625, %v204_v34  ;;  %v302_v36 = vmul.f32 0.0625, %v180_v35 }
  0xd6   :  { %v698_v0 = vsel %vm656_vm2, %v567_v15, %v563_v18 }
  0xd7   :  { %v571_v22 = vrot.slane %v310_v33, %v1255_v14  ;;  %v539_v48 = vrot.slane %v302_v36, %v1255_v14 }
  0xd8   :  { %v171_v13 = vpop.xlane.xlu1 %170  ;;  %v147_v16 = vpop.xlane.xlu0 %146 }
  0xd9   :  { %v299_v21 = vmul.f32 0.0625, %v171_v13  ;;  %v291_v24 = vmul.f32 0.0625, %v147_v16  ;;  %v699_v5 = vsel %vm658_vm3, %v571_v22, %v698_v0  ;;  %v692_v8 = vsel %vm658_vm3, %v539_v48, %v691_v61 }
  0xdb   :  { %v527_v43 = vrot.slane %v299_v21, %v1255_v14  ;;  %v495_v46 = vrot.slane %v291_v24, %v1255_v14 }
  0xdc   :  { %v207_v51 = vpop.xlane.xlu1 %206  ;;  %v183_v54 = vpop.xlane.xlu0 %182 }
  0xdd   :  { %v683_v55 = vsel %vm668_vm8, %v495_v46, %v682_v50  ;;  %v690_v58 = vsel %vm668_vm8, %v527_v43, %v689_v47  ;;  %v311_v41 = vmul.f32 0.0625, %v207_v51  ;;  %v303_v44 = vmul.f32 0.0625, %v183_v54 }
  0xde   :  { %v852_v59 = vpack.c.bf16 %v690_v58, %v683_v55 }
  0xdf   :  { %v575_v53 = vrot.slane %v311_v41, %v1255_v14  ;;  %v543_v56 = vrot.slane %v303_v44, %v1255_v14 }
  0xe0   :  { %v210_v62 = vpop.xlane.xlu1 %209  ;;  %853 = vmatprep.subr.bf16.mxu0 %v852_v59  ;;  %v186_v63 = vpop.xlane.xlu0 %185 }
  0xe1   :  { %855 = vmatpush3.bf16.msra.mxu0 %v852_v59  ;;  %v312_v45 = vmul.f32 0.0625, %v210_v62  ;;  %v304_v10 = vmul.f32 0.0625, %v186_v63  ;;  %v700_v17 = vsel %vm660_vm4, %v575_v53, %v699_v5  ;;  %v693_v20 = vsel %vm660_vm4, %v543_v56, %v692_v8 }
  0xe3   :  { %v579_v57 = vrot.slane %v312_v45, %v1255_v14  ;;  %v547_v60 = vrot.slane %v304_v10, %v1255_v14 }
  0xe4   :  { %v213_v6 = vpop.xlane.xlu1 %212  ;;  %v189_v7 = vpop.xlane.xlu0 %188 }
  0xe5   :  { %v313_v11 = vmul.f32 0.0625, %v213_v6  ;;  %v305_v19 = vmul.f32 0.0625, %v189_v7  ;;  %v701_v25 = vsel %vm662_vm5, %v579_v57, %v700_v17  ;;  %v694_v38 = vsel %vm662_vm5, %v547_v60, %v693_v20 }
  0xe7   :  { %v583_v1 = vrot.slane %v313_v11, %v1255_v14  ;;  %v551_v4 = vrot.slane %v305_v19, %v1255_v14 }
  0xe8   :  { %v225_v23 = vpop.xlane.xlu1 %224  ;;  %v222_v26 = vpop.xlane.xlu0 %221 }
  0xe9   :  { %v702_v39 = vsel %vm664_vm6, %v583_v1, %v701_v25  ;;  %v695_v42 = vsel %vm664_vm6, %v551_v4, %v694_v38  ;;  %v317_v6 = vmul.f32 0.0625, %v225_v23  ;;  %v316_v7 = vmul.f32 0.0625, %v222_v26 }
  0xeb   :  { %v599_v41 = vrot.slane %v317_v6, %v1255_v14  ;;  %v595_v44 = vrot.slane %v316_v7, %v1255_v14 }
  0xec   :  { %v249_v27 = vpop.xlane.xlu1 %248  ;;  %v246_v28 = vpop.xlane.xlu0 %245 }
  0xed   :  { %v325_v29 = vmul.f32 0.0625, %v249_v27  ;;  %v324_v30 = vmul.f32 0.0625, %v246_v28 }
  0xef   :  { %v631_v45 = vrot.slane %v325_v29, %v1255_v14  ;;  %v627_v10 = vrot.slane %v324_v30, %v1255_v14 }
  0xf0   :  { %v216_v37 = vpop.xlane.xlu1 %215  ;;  %v192_v40 = vpop.xlane.xlu0 %191 }
  0xf1   :  { %v314_v49 = vmul.f32 0.0625, %v216_v37  ;;  %v306_v52 = vmul.f32 0.0625, %v192_v40 }
  0xf3   :  { %v587_v9 = vrot.slane %v314_v49, %v1255_v14  ;;  %v555_v12 = vrot.slane %v306_v52, %v1255_v14 }
  0xf4   :  { %v252_v34 = vpop.xlane.xlu1 %251  ;;  %v228_v35 = vpop.xlane.xlu0 %227 }
  0xf5   :  { %v703_v47 = vsel %vm666_vm7, %v587_v9, %v702_v39  ;;  %v696_v50 = vsel %vm666_vm7, %v555_v12, %v695_v42  ;;  %v326_v31 = vmul.f32 0.0625, %v252_v34  ;;  %v318_v32 = vmul.f32 0.0625, %v228_v35 }
  0xf6   :  { %v705_v34 = vsel %vm656_vm2, %v599_v41, %v595_v44  ;;  %v712_v35 = vsel %vm656_vm2, %v631_v45, %v627_v10 }
  0xf7   :  { %v635_v27 = vrot.slane %v326_v31, %v1255_v14  ;;  %v603_v28 = vrot.slane %v318_v32, %v1255_v14 }
  0xf8   :  { %v219_v13 = vpop.xlane.xlu1 %218  ;;  %v195_v16 = vpop.xlane.xlu0 %194 }
  0xf9   :  { %v315_v21 = vmul.f32 0.0625, %v219_v13  ;;  %v307_v24 = vmul.f32 0.0625, %v195_v16  ;;  %v713_v57 = vsel %vm658_vm3, %v635_v27, %v712_v35  ;;  %v706_v60 = vsel %vm658_vm3, %v603_v28, %v705_v34 }
  0xfb   :  { %v591_v43 = vrot.slane %v315_v21, %v1255_v14  ;;  %v559_v46 = vrot.slane %v307_v24, %v1255_v14 }
  0xfc   :  { %v255_v51 = vpop.xlane.xlu1 %254  ;;  %v231_v54 = vpop.xlane.xlu0 %230 }
  0xfd   :  { %v697_v55 = vsel %vm668_vm8, %v559_v46, %v696_v50  ;;  %v704_v58 = vsel %vm668_vm8, %v591_v43, %v703_v47  ;;  %v327_v37 = vmul.f32 0.0625, %v255_v51  ;;  %v319_v40 = vmul.f32 0.0625, %v231_v54  ;;  %v333_v46 = vld [vmem:[%s1404_s1 + $0x8] sm:$0x3] }
  0xfe   :  { %v856_v59 = vpack.c.bf16 %v704_v58, %v697_v55 }
  0xff   :  { %v639_v11 = vrot.slane %v327_v37, %v1255_v14  ;;  %v607_v19 = vrot.slane %v319_v40, %v1255_v14 }
 0x100   :  { %v258_v62 = vpop.xlane.xlu1 %257  ;;  %857 = vmatprep.subr.bf16.mxu0 %v856_v59  ;;  %v234_v63 = vpop.xlane.xlu0 %233 }
 0x101   :  { %859 = vmatpush3.bf16.msra.mxu0 %v856_v59  ;;  %v328_v2 = vmul.f32 0.0625, %v258_v62  ;;  %v320_v3 = vmul.f32 0.0625, %v234_v63  ;;  %v714_v5 = vsel %vm660_vm4, %v639_v11, %v713_v57  ;;  %v707_v8 = vsel %vm660_vm4, %v607_v19, %v706_v60 }
 0x103   :  { %v643_v49 = vrot.slane %v328_v2, %v1255_v14  ;;  %v611_v52 = vrot.slane %v320_v3, %v1255_v14 }
 0x104   :  { %v261_v33 = vpop.xlane.xlu1 %260  ;;  %v237_v36 = vpop.xlane.xlu0 %236 }
 0x105   :  { %v329_v23 = vmul.f32 0.0625, %v261_v33  ;;  %v321_v26 = vmul.f32 0.0625, %v237_v36  ;;  %v715_v13 = vsel %vm662_vm5, %v643_v49, %v714_v5  ;;  %v708_v16 = vsel %vm662_vm5, %v611_v52, %v707_v8 }
 0x107   :  { %v647_v53 = vrot.slane %v329_v23, %v1255_v14  ;;  %v615_v56 = vrot.slane %v321_v26, %v1255_v14 }
 0x108   :  { %v264_v15 = vpop.xlane.xlu1 %263  ;;  %v240_v18 = vpop.xlane.xlu0 %239 }
 0x109   :  { %v330_v22 = vmul.f32 0.0625, %v264_v15  ;;  %v322_v48 = vmul.f32 0.0625, %v240_v18  ;;  %v716_v17 = vsel %vm664_vm6, %v647_v53, %v715_v13  ;;  %v709_v20 = vsel %vm664_vm6, %v615_v56, %v708_v16 }
 0x10b   :  { %v651_v61 = vrot.slane %v330_v22, %v1255_v14  ;;  %v619_v0 = vrot.slane %v322_v48, %v1255_v14 }
 0x10c   :  { %v267_v1 = vpop.xlane.xlu1 %266  ;;  %v243_v4 = vpop.xlane.xlu0 %242 }
 0x10d   :  { %v331_v9 = vmul.f32 0.0625, %v267_v1  ;;  %v323_v12 = vmul.f32 0.0625, %v243_v4  ;;  %v717_v25 = vsel %vm666_vm7, %v651_v61, %v716_v17  ;;  %v710_v38 = vsel %vm666_vm7, %v619_v0, %v709_v20 }
 0x10f   :  { %v655_v21 = vrot.slane %v331_v9, %v1255_v14  ;;  %v623_v24 = vrot.slane %v323_v12, %v1255_v14 }
 0x111   :  { %v711_v39 = vsel %vm668_vm8, %v623_v24, %v710_v38  ;;  %v718_v42 = vsel %vm668_vm8, %v655_v21, %v717_v25 }
 0x112   :  { %v860_v43 = vpack.c.bf16 %v718_v42, %v711_v39 }
 0x114   :  { %861 = vmatprep.subr.bf16.mxu0 %v860_v43 }
 0x115   :  { %863 = vmatpush3.bf16.msra.mxu0 %v860_v43 }
 0x118   :  { %846 = vmatmul.mubr.msk.f32.vlgmr.msra.gmra.mrb[0].mxu0 %vm727_vm1, %v333_v46 }
 0x1eb   :  { %v847_v14 = vpop.f32.mrb[0].mxu0 }
 0x1ec   :  { %812 = vst.msk [vmem:[%s1405_s2 + $0x8] sm:$0x3] %vm811_vm9, %v847_v14  ;;  %v800_v47 = vpop.f32.mrb[1].mxu0 }
 0x1ed   :  { %810 = vst.msk [vmem:[%s1405_s2] sm:$0xff] %vm809_vm10, %v800_v47 }

</bundles_post_ra>
